<compile_context>
chip_gen: v7x
topology: tpu7x:2x2x1
jax: 0.10.0
libtpu: 0.0.40
codegen_flags: <defaults>
</compile_context>

<pallas_src>
import math
import functools

import jax
import jax.numpy as jnp
from jax.experimental import pallas as pl
from jax.experimental.pallas import tpu as pltpu

_EPS = 1e-5                      # BatchNorm2d default eps
_VMEM_LIMIT = 32 * 1024 * 1024   # explicit scoped-VMEM budget (portable to v7x)
_LANE = 128


def _vmem_full():
    # whole array resident in VMEM (all tensors in this toy config are tiny)
    return pl.BlockSpec(memory_space=pltpu.MemorySpace.VMEM)


def _round_up(x, m):
    return ((x + m - 1) // m) * m


# ---------------------------------------------------------------------------
# Kernel 1: head block  ConvT(nz, C0, 4, 1, 0) on 1x1 input  + BN + ReLU
#   Pure dense matmul:  y[b, (oc,ky,kx)] = sum_ic z[b,ic] * w[ic,oc,ky,kx]
#   Lane-dense output slab (B, C0*16); grouped BN stats via 0/1 group matmuls.
# ---------------------------------------------------------------------------
def _head_bn_relu_kernel(z_ref, w_ref, g_ref, b_ref, gsum_ref, gbc_ref, o_ref,
                         *, inv_count):
    # z: (B, nz) bf16 ; w: (nz, C0*16) bf16 ; g/b: (1, C0) f32
    # gsum: (C0*16, C0) f32 ; gbc: (C0, C0*16) f32 ; o: (B, C0*16) bf16
    y = jnp.dot(z_ref[...], w_ref[...], preferred_element_type=jnp.float32)

    cs = jnp.sum(y, axis=0, keepdims=True)          # (1, C0*16) sum over batch
    csq = jnp.sum(y * y, axis=0, keepdims=True)
    s = jnp.dot(cs, gsum_ref[...], preferred_element_type=jnp.float32)   # (1, C0)
    sq = jnp.dot(csq, gsum_ref[...], preferred_element_type=jnp.float32)

    mean = s * inv_count
    var = sq * inv_count - mean * mean               # biased var (PyTorch train)
    scale = g_ref[...] * jax.lax.rsqrt(var + _EPS)   # (1, C0)
    shift = b_ref[...] - mean * scale
    # broadcast per-channel scale/shift back to the (oc,ky,kx) columns
    scale_c = jnp.dot(scale, gbc_ref[...], preferred_element_type=jnp.float32)
    shift_c = jnp.dot(shift, gbc_ref[...], preferred_element_type=jnp.float32)

    o_ref[...] = jnp.maximum(y * scale_c + shift_c, 0.0).astype(o_ref.dtype)


def _head_layer(noise, w_ct, gamma, beta):
    # noise: (B, nz, 1, 1) f32 ; w_ct: (nz, C0, 4, 4) PyTorch ConvT layout.
    B, nz = noise.shape[0], noise.shape[1]
    C0 = w_ct.shape[1]
    z = noise.reshape(B, nz).astype(jnp.bfloat16)
    w_mat = w_ct.reshape(nz, C0 * 16).astype(jnp.bfloat16)   # col = oc*16+ky*4+kx
    eye = jnp.eye(C0, dtype=jnp.float32)
    gsum = jnp.repeat(eye, 16, axis=0)                       # (C0*16, C0)
    gbc = jnp.repeat(eye, 16, axis=1)                        # (C0, C0*16)

    kern = functools.partial(_head_bn_relu_kernel, inv_count=1.0 / (16.0 * B))
    y = pl.pallas_call(
        kern,
        out_shape=jax.ShapeDtypeStruct((B, C0 * 16), jnp.bfloat16),
        in_specs=[_vmem_full()] * 6,
        out_specs=_vmem_full(),
        compiler_params=pltpu.CompilerParams(vmem_limit_bytes=_VMEM_LIMIT),
    )(z, w_mat, gamma.reshape(1, C0), beta.reshape(1, C0), gsum, gbc)

    # -> channel-major spatial map (C0, B, 4, 4), bf16
    return y.reshape(B, C0, 4, 4).transpose(1, 0, 2, 3)


# ---------------------------------------------------------------------------
# Kernels 2/3: ConvT(Cin, Cout, 4, 2, 1) via sub-pixel phase decomposition.
#
# Output pixel (2a+py, 2b+px) only uses 2x2 input taps and 2x2 kernel taps:
#   py=0: (dy, ky) in [(-1,3), (0,1)]     py=1: (dy, ky) in [(0,2), (1,0)]
# The input is stored as a flat, zero-padded, margined buffer
#   xbuf: (Cin, M + Lpad + M)   with Hp=H+2, Wp=W+2, M=Wp+1,
#   L = B*Hp*Wp, Lpad = round_up(L, 128)
# so every tap is a static slice xbuf[:, M + dy*Wp + dx : ... + Lpad].
# Border / tail positions of the padded grid produce garbage values that are
# masked out of the BN statistics and discarded by the wrapper.
# ---------------------------------------------------------------------------
_TAPDEFS = {0: [(-1, 3), (0, 1)], 1: [(0, 2), (1, 0)]}   # (spatial shift, kernel idx)


def _phase_weights_and_offsets(w_ct, Wp, M):
    # w_ct: (Cin, Cout, 4, 4) PyTorch ConvTranspose2d weight.
    assert w_ct.shape[2] == 4 and w_ct.shape[3] == 4
    wlist, offs = [], []
    for py in range(2):
        for px in range(2):
            wrow, orow = [], []
            for (dy, ky) in _TAPDEFS[py]:
                for (dx, kx) in _TAPDEFS[px]:
                    wrow.append(jnp.transpose(w_ct[:, :, ky, kx]))  # (Cout, Cin)
                    orow.append(M + dy * Wp + dx)                   # python int
            wlist.append(jnp.stack(wrow, axis=0))
            offs.append(orow)
    wmats = jnp.stack(wlist, axis=0).astype(jnp.bfloat16)           # (4,4,Cout,Cin)
    return wmats, offs


def _flat_padded_input(x):
    # x: (Cin, B, H, W) -> flat padded + margined + lane-padded buffer, bf16
    Cin, B, H, W = x.shape
    Hp, Wp = H + 2, W + 2
    L = B * Hp * Wp
    Lpad = _round_up(L, _LANE)
    M = Wp + 1
    xp = jnp.pad(x, ((0, 0), (0, 0), (1, 1), (1, 1))).reshape(Cin, L)
    xbuf = jnp.pad(xp, ((0, 0), (M, M + (Lpad - L)))).astype(jnp.bfloat16)
    return xbuf, L, Lpad, M, Hp, Wp


def _valid_mask(B, H, W, Lpad):
    Hp, Wp = H + 2, W + 2
    L = B * Hp * Wp
    m = jnp.zeros((B, Hp, Wp), jnp.float32).at[:, 1:1 + H, 1:1 + W].set(1.0)
    m = m.reshape(1, L)
    return jnp.pad(m, ((0, 0), (0, Lpad - L)))


def _interleave_phases(o, B, H, W, L):
    # o: (4, Cout, Lpad); phase index = py*2 + px; only first L flat cols valid.
    Cout = o.shape[1]
    Hp, Wp = H + 2, W + 2
    o = o[:, :, :L].reshape(4, Cout, B, Hp, Wp)[:, :, :, 1:1 + H, 1:1 + W]
    o = o.reshape(2, 2, Cout, B, H, W).transpose(2, 3, 4, 0, 5, 1)
    return o.reshape(Cout, B, 2 * H, 2 * W)


def _convt2x_bn_relu_kernel(x_ref, w_ref, g_ref, b_ref, mask_ref, o_ref,
                            *, offsets, inv_count):
    # x: (Cin, Lbuf) bf16 ; w: (4, 4, tc, Cin) bf16 ; g/b: (tc, 1) f32
    # mask: (1, Lpad) f32 ; o: (4, tc, Lpad) bf16
    tc = o_ref.shape[1]
    lp = o_ref.shape[2]
    mask = mask_ref[...]

    ys = []
    ssum = jnp.zeros((tc, 1), jnp.float32)
    ssq = jnp.zeros((tc, 1), jnp.float32)
    for ph in range(4):
        acc = jnp.zeros((tc, lp), jnp.float32)
        for t in range(4):
            start = offsets[ph][t]
            acc = acc + jnp.dot(w_ref[ph, t], x_ref[:, start:start + lp],
                                preferred_element_type=jnp.float32)
        ys.append(acc)
        am = acc * mask
        ssum = ssum + jnp.sum(am, axis=1, keepdims=True)
        ssq = ssq + jnp.sum(am * acc, axis=1, keepdims=True)

    mean = ssum * inv_count
    var = ssq * inv_count - mean * mean              # biased var (PyTorch train)
    scale = g_ref[...] * jax.lax.rsqrt(var + _EPS)   # single-FMA BN
    shift = b_ref[...] - mean * scale
    for ph in range(4):
        o_ref[ph] = jnp.maximum(ys[ph] * scale + shift, 0.0).astype(o_ref.dtype)


def _convt2x_tanh_kernel(x_ref, w_ref, o_ref, *, offsets):
    co = o_ref.shape[1]
    lp = o_ref.shape[2]
    for ph in range(4):
        acc = jnp.zeros((co, lp), jnp.float32)
        for t in range(4):
            start = offsets[ph][t]
            acc = acc + jnp.dot(w_ref[ph, t], x_ref[:, start:start + lp],
                                preferred_element_type=jnp.float32)
        o_ref[ph] = jnp.tanh(acc).astype(o_ref.dtype)


def _pick_channel_tile(cout):
    # 2 grid steps when possible (feeds both TensorCores on megacore parts
    # while keeping per-step overhead minimal for these tiny layers).
    if cout % 2 == 0 and (cout // 2) % 16 == 0:
        return cout // 2
    if cout % 16 == 0:
        return 16
    return cout


def _convt2x_bn_relu(x, w_ct, gamma, beta):
    # x: (Cin, B, H, W) channel-major -> (Cout, B, 2H, 2W) channel-major, bf16
    Cin, B, H, W = x.shape
    Cout = w_ct.shape[1]
    xbuf, L, Lpad, M, Hp, Wp = _flat_padded_input(x)
    wmats, offs = _phase_weights_and_offsets(w_ct, Wp, M)
    mask = _valid_mask(B, H, W, Lpad)

    TC = _pick_channel_tile(Cout)
    grid = (Cout // TC,)
    Lbuf = xbuf.shape[1]
    kern = functools.partial(_convt2x_bn_relu_kernel, offsets=offs,
                             inv_count=1.0 / (4.0 * B * H * W))
    out = pl.pallas_call(
        kern,
        out_shape=jax.ShapeDtypeStruct((4, Cout, Lpad), jnp.bfloat16),
        grid=grid,
        in_specs=[
            pl.BlockSpec((Cin, Lbuf), lambda i: (0, 0)),
            pl.BlockSpec((4, 4, TC, Cin), lambda i: (0, 0, i, 0)),
            pl.BlockSpec((TC, 1), lambda i: (i, 0)),
            pl.BlockSpec((TC, 1), lambda i: (i, 0)),
            pl.BlockSpec((1, Lpad), lambda i: (0, 0)),
        ],
        out_specs=pl.BlockSpec((4, TC, Lpad), lambda i: (0, i, 0)),
        compiler_params=pltpu.CompilerParams(
            dimension_semantics=("parallel",),
            vmem_limit_bytes=_VMEM_LIMIT),
    )(xbuf, wmats, gamma.reshape(Cout, 1), beta.reshape(Cout, 1), mask)
    return _interleave_phases(out, B, H, W, L)


def _convt2x_tanh(x, w_ct):
    Cin, B, H, W = x.shape
    Cout = w_ct.shape[1]
    xbuf, L, Lpad, M, Hp, Wp = _flat_padded_input(x)
    wmats, offs = _phase_weights_and_offsets(w_ct, Wp, M)
    kern = functools.partial(_convt2x_tanh_kernel, offsets=offs)
    out = pl.pallas_call(
        kern,
        out_shape=jax.ShapeDtypeStruct((4, Cout, Lpad), jnp.float32),
        in_specs=[_vmem_full(), _vmem_full()],
        out_specs=_vmem_full(),
        compiler_params=pltpu.CompilerParams(vmem_limit_bytes=_VMEM_LIMIT),
    )(xbuf, wmats)
    return _interleave_phases(out, B, H, W, L)


# ---------------------------------------------------------------- model -----
def make_image_generator_params(key, nz, ngf, nc, img_size):
    """DCGAN-style init: ConvT weights ~ N(0, .02); BN gamma ~ N(1, .02), beta=0."""
    num_blocks = math.ceil(math.log(img_size // 8, 2))
    layer_defs = [(nz, ngf * 2 ** num_blocks)]               # ConvT(.., 4, 1, 0)
    for i in range(num_blocks):
        nf = ngf * 2 ** (num_blocks - i)
        layer_defs.append((nf, nf // 2))                     # ConvT(.., 4, 2, 1)
    blocks = []
    for (cin, cout) in layer_defs:
        key, kw, kg = jax.random.split(key, 3)
        blocks.append({
            "w": 0.02 * jax.random.normal(kw, (cin, cout, 4, 4), jnp.float32),
            "gamma": 1.0 + 0.02 * jax.random.normal(kg, (cout,), jnp.float32),
            "beta": jnp.zeros((cout,), jnp.float32),
        })
    key, kw = jax.random.split(key)
    end = {"w": 0.02 * jax.random.normal(kw, (ngf, nc, 4, 4), jnp.float32)}
    return {"blocks": blocks, "end": end}


def image_generator_forward(noise, params):
    # noise: (B, nz, 1, 1) NCHW, like the PyTorch module.
    blk0 = params["blocks"][0]
    x = _head_layer(noise, blk0["w"], blk0["gamma"], blk0["beta"])   # (C0, B, 4, 4)
    for blk in params["blocks"][1:]:
        x = _convt2x_bn_relu(x, blk["w"], blk["gamma"], blk["beta"])
    y = _convt2x_tanh(x, params["end"]["w"])                         # (nc, B, S, S)
    return jnp.transpose(y, (1, 0, 2, 3))                            # NCHW


# ---------------------------------------------------------------- main ------
if __name__ == "__main__":
    # Small but structurally faithful config: num_blocks = ceil(log2(32//8)) = 2
    B, NZ, NGF, NC, IMG = 2, 32, 16, 3, 32

    key = jax.random.PRNGKey(0)
    key, knoise = jax.random.split(key)
    params = make_image_generator_params(key, NZ, NGF, NC, IMG)
    noise = jax.random.normal(knoise, (B, NZ, 1, 1), jnp.float32)

    fwd = jax.jit(image_generator_forward)
    out = jax.block_until_ready(fwd(noise, params))

    assert out.shape == (B, NC, IMG, IMG), out.shape
    assert bool(jnp.all(jnp.isfinite(out)))
    assert bool(jnp.all(jnp.abs(out) <= 1.0 + 1e-6))  # tanh range
    print("KERNEL_OK")
</pallas_src>

<mosaic_0001>
module attributes {stable_mosaic.version = 11 : i64} {
  func.func @_head_bn_relu_kernel(%arg0: memref<2x32xbf16, #tpu.memory_space<vmem>>, %arg1: memref<32x1024xbf16, #tpu.memory_space<vmem>>, %arg2: memref<1x64xf32, #tpu.memory_space<vmem>>, %arg3: memref<1x64xf32, #tpu.memory_space<vmem>>, %arg4: memref<1024x64xf32, #tpu.memory_space<vmem>>, %arg5: memref<64x1024xf32, #tpu.memory_space<vmem>>, %arg6: memref<2x1024xbf16, #tpu.memory_space<vmem>>) attributes {dimension_semantics = [], scalar_prefetch = 0 : i64, scratch_operands = 0 : i64, tpu.core_type = #tpu.core_type<tc>} {
    %c0 = arith.constant 0 : index
    %c0_0 = arith.constant 0 : index
    %0 = vector.load %arg0[%c0, %c0_0] : memref<2x32xbf16, #tpu.memory_space<vmem>>, vector<2x32xbf16>
    %c0_1 = arith.constant 0 : index
    %c0_2 = arith.constant 0 : index
    %1 = vector.load %arg1[%c0_1, %c0_2] : memref<32x1024xbf16, #tpu.memory_space<vmem>>, vector<32x1024xbf16>
    %cst = arith.constant dense<0.000000e+00> : vector<2x1024xf32>
    %2 = tpu.matmul %0, %1, %cst {dimension_numbers = #tpu.dot_dimension_numbers<[1], [0], [0], [1], [0, 0, 1, 1], [], []>} : vector<2x32xbf16>, vector<32x1024xbf16>, vector<2x1024xf32> -> vector<2x1024xf32>
    %cst_3 = arith.constant dense<0.000000e+00> : vector<1024xf32>
    %3 = vector.multi_reduction <add>, %2, %cst_3 [0] : vector<2x1024xf32> to vector<1024xf32>
    %4 = vector.shape_cast %3 : vector<1024xf32> to vector<1x1024xf32>
    %5 = arith.mulf %2, %2 : vector<2x1024xf32>
    %cst_4 = arith.constant dense<0.000000e+00> : vector<1024xf32>
    %6 = vector.multi_reduction <add>, %5, %cst_4 [0] : vector<2x1024xf32> to vector<1024xf32>
    %7 = vector.shape_cast %6 : vector<1024xf32> to vector<1x1024xf32>
    %c0_5 = arith.constant 0 : index
    %c0_6 = arith.constant 0 : index
    %8 = vector.load %arg4[%c0_5, %c0_6] : memref<1024x64xf32, #tpu.memory_space<vmem>>, vector<1024x64xf32>
    %cst_7 = arith.constant dense<0.000000e+00> : vector<1x64xf32>
    %9 = tpu.matmul %4, %8, %cst_7 {dimension_numbers = #tpu.dot_dimension_numbers<[1], [0], [0], [1], [0, 0, 1, 1], [], []>} : vector<1x1024xf32>, vector<1024x64xf32>, vector<1x64xf32> -> vector<1x64xf32>
    %c0_8 = arith.constant 0 : index
    %c0_9 = arith.constant 0 : index
    %10 = vector.load %arg4[%c0_8, %c0_9] : memref<1024x64xf32, #tpu.memory_space<vmem>>, vector<1024x64xf32>
    %cst_10 = arith.constant dense<0.000000e+00> : vector<1x64xf32>
    %11 = tpu.matmul %7, %10, %cst_10 {dimension_numbers = #tpu.dot_dimension_numbers<[1], [0], [0], [1], [0, 0, 1, 1], [], []>} : vector<1x1024xf32>, vector<1024x64xf32>, vector<1x64xf32> -> vector<1x64xf32>
    %cst_11 = arith.constant 3.125000e-02 : f32
    %12 = vector.broadcast %cst_11 : f32 to vector<1x64xf32>
    %13 = arith.mulf %9, %12 : vector<1x64xf32>
    %cst_12 = arith.constant 3.125000e-02 : f32
    %14 = vector.broadcast %cst_12 : f32 to vector<1x64xf32>
    %15 = arith.mulf %11, %14 : vector<1x64xf32>
    %16 = arith.mulf %13, %13 : vector<1x64xf32>
    %17 = arith.subf %15, %16 : vector<1x64xf32>
    %c0_13 = arith.constant 0 : index
    %c0_14 = arith.constant 0 : index
    %18 = vector.load %arg2[%c0_13, %c0_14] : memref<1x64xf32, #tpu.memory_space<vmem>>, vector<1x64xf32>
    %cst_15 = arith.constant 9.99999974E-6 : f32
    %19 = vector.broadcast %cst_15 : f32 to vector<1x64xf32>
    %20 = arith.addf %17, %19 : vector<1x64xf32>
    %21 = math.rsqrt %20 : vector<1x64xf32>
    %22 = arith.mulf %18, %21 : vector<1x64xf32>
    %c0_16 = arith.constant 0 : index
    %c0_17 = arith.constant 0 : index
    %23 = vector.load %arg3[%c0_16, %c0_17] : memref<1x64xf32, #tpu.memory_space<vmem>>, vector<1x64xf32>
    %24 = arith.mulf %13, %22 : vector<1x64xf32>
    %25 = arith.subf %23, %24 : vector<1x64xf32>
    %c0_18 = arith.constant 0 : index
    %c0_19 = arith.constant 0 : index
    %26 = vector.load %arg5[%c0_18, %c0_19] : memref<64x1024xf32, #tpu.memory_space<vmem>>, vector<64x1024xf32>
    %cst_20 = arith.constant dense<0.000000e+00> : vector<1x1024xf32>
    %27 = tpu.matmul %22, %26, %cst_20 {dimension_numbers = #tpu.dot_dimension_numbers<[1], [0], [0], [1], [0, 0, 1, 1], [], []>} : vector<1x64xf32>, vector<64x1024xf32>, vector<1x1024xf32> -> vector<1x1024xf32>
    %c0_21 = arith.constant 0 : index
    %c0_22 = arith.constant 0 : index
    %28 = vector.load %arg5[%c0_21, %c0_22] : memref<64x1024xf32, #tpu.memory_space<vmem>>, vector<64x1024xf32>
    %cst_23 = arith.constant dense<0.000000e+00> : vector<1x1024xf32>
    %29 = tpu.matmul %25, %28, %cst_23 {dimension_numbers = #tpu.dot_dimension_numbers<[1], [0], [0], [1], [0, 0, 1, 1], [], []>} : vector<1x64xf32>, vector<64x1024xf32>, vector<1x1024xf32> -> vector<1x1024xf32>
    %30 = vector.broadcast %27 : vector<1x1024xf32> to vector<2x1024xf32>
    %31 = arith.mulf %2, %30 : vector<2x1024xf32>
    %32 = vector.broadcast %29 : vector<1x1024xf32> to vector<2x1024xf32>
    %33 = arith.addf %31, %32 : vector<2x1024xf32>
    %cst_24 = arith.constant 0.000000e+00 : f32
    %34 = vector.broadcast %cst_24 : f32 to vector<2x1024xf32>
    %35 = arith.maximumf %33, %34 : vector<2x1024xf32>
    %36 = arith.truncf %35 : vector<2x1024xf32> to vector<2x1024xbf16>
    %c0_25 = arith.constant 0 : index
    %c0_26 = arith.constant 0 : index
    %37 = vector.load %arg6[%c0_25, %c0_26] : memref<2x1024xbf16, #tpu.memory_space<vmem>>, vector<2x1024xbf16>
    tpu.vector_store %arg6[%c0_25, %c0_26], %36 {strides = array<i32>} : memref<2x1024xbf16, #tpu.memory_space<vmem>>, vector<2x1024xbf16>,
    return
  }
}

module attributes {stable_mosaic.version = 11 : i64} {
  func.func @_convt2x_bn_relu_kernel(%arg0: i32, %arg1: memref<64x142xbf16, #tpu.memory_space<vmem>>, %arg2: memref<4x4x16x64xbf16, #tpu.memory_space<vmem>>, %arg3: memref<16x1xf32, #tpu.memory_space<vmem>>, %arg4: memref<16x1xf32, #tpu.memory_space<vmem>>, %arg5: memref<1x128xf32, #tpu.memory_space<vmem>>, %arg6: memref<4x16x128xbf16, #tpu.memory_space<vmem>>) attributes {dimension_semantics = [#tpu.dimension_semantics<parallel>], iteration_bounds = array<i64: 2>, scalar_prefetch = 0 : i64, scratch_operands = 0 : i64, tpu.core_type = #tpu.core_type<tc>, window_params = [{pipeline_mode = #tpu.pipeline_mode<synchronous>, transform_indices = @transform_0, window_bounds = array<i64: 64, 142>}, {transform_indices = @transform_1, window_bounds = array<i64: 4, 4, 16, 64>}, {transform_indices = @transform_2, window_bounds = array<i64: 16, 1>}, {transform_indices = @transform_3, window_bounds = array<i64: 16, 1>}, {pipeline_mode = #tpu.pipeline_mode<synchronous>, transform_indices = @transform_4, window_bounds = array<i64: 1, 128>}, {transform_indices = @transform_5, window_bounds = array<i64: 4, 16, 128>}]} {
    %c0 = arith.constant 0 : index
    %c0_0 = arith.constant 0 : index
    %0 = vector.load %arg5[%c0, %c0_0] : memref<1x128xf32, #tpu.memory_space<vmem>>, vector<1x128xf32>
    %cst = arith.constant 0.000000e+00 : f32
    %1 = vector.broadcast %cst : f32 to vector<16x1xf32>
    %cst_1 = arith.constant 0.000000e+00 : f32
    %2 = vector.broadcast %cst_1 : f32 to vector<16x1xf32>
    %cst_2 = arith.constant 0.000000e+00 : f32
    %3 = vector.broadcast %cst_2 : f32 to vector<16x128xf32>
    %c0_3 = arith.constant 0 : index
    %c0_4 = arith.constant 0 : index
    %c0_5 = arith.constant 0 : index
    %c0_6 = arith.constant 0 : index
    %4 = vector.load %arg2[%c0_3, %c0_4, %c0_5, %c0_6] : memref<4x4x16x64xbf16, #tpu.memory_space<vmem>>, vector<1x1x16x64xbf16>
    %5 = vector.shape_cast %4 : vector<1x1x16x64xbf16> to vector<16x64xbf16>
    %c0_7 = arith.constant 0 : index
    %c0_8 = arith.constant 0 : index
    %6 = vector.load %arg1[%c0_7, %c0_8] : memref<64x142xbf16, #tpu.memory_space<vmem>>, vector<64x128xbf16>
    %cst_9 = arith.constant dense<0.000000e+00> : vector<16x128xf32>
    %7 = tpu.matmul %5, %6, %cst_9 {dimension_numbers = #tpu.dot_dimension_numbers<[1], [0], [0], [1], [0, 0, 1, 1], [], []>} : vector<16x64xbf16>, vector<64x128xbf16>, vector<16x128xf32> -> vector<16x128xf32>
    %8 = arith.addf %3, %7 : vector<16x128xf32>
    %c0_10 = arith.constant 0 : index
    %c1 = arith.constant 1 : index
    %c0_11 = arith.constant 0 : index
    %c0_12 = arith.constant 0 : index
    %9 = vector.load %arg2[%c0_10, %c1, %c0_11, %c0_12] : memref<4x4x16x64xbf16, #tpu.memory_space<vmem>>, vector<1x1x16x64xbf16>
    %10 = vector.shape_cast %9 : vector<1x1x16x64xbf16> to vector<16x64xbf16>
    %c0_13 = arith.constant 0 : index
    %c1_14 = arith.constant 1 : index
    %11 = vector.load %arg1[%c0_13, %c1_14] : memref<64x142xbf16, #tpu.memory_space<vmem>>, vector<64x128xbf16>
    %cst_15 = arith.constant dense<0.000000e+00> : vector<16x128xf32>
    %12 = tpu.matmul %10, %11, %cst_15 {dimension_numbers = #tpu.dot_dimension_numbers<[1], [0], [0], [1], [0, 0, 1, 1], [], []>} : vector<16x64xbf16>, vector<64x128xbf16>, vector<16x128xf32> -> vector<16x128xf32>
    %13 = arith.addf %8, %12 : vector<16x128xf32>
    %c0_16 = arith.constant 0 : index
    %c2 = arith.constant 2 : index
    %c0_17 = arith.constant 0 : index
    %c0_18 = arith.constant 0 : index
    %14 = vector.load %arg2[%c0_16, %c2, %c0_17, %c0_18] : memref<4x4x16x64xbf16, #tpu.memory_space<vmem>>, vector<1x1x16x64xbf16>
    %15 = vector.shape_cast %14 : vector<1x1x16x64xbf16> to vector<16x64xbf16>
    %c0_19 = arith.constant 0 : index
    %c6 = arith.constant 6 : index
    %16 = vector.load %arg1[%c0_19, %c6] : memref<64x142xbf16, #tpu.memory_space<vmem>>, vector<64x128xbf16>
    %cst_20 = arith.constant dense<0.000000e+00> : vector<16x128xf32>
    %17 = tpu.matmul %15, %16, %cst_20 {dimension_numbers = #tpu.dot_dimension_numbers<[1], [0], [0], [1], [0, 0, 1, 1], [], []>} : vector<16x64xbf16>, vector<64x128xbf16>, vector<16x128xf32> -> vector<16x128xf32>
    %18 = arith.addf %13, %17 : vector<16x128xf32>
    %c0_21 = arith.constant 0 : index
    %c3 = arith.constant 3 : index
    %c0_22 = arith.constant 0 : index
    %c0_23 = arith.constant 0 : index
    %19 = vector.load %arg2[%c0_21, %c3, %c0_22, %c0_23] : memref<4x4x16x64xbf16, #tpu.memory_space<vmem>>, vector<1x1x16x64xbf16>
    %20 = vector.shape_cast %19 : vector<1x1x16x64xbf16> to vector<16x64xbf16>
    %c0_24 = arith.constant 0 : index
    %c7 = arith.constant 7 : index
    %21 = vector.load %arg1[%c0_24, %c7] : memref<64x142xbf16, #tpu.memory_space<vmem>>, vector<64x128xbf16>
    %cst_25 = arith.constant dense<0.000000e+00> : vector<16x128xf32>
    %22 = tpu.matmul %20, %21, %cst_25 {dimension_numbers = #tpu.dot_dimension_numbers<[1], [0], [0], [1], [0, 0, 1, 1], [], []>} : vector<16x64xbf16>, vector<64x128xbf16>, vector<16x128xf32> -> vector<16x128xf32>
    %23 = arith.addf %18, %22 : vector<16x128xf32>
    %24 = vector.broadcast %0 : vector<1x128xf32> to vector<16x128xf32>
    %25 = arith.mulf %23, %24 : vector<16x128xf32>
    %cst_26 = arith.constant dense<0.000000e+00> : vector<16xf32>
    %26 = vector.multi_reduction <add>, %25, %cst_26 [1] : vector<16x128xf32> to vector<16xf32>
    %27 = vector.shape_cast %26 : vector<16xf32> to vector<16x1xf32>
    %28 = arith.addf %1, %27 : vector<16x1xf32>
    %29 = arith.mulf %25, %23 : vector<16x128xf32>
    %cst_27 = arith.constant dense<0.000000e+00> : vector<16xf32>
    %30 = vector.multi_reduction <add>, %29, %cst_27 [1] : vector<16x128xf32> to vector<16xf32>
    %31 = vector.shape_cast %30 : vector<16xf32> to vector<16x1xf32>
    %32 = arith.addf %2, %31 : vector<16x1xf32>
    %cst_28 = arith.constant 0.000000e+00 : f32
    %33 = vector.broadcast %cst_28 : f32 to vector<16x128xf32>
    %c1_29 = arith.constant 1 : index
    %c0_30 = arith.constant 0 : index
    %c0_31 = arith.constant 0 : index
    %c0_32 = arith.constant 0 : index
    %34 = vector.load %arg2[%c1_29, %c0_30, %c0_31, %c0_32] : memref<4x4x16x64xbf16, #tpu.memory_space<vmem>>, vector<1x1x16x64xbf16>
    %35 = vector.shape_cast %34 : vector<1x1x16x64xbf16> to vector<16x64xbf16>
    %c0_33 = arith.constant 0 : index
    %c1_34 = arith.constant 1 : index
    %36 = vector.load %arg1[%c0_33, %c1_34] : memref<64x142xbf16, #tpu.memory_space<vmem>>, vector<64x128xbf16>
    %cst_35 = arith.constant dense<0.000000e+00> : vector<16x128xf32>
    %37 = tpu.matmul %35, %36, %cst_35 {dimension_numbers = #tpu.dot_dimension_numbers<[1], [0], [0], [1], [0, 0, 1, 1], [], []>} : vector<16x64xbf16>, vector<64x128xbf16>, vector<16x128xf32> -> vector<16x128xf32>
    %38 = arith.addf %33, %37 : vector<16x128xf32>
    %c1_36 = arith.constant 1 : index
    %c1_37 = arith.constant 1 : index
    %c0_38 = arith.constant 0 : index
    %c0_39 = arith.constant 0 : index
    %39 = vector.load %arg2[%c1_36, %c1_37, %c0_38, %c0_39] : memref<4x4x16x64xbf16, #tpu.memory_space<vmem>>, vector<1x1x16x64xbf16>
    %40 = vector.shape_cast %39 : vector<1x1x16x64xbf16> to vector<16x64xbf16>
    %c0_40 = arith.constant 0 : index
    %c2_41 = arith.constant 2 : index
    %41 = vector.load %arg1[%c0_40, %c2_41] : memref<64x142xbf16, #tpu.memory_space<vmem>>, vector<64x128xbf16>
    %cst_42 = arith.constant dense<0.000000e+00> : vector<16x128xf32>
    %42 = tpu.matmul %40, %41, %cst_42 {dimension_numbers = #tpu.dot_dimension_numbers<[1], [0], [0], [1], [0, 0, 1, 1], [], []>} : vector<16x64xbf16>, vector<64x128xbf16>, vector<16x128xf32> -> vector<16x128xf32>
    %43 = arith.addf %38, %42 : vector<16x128xf32>
    %c1_43 = arith.constant 1 : index
    %c2_44 = arith.constant 2 : index
    %c0_45 = arith.constant 0 : index
    %c0_46 = arith.constant 0 : index
    %44 = vector.load %arg2[%c1_43, %c2_44, %c0_45, %c0_46] : memref<4x4x16x64xbf16, #tpu.memory_space<vmem>>, vector<1x1x16x64xbf16>
    %45 = vector.shape_cast %44 : vector<1x1x16x64xbf16> to vector<16x64xbf16>
    %c0_47 = arith.constant 0 : index
    %c7_48 = arith.constant 7 : index
    %46 = vector.load %arg1[%c0_47, %c7_48] : memref<64x142xbf16, #tpu.memory_space<vmem>>, vector<64x128xbf16>
    %cst_49 = arith.constant dense<0.000000e+00> : vector<16x128xf32>
    %47 = tpu.matmul %45, %46, %cst_49 {dimension_numbers = #tpu.dot_dimension_numbers<[1], [0], [0], [1], [0, 0, 1, 1], [], []>} : vector<16x64xbf16>, vector<64x128xbf16>, vector<16x128xf32> -> vector<16x128xf32>
    %48 = arith.addf %43, %47 : vector<16x128xf32>
    %c1_50 = arith.constant 1 : index
    %c3_51 = arith.constant 3 : index
    %c0_52 = arith.constant 0 : index
    %c0_53 = arith.constant 0 : index
    %49 = vector.load %arg2[%c1_50, %c3_51, %c0_52, %c0_53] : memref<4x4x16x64xbf16, #tpu.memory_space<vmem>>, vector<1x1x16x64xbf16>
    %50 = vector.shape_cast %49 : vector<1x1x16x64xbf16> to vector<16x64xbf16>
    %c0_54 = arith.constant 0 : index
    %c8 = arith.constant 8 : index
    %51 = vector.load %arg1[%c0_54, %c8] : memref<64x142xbf16, #tpu.memory_space<vmem>>, vector<64x128xbf16>
    %cst_55 = arith.constant dense<0.000000e+00> : vector<16x128xf32>
    %52 = tpu.matmul %50, %51, %cst_55 {dimension_numbers = #tpu.dot_dimension_numbers<[1], [0], [0], [1], [0, 0, 1, 1], [], []>} : vector<16x64xbf16>, vector<64x128xbf16>, vector<16x128xf32> -> vector<16x128xf32>
    %53 = arith.addf %48, %52 : vector<16x128xf32>
    %54 = vector.broadcast %0 : vector<1x128xf32> to vector<16x128xf32>
    %55 = arith.mulf %53, %54 : vector<16x128xf32>
    %cst_56 = arith.constant dense<0.000000e+00> : vector<16xf32>
    %56 = vector.multi_reduction <add>, %55, %cst_56 [1] : vector<16x128xf32> to vector<16xf32>
    %57 = vector.shape_cast %56 : vector<16xf32> to vector<16x1xf32>
    %58 = arith.addf %28, %57 : vector<16x1xf32>
    %59 = arith.mulf %55, %53 : vector<16x128xf32>
    %cst_57 = arith.constant dense<0.000000e+00> : vector<16xf32>
    %60 = vector.multi_reduction <add>, %59, %cst_57 [1] : vector<16x128xf32> to vector<16xf32>
    %61 = vector.shape_cast %60 : vector<16xf32> to vector<16x1xf32>
    %62 = arith.addf %32, %61 : vector<16x1xf32>
    %cst_58 = arith.constant 0.000000e+00 : f32
    %63 = vector.broadcast %cst_58 : f32 to vector<16x128xf32>
    %c2_59 = arith.constant 2 : index
    %c0_60 = arith.constant 0 : index
    %c0_61 = arith.constant 0 : index
    %c0_62 = arith.constant 0 : index
    %64 = vector.load %arg2[%c2_59, %c0_60, %c0_61, %c0_62] : memref<4x4x16x64xbf16, #tpu.memory_space<vmem>>, vector<1x1x16x64xbf16>
    %65 = vector.shape_cast %64 : vector<1x1x16x64xbf16> to vector<16x64xbf16>
    %c0_63 = arith.constant 0 : index
    %c6_64 = arith.constant 6 : index
    %66 = vector.load %arg1[%c0_63, %c6_64] : memref<64x142xbf16, #tpu.memory_space<vmem>>, vector<64x128xbf16>
    %cst_65 = arith.constant dense<0.000000e+00> : vector<16x128xf32>
    %67 = tpu.matmul %65, %66, %cst_65 {dimension_numbers = #tpu.dot_dimension_numbers<[1], [0], [0], [1], [0, 0, 1, 1], [], []>} : vector<16x64xbf16>, vector<64x128xbf16>, vector<16x128xf32> -> vector<16x128xf32>
    %68 = arith.addf %63, %67 : vector<16x128xf32>
    %c2_66 = arith.constant 2 : index
    %c1_67 = arith.constant 1 : index
    %c0_68 = arith.constant 0 : index
    %c0_69 = arith.constant 0 : index
    %69 = vector.load %arg2[%c2_66, %c1_67, %c0_68, %c0_69] : memref<4x4x16x64xbf16, #tpu.memory_space<vmem>>, vector<1x1x16x64xbf16>
    %70 = vector.shape_cast %69 : vector<1x1x16x64xbf16> to vector<16x64xbf16>
    %c0_70 = arith.constant 0 : index
    %c7_71 = arith.constant 7 : index
    %71 = vector.load %arg1[%c0_70, %c7_71] : memref<64x142xbf16, #tpu.memory_space<vmem>>, vector<64x128xbf16>
    %cst_72 = arith.constant dense<0.000000e+00> : vector<16x128xf32>
    %72 = tpu.matmul %70, %71, %cst_72 {dimension_numbers = #tpu.dot_dimension_numbers<[1], [0], [0], [1], [0, 0, 1, 1], [], []>} : vector<16x64xbf16>, vector<64x128xbf16>, vector<16x128xf32> -> vector<16x128xf32>
    %73 = arith.addf %68, %72 : vector<16x128xf32>
    %c2_73 = arith.constant 2 : index
    %c2_74 = arith.constant 2 : index
    %c0_75 = arith.constant 0 : index
    %c0_76 = arith.constant 0 : index
    %74 = vector.load %arg2[%c2_73, %c2_74, %c0_75, %c0_76] : memref<4x4x16x64xbf16, #tpu.memory_space<vmem>>, vector<1x1x16x64xbf16>
    %75 = vector.shape_cast %74 : vector<1x1x16x64xbf16> to vector<16x64xbf16>
    %c0_77 = arith.constant 0 : index
    %c12 = arith.constant 12 : index
    %76 = vector.load %arg1[%c0_77, %c12] : memref<64x142xbf16, #tpu.memory_space<vmem>>, vector<64x128xbf16>
    %cst_78 = arith.constant dense<0.000000e+00> : vector<16x128xf32>
    %77 = tpu.matmul %75, %76, %cst_78 {dimension_numbers = #tpu.dot_dimension_numbers<[1], [0], [0], [1], [0, 0, 1, 1], [], []>} : vector<16x64xbf16>, vector<64x128xbf16>, vector<16x128xf32> -> vector<16x128xf32>
    %78 = arith.addf %73, %77 : vector<16x128xf32>
    %c2_79 = arith.constant 2 : index
    %c3_80 = arith.constant 3 : index
    %c0_81 = arith.constant 0 : index
    %c0_82 = arith.constant 0 : index
    %79 = vector.load %arg2[%c2_79, %c3_80, %c0_81, %c0_82] : memref<4x4x16x64xbf16, #tpu.memory_space<vmem>>, vector<1x1x16x64xbf16>
    %80 = vector.shape_cast %79 : vector<1x1x16x64xbf16> to vector<16x64xbf16>
    %c0_83 = arith.constant 0 : index
    %c13 = arith.constant 13 : index
    %81 = vector.load %arg1[%c0_83, %c13] : memref<64x142xbf16, #tpu.memory_space<vmem>>, vector<64x128xbf16>
    %cst_84 = arith.constant dense<0.000000e+00> : vector<16x128xf32>
    %82 = tpu.matmul %80, %81, %cst_84 {dimension_numbers = #tpu.dot_dimension_numbers<[1], [0], [0], [1], [0, 0, 1, 1], [], []>} : vector<16x64xbf16>, vector<64x128xbf16>, vector<16x128xf32> -> vector<16x128xf32>
    %83 = arith.addf %78, %82 : vector<16x128xf32>
    %84 = vector.broadcast %0 : vector<1x128xf32> to vector<16x128xf32>
    %85 = arith.mulf %83, %84 : vector<16x128xf32>
    %cst_85 = arith.constant dense<0.000000e+00> : vector<16xf32>
    %86 = vector.multi_reduction <add>, %85, %cst_85 [1] : vector<16x128xf32> to vector<16xf32>
    %87 = vector.shape_cast %86 : vector<16xf32> to vector<16x1xf32>
    %88 = arith.addf %58, %87 : vector<16x1xf32>
    %89 = arith.mulf %85, %83 : vector<16x128xf32>
    %cst_86 = arith.constant dense<0.000000e+00> : vector<16xf32>
    %90 = vector.multi_reduction <add>, %89, %cst_86 [1] : vector<16x128xf32> to vector<16xf32>
    %91 = vector.shape_cast %90 : vector<16xf32> to vector<16x1xf32>
    %92 = arith.addf %62, %91 : vector<16x1xf32>
    %cst_87 = arith.constant 0.000000e+00 : f32
    %93 = vector.broadcast %cst_87 : f32 to vector<16x128xf32>
    %c3_88 = arith.constant 3 : index
    %c0_89 = arith.constant 0 : index
    %c0_90 = arith.constant 0 : index
    %c0_91 = arith.constant 0 : index
    %94 = vector.load %arg2[%c3_88, %c0_89, %c0_90, %c0_91] : memref<4x4x16x64xbf16, #tpu.memory_space<vmem>>, vector<1x1x16x64xbf16>
    %95 = vector.shape_cast %94 : vector<1x1x16x64xbf16> to vector<16x64xbf16>
    %c0_92 = arith.constant 0 : index
    %c7_93 = arith.constant 7 : index
    %96 = vector.load %arg1[%c0_92, %c7_93] : memref<64x142xbf16, #tpu.memory_space<vmem>>, vector<64x128xbf16>
    %cst_94 = arith.constant dense<0.000000e+00> : vector<16x128xf32>
    %97 = tpu.matmul %95, %96, %cst_94 {dimension_numbers = #tpu.dot_dimension_numbers<[1], [0], [0], [1], [0, 0, 1, 1], [], []>} : vector<16x64xbf16>, vector<64x128xbf16>, vector<16x128xf32> -> vector<16x128xf32>
    %98 = arith.addf %93, %97 : vector<16x128xf32>
    %c3_95 = arith.constant 3 : index
    %c1_96 = arith.constant 1 : index
    %c0_97 = arith.constant 0 : index
    %c0_98 = arith.constant 0 : index
    %99 = vector.load %arg2[%c3_95, %c1_96, %c0_97, %c0_98] : memref<4x4x16x64xbf16, #tpu.memory_space<vmem>>, vector<1x1x16x64xbf16>
    %100 = vector.shape_cast %99 : vector<1x1x16x64xbf16> to vector<16x64xbf16>
    %c0_99 = arith.constant 0 : index
    %c8_100 = arith.constant 8 : index
    %101 = vector.load %arg1[%c0_99, %c8_100] : memref<64x142xbf16, #tpu.memory_space<vmem>>, vector<64x128xbf16>
    %cst_101 = arith.constant dense<0.000000e+00> : vector<16x128xf32>
    %102 = tpu.matmul %100, %101, %cst_101 {dimension_numbers = #tpu.dot_dimension_numbers<[1], [0], [0], [1], [0, 0, 1, 1], [], []>} : vector<16x64xbf16>, vector<64x128xbf16>, vector<16x128xf32> -> vector<16x128xf32>
    %103 = arith.addf %98, %102 : vector<16x128xf32>
    %c3_102 = arith.constant 3 : index
    %c2_103 = arith.constant 2 : index
    %c0_104 = arith.constant 0 : index
    %c0_105 = arith.constant 0 : index
    %104 = vector.load %arg2[%c3_102, %c2_103, %c0_104, %c0_105] : memref<4x4x16x64xbf16, #tpu.memory_space<vmem>>, vector<1x1x16x64xbf16>
    %105 = vector.shape_cast %104 : vector<1x1x16x64xbf16> to vector<16x64xbf16>
    %c0_106 = arith.constant 0 : index
    %c13_107 = arith.constant 13 : index
    %106 = vector.load %arg1[%c0_106, %c13_107] : memref<64x142xbf16, #tpu.memory_space<vmem>>, vector<64x128xbf16>
    %cst_108 = arith.constant dense<0.000000e+00> : vector<16x128xf32>
    %107 = tpu.matmul %105, %106, %cst_108 {dimension_numbers = #tpu.dot_dimension_numbers<[1], [0], [0], [1], [0, 0, 1, 1], [], []>} : vector<16x64xbf16>, vector<64x128xbf16>, vector<16x128xf32> -> vector<16x128xf32>
    %108 = arith.addf %103, %107 : vector<16x128xf32>
    %c3_109 = arith.constant 3 : index
    %c3_110 = arith.constant 3 : index
    %c0_111 = arith.constant 0 : index
    %c0_112 = arith.constant 0 : index
    %109 = vector.load %arg2[%c3_109, %c3_110, %c0_111, %c0_112] : memref<4x4x16x64xbf16, #tpu.memory_space<vmem>>, vector<1x1x16x64xbf16>
    %110 = vector.shape_cast %109 : vector<1x1x16x64xbf16> to vector<16x64xbf16>
    %c0_113 = arith.constant 0 : index
    %c14 = arith.constant 14 : index
    %111 = vector.load %arg1[%c0_113, %c14] : memref<64x142xbf16, #tpu.memory_space<vmem>>, vector<64x128xbf16>
    %cst_114 = arith.constant dense<0.000000e+00> : vector<16x128xf32>
    %112 = tpu.matmul %110, %111, %cst_114 {dimension_numbers = #tpu.dot_dimension_numbers<[1], [0], [0], [1], [0, 0, 1, 1], [], []>} : vector<16x64xbf16>, vector<64x128xbf16>, vector<16x128xf32> -> vector<16x128xf32>
    %113 = arith.addf %108, %112 : vector<16x128xf32>
    %114 = vector.broadcast %0 : vector<1x128xf32> to vector<16x128xf32>
    %115 = arith.mulf %113, %114 : vector<16x128xf32>
    %cst_115 = arith.constant dense<0.000000e+00> : vector<16xf32>
    %116 = vector.multi_reduction <add>, %115, %cst_115 [1] : vector<16x128xf32> to vector<16xf32>
    %117 = vector.shape_cast %116 : vector<16xf32> to vector<16x1xf32>
    %118 = arith.addf %88, %117 : vector<16x1xf32>
    %119 = arith.mulf %115, %113 : vector<16x128xf32>
    %cst_116 = arith.constant dense<0.000000e+00> : vector<16xf32>
    %120 = vector.multi_reduction <add>, %119, %cst_116 [1] : vector<16x128xf32> to vector<16xf32>
    %121 = vector.shape_cast %120 : vector<16xf32> to vector<16x1xf32>
    %122 = arith.addf %92, %121 : vector<16x1xf32>
    %cst_117 = arith.constant 7.812500e-03 : f32
    %123 = vector.broadcast %cst_117 : f32 to vector<16x1xf32>
    %124 = arith.mulf %118, %123 : vector<16x1xf32>
    %cst_118 = arith.constant 7.812500e-03 : f32
    %125 = vector.broadcast %cst_118 : f32 to vector<16x1xf32>
    %126 = arith.mulf %122, %125 : vector<16x1xf32>
    %127 = arith.mulf %124, %124 : vector<16x1xf32>
    %128 = arith.subf %126, %127 : vector<16x1xf32>
    %c0_119 = arith.constant 0 : index
    %c0_120 = arith.constant 0 : index
    %129 = vector.load %arg3[%c0_119, %c0_120] : memref<16x1xf32, #tpu.memory_space<vmem>>, vector<16x1xf32>
    %cst_121 = arith.constant 9.99999974E-6 : f32
    %130 = vector.broadcast %cst_121 : f32 to vector<16x1xf32>
    %131 = arith.addf %128, %130 : vector<16x1xf32>
    %132 = math.rsqrt %131 : vector<16x1xf32>
    %133 = arith.mulf %129, %132 : vector<16x1xf32>
    %c0_122 = arith.constant 0 : index
    %c0_123 = arith.constant 0 : index
    %134 = vector.load %arg4[%c0_122, %c0_123] : memref<16x1xf32, #tpu.memory_space<vmem>>, vector<16x1xf32>
    %135 = arith.mulf %124, %133 : vector<16x1xf32>
    %136 = arith.subf %134, %135 : vector<16x1xf32>
    %137 = vector.broadcast %133 : vector<16x1xf32> to vector<16x128xf32>
    %138 = arith.mulf %23, %137 : vector<16x128xf32>
    %139 = vector.broadcast %136 : vector<16x1xf32> to vector<16x128xf32>
    %140 = arith.addf %138, %139 : vector<16x128xf32>
    %cst_124 = arith.constant 0.000000e+00 : f32
    %141 = vector.broadcast %cst_124 : f32 to vector<16x128xf32>
    %142 = arith.maximumf %140, %141 : vector<16x128xf32>
    %143 = arith.truncf %142 : vector<16x128xf32> to vector<16x128xbf16>
    %c0_125 = arith.constant 0 : index
    %c0_126 = arith.constant 0 : index
    %c0_127 = arith.constant 0 : index
    %144 = vector.load %arg6[%c0_125, %c0_126, %c0_127] : memref<4x16x128xbf16, #tpu.memory_space<vmem>>, vector<1x16x128xbf16>
    %145 = vector.shape_cast %144 : vector<1x16x128xbf16> to vector<16x128xbf16>
    %146 = vector.shape_cast %143 : vector<16x128xbf16> to vector<1x16x128xbf16>
    tpu.vector_store %arg6[%c0_125, %c0_126, %c0_127], %146 {strides = array<i32>} : memref<4x16x128xbf16, #tpu.memory_space<vmem>>, vector<1x16x128xbf16>,
    %147 = vector.broadcast %133 : vector<16x1xf32> to vector<16x128xf32>
    %148 = arith.mulf %53, %147 : vector<16x128xf32>
    %149 = vector.broadcast %136 : vector<16x1xf32> to vector<16x128xf32>
    %150 = arith.addf %148, %149 : vector<16x128xf32>
    %cst_128 = arith.constant 0.000000e+00 : f32
    %151 = vector.broadcast %cst_128 : f32 to vector<16x128xf32>
    %152 = arith.maximumf %150, %151 : vector<16x128xf32>
    %153 = arith.truncf %152 : vector<16x128xf32> to vector<16x128xbf16>
    %c1_129 = arith.constant 1 : index
    %c0_130 = arith.constant 0 : index
    %c0_131 = arith.constant 0 : index
    %154 = vector.load %arg6[%c1_129, %c0_130, %c0_131] : memref<4x16x128xbf16, #tpu.memory_space<vmem>>, vector<1x16x128xbf16>
    %155 = vector.shape_cast %154 : vector<1x16x128xbf16> to vector<16x128xbf16>
    %156 = vector.shape_cast %153 : vector<16x128xbf16> to vector<1x16x128xbf16>
    tpu.vector_store %arg6[%c1_129, %c0_130, %c0_131], %156 {strides = array<i32>} : memref<4x16x128xbf16, #tpu.memory_space<vmem>>, vector<1x16x128xbf16>,
    %157 = vector.broadcast %133 : vector<16x1xf32> to vector<16x128xf32>
    %158 = arith.mulf %83, %157 : vector<16x128xf32>
    %159 = vector.broadcast %136 : vector<16x1xf32> to vector<16x128xf32>
    %160 = arith.addf %158, %159 : vector<16x128xf32>
    %cst_132 = arith.constant 0.000000e+00 : f32
    %161 = vector.broadcast %cst_132 : f32 to vector<16x128xf32>
    %162 = arith.maximumf %160, %161 : vector<16x128xf32>
    %163 = arith.truncf %162 : vector<16x128xf32> to vector<16x128xbf16>
    %c2_133 = arith.constant 2 : index
    %c0_134 = arith.constant 0 : index
    %c0_135 = arith.constant 0 : index
    %164 = vector.load %arg6[%c2_133, %c0_134, %c0_135] : memref<4x16x128xbf16, #tpu.memory_space<vmem>>, vector<1x16x128xbf16>
    %165 = vector.shape_cast %164 : vector<1x16x128xbf16> to vector<16x128xbf16>
    %166 = vector.shape_cast %163 : vector<16x128xbf16> to vector<1x16x128xbf16>
    tpu.vector_store %arg6[%c2_133, %c0_134, %c0_135], %166 {strides = array<i32>} : memref<4x16x128xbf16, #tpu.memory_space<vmem>>, vector<1x16x128xbf16>,
    %167 = vector.broadcast %133 : vector<16x1xf32> to vector<16x128xf32>
    %168 = arith.mulf %113, %167 : vector<16x128xf32>
    %169 = vector.broadcast %136 : vector<16x1xf32> to vector<16x128xf32>
    %170 = arith.addf %168, %169 : vector<16x128xf32>
    %cst_136 = arith.constant 0.000000e+00 : f32
    %171 = vector.broadcast %cst_136 : f32 to vector<16x128xf32>
    %172 = arith.maximumf %170, %171 : vector<16x128xf32>
    %173 = arith.truncf %172 : vector<16x128xf32> to vector<16x128xbf16>
    %c3_137 = arith.constant 3 : index
    %c0_138 = arith.constant 0 : index
    %c0_139 = arith.constant 0 : index
    %174 = vector.load %arg6[%c3_137, %c0_138, %c0_139] : memref<4x16x128xbf16, #tpu.memory_space<vmem>>, vector<1x16x128xbf16>
    %175 = vector.shape_cast %174 : vector<1x16x128xbf16> to vector<16x128xbf16>
    %176 = vector.shape_cast %173 : vector<16x128xbf16> to vector<1x16x128xbf16>
    tpu.vector_store %arg6[%c3_137, %c0_138, %c0_139], %176 {strides = array<i32>} : memref<4x16x128xbf16, #tpu.memory_space<vmem>>, vector<1x16x128xbf16>,
    return
  }
  func.func @transform_0(%arg0: i32) -> (i32, i32) {
    %c0_i32 = arith.constant 0 : i32
    %c0_i32_0 = arith.constant 0 : i32
    %c0_i32_1 = arith.constant 0 : i32
    return %c0_i32, %c0_i32_0 : i32, i32
  }
  func.func @transform_1(%arg0: i32) -> (i32, i32, i32, i32) {
    %c0_i32 = arith.constant 0 : i32
    %c0_i32_0 = arith.constant 0 : i32
    %c0_i32_1 = arith.constant 0 : i32
    %c0_i32_2 = arith.constant 0 : i32
    return %c0_i32, %c0_i32_0, %arg0, %c0_i32_1 : i32, i32, i32, i32
  }
  func.func @transform_2(%arg0: i32) -> (i32, i32) {
    %c0_i32 = arith.constant 0 : i32
    %c0_i32_0 = arith.constant 0 : i32
    return %arg0, %c0_i32 : i32, i32
  }
  func.func @transform_3(%arg0: i32) -> (i32, i32) {
    %c0_i32 = arith.constant 0 : i32
    %c0_i32_0 = arith.constant 0 : i32
    return %arg0, %c0_i32 : i32, i32
  }
  func.func @transform_4(%arg0: i32) -> (i32, i32) {
    %c0_i32 = arith.constant 0 : i32
    %c0_i32_0 = arith.constant 0 : i32
    %c0_i32_1 = arith.constant 0 : i32
    return %c0_i32, %c0_i32_0 : i32, i32
  }
  func.func @transform_5(%arg0: i32) -> (i32, i32, i32) {
    %c0_i32 = arith.constant 0 : i32
    %c0_i32_0 = arith.constant 0 : i32
    %c0_i32_1 = arith.constant 0 : i32
    return %c0_i32, %arg0, %c0_i32_0 : i32, i32, i32
  }
}

module attributes {stable_mosaic.version = 11 : i64} {
  func.func @_convt2x_bn_relu_kernel(%arg0: i32, %arg1: memref<32x278xbf16, #tpu.memory_space<vmem>>, %arg2: memref<4x4x16x32xbf16, #tpu.memory_space<vmem>>, %arg3: memref<16x1xf32, #tpu.memory_space<vmem>>, %arg4: memref<16x1xf32, #tpu.memory_space<vmem>>, %arg5: memref<1x256xf32, #tpu.memory_space<vmem>>, %arg6: memref<4x16x256xbf16, #tpu.memory_space<vmem>>) attributes {dimension_semantics = [#tpu.dimension_semantics<parallel>], iteration_bounds = array<i64: 1>, scalar_prefetch = 0 : i64, scratch_operands = 0 : i64, tpu.core_type = #tpu.core_type<tc>, window_params = [{pipeline_mode = #tpu.pipeline_mode<synchronous>, transform_indices = @transform_0, window_bounds = array<i64: 32, 278>}, {transform_indices = @transform_1, window_bounds = array<i64: 4, 4, 16, 32>}, {transform_indices = @transform_2, window_bounds = array<i64: 16, 1>}, {transform_indices = @transform_3, window_bounds = array<i64: 16, 1>}, {pipeline_mode = #tpu.pipeline_mode<synchronous>, transform_indices = @transform_4, window_bounds = array<i64: 1, 256>}, {transform_indices = @transform_5, window_bounds = array<i64: 4, 16, 256>}]} {
    %c0 = arith.constant 0 : index
    %c0_0 = arith.constant 0 : index
    %0 = vector.load %arg5[%c0, %c0_0] : memref<1x256xf32, #tpu.memory_space<vmem>>, vector<1x256xf32>
    %cst = arith.constant 0.000000e+00 : f32
    %1 = vector.broadcast %cst : f32 to vector<16x1xf32>
    %cst_1 = arith.constant 0.000000e+00 : f32
    %2 = vector.broadcast %cst_1 : f32 to vector<16x1xf32>
    %cst_2 = arith.constant 0.000000e+00 : f32
    %3 = vector.broadcast %cst_2 : f32 to vector<16x256xf32>
    %c0_3 = arith.constant 0 : index
    %c0_4 = arith.constant 0 : index
    %c0_5 = arith.constant 0 : index
    %c0_6 = arith.constant 0 : index
    %4 = vector.load %arg2[%c0_3, %c0_4, %c0_5, %c0_6] : memref<4x4x16x32xbf16, #tpu.memory_space<vmem>>, vector<1x1x16x32xbf16>
    %5 = vector.shape_cast %4 : vector<1x1x16x32xbf16> to vector<16x32xbf16>
    %c0_7 = arith.constant 0 : index
    %c0_8 = arith.constant 0 : index
    %6 = vector.load %arg1[%c0_7, %c0_8] : memref<32x278xbf16, #tpu.memory_space<vmem>>, vector<32x256xbf16>
    %cst_9 = arith.constant dense<0.000000e+00> : vector<16x256xf32>
    %7 = tpu.matmul %5, %6, %cst_9 {dimension_numbers = #tpu.dot_dimension_numbers<[1], [0], [0], [1], [0, 0, 1, 1], [], []>} : vector<16x32xbf16>, vector<32x256xbf16>, vector<16x256xf32> -> vector<16x256xf32>
    %8 = arith.addf %3, %7 : vector<16x256xf32>
    %c0_10 = arith.constant 0 : index
    %c1 = arith.constant 1 : index
    %c0_11 = arith.constant 0 : index
    %c0_12 = arith.constant 0 : index
    %9 = vector.load %arg2[%c0_10, %c1, %c0_11, %c0_12] : memref<4x4x16x32xbf16, #tpu.memory_space<vmem>>, vector<1x1x16x32xbf16>
    %10 = vector.shape_cast %9 : vector<1x1x16x32xbf16> to vector<16x32xbf16>
    %c0_13 = arith.constant 0 : index
    %c1_14 = arith.constant 1 : index
    %11 = vector.load %arg1[%c0_13, %c1_14] : memref<32x278xbf16, #tpu.memory_space<vmem>>, vector<32x256xbf16>
    %cst_15 = arith.constant dense<0.000000e+00> : vector<16x256xf32>
    %12 = tpu.matmul %10, %11, %cst_15 {dimension_numbers = #tpu.dot_dimension_numbers<[1], [0], [0], [1], [0, 0, 1, 1], [], []>} : vector<16x32xbf16>, vector<32x256xbf16>, vector<16x256xf32> -> vector<16x256xf32>
    %13 = arith.addf %8, %12 : vector<16x256xf32>
    %c0_16 = arith.constant 0 : index
    %c2 = arith.constant 2 : index
    %c0_17 = arith.constant 0 : index
    %c0_18 = arith.constant 0 : index
    %14 = vector.load %arg2[%c0_16, %c2, %c0_17, %c0_18] : memref<4x4x16x32xbf16, #tpu.memory_space<vmem>>, vector<1x1x16x32xbf16>
    %15 = vector.shape_cast %14 : vector<1x1x16x32xbf16> to vector<16x32xbf16>
    %c0_19 = arith.constant 0 : index
    %c10 = arith.constant 10 : index
    %16 = vector.load %arg1[%c0_19, %c10] : memref<32x278xbf16, #tpu.memory_space<vmem>>, vector<32x256xbf16>
    %cst_20 = arith.constant dense<0.000000e+00> : vector<16x256xf32>
    %17 = tpu.matmul %15, %16, %cst_20 {dimension_numbers = #tpu.dot_dimension_numbers<[1], [0], [0], [1], [0, 0, 1, 1], [], []>} : vector<16x32xbf16>, vector<32x256xbf16>, vector<16x256xf32> -> vector<16x256xf32>
    %18 = arith.addf %13, %17 : vector<16x256xf32>
    %c0_21 = arith.constant 0 : index
    %c3 = arith.constant 3 : index
    %c0_22 = arith.constant 0 : index
    %c0_23 = arith.constant 0 : index
    %19 = vector.load %arg2[%c0_21, %c3, %c0_22, %c0_23] : memref<4x4x16x32xbf16, #tpu.memory_space<vmem>>, vector<1x1x16x32xbf16>
    %20 = vector.shape_cast %19 : vector<1x1x16x32xbf16> to vector<16x32xbf16>
    %c0_24 = arith.constant 0 : index
    %c11 = arith.constant 11 : index
    %21 = vector.load %arg1[%c0_24, %c11] : memref<32x278xbf16, #tpu.memory_space<vmem>>, vector<32x256xbf16>
    %cst_25 = arith.constant dense<0.000000e+00> : vector<16x256xf32>
    %22 = tpu.matmul %20, %21, %cst_25 {dimension_numbers = #tpu.dot_dimension_numbers<[1], [0], [0], [1], [0, 0, 1, 1], [], []>} : vector<16x32xbf16>, vector<32x256xbf16>, vector<16x256xf32> -> vector<16x256xf32>
    %23 = arith.addf %18, %22 : vector<16x256xf32>
    %24 = vector.broadcast %0 : vector<1x256xf32> to vector<16x256xf32>
    %25 = arith.mulf %23, %24 : vector<16x256xf32>
    %cst_26 = arith.constant dense<0.000000e+00> : vector<16xf32>
    %26 = vector.multi_reduction <add>, %25, %cst_26 [1] : vector<16x256xf32> to vector<16xf32>
    %27 = vector.shape_cast %26 : vector<16xf32> to vector<16x1xf32>
    %28 = arith.addf %1, %27 : vector<16x1xf32>
    %29 = arith.mulf %25, %23 : vector<16x256xf32>
    %cst_27 = arith.constant dense<0.000000e+00> : vector<16xf32>
    %30 = vector.multi_reduction <add>, %29, %cst_27 [1] : vector<16x256xf32> to vector<16xf32>
    %31 = vector.shape_cast %30 : vector<16xf32> to vector<16x1xf32>
    %32 = arith.addf %2, %31 : vector<16x1xf32>
    %cst_28 = arith.constant 0.000000e+00 : f32
    %33 = vector.broadcast %cst_28 : f32 to vector<16x256xf32>
    %c1_29 = arith.constant 1 : index
    %c0_30 = arith.constant 0 : index
    %c0_31 = arith.constant 0 : index
    %c0_32 = arith.constant 0 : index
    %34 = vector.load %arg2[%c1_29, %c0_30, %c0_31, %c0_32] : memref<4x4x16x32xbf16, #tpu.memory_space<vmem>>, vector<1x1x16x32xbf16>
    %35 = vector.shape_cast %34 : vector<1x1x16x32xbf16> to vector<16x32xbf16>
    %c0_33 = arith.constant 0 : index
    %c1_34 = arith.constant 1 : index
    %36 = vector.load %arg1[%c0_33, %c1_34] : memref<32x278xbf16, #tpu.memory_space<vmem>>, vector<32x256xbf16>
    %cst_35 = arith.constant dense<0.000000e+00> : vector<16x256xf32>
    %37 = tpu.matmul %35, %36, %cst_35 {dimension_numbers = #tpu.dot_dimension_numbers<[1], [0], [0], [1], [0, 0, 1, 1], [], []>} : vector<16x32xbf16>, vector<32x256xbf16>, vector<16x256xf32> -> vector<16x256xf32>
    %38 = arith.addf %33, %37 : vector<16x256xf32>
    %c1_36 = arith.constant 1 : index
    %c1_37 = arith.constant 1 : index
    %c0_38 = arith.constant 0 : index
    %c0_39 = arith.constant 0 : index
    %39 = vector.load %arg2[%c1_36, %c1_37, %c0_38, %c0_39] : memref<4x4x16x32xbf16, #tpu.memory_space<vmem>>, vector<1x1x16x32xbf16>
    %40 = vector.shape_cast %39 : vector<1x1x16x32xbf16> to vector<16x32xbf16>
    %c0_40 = arith.constant 0 : index
    %c2_41 = arith.constant 2 : index
    %41 = vector.load %arg1[%c0_40, %c2_41] : memref<32x278xbf16, #tpu.memory_space<vmem>>, vector<32x256xbf16>
    %cst_42 = arith.constant dense<0.000000e+00> : vector<16x256xf32>
    %42 = tpu.matmul %40, %41, %cst_42 {dimension_numbers = #tpu.dot_dimension_numbers<[1], [0], [0], [1], [0, 0, 1, 1], [], []>} : vector<16x32xbf16>, vector<32x256xbf16>, vector<16x256xf32> -> vector<16x256xf32>
    %43 = arith.addf %38, %42 : vector<16x256xf32>
    %c1_43 = arith.constant 1 : index
    %c2_44 = arith.constant 2 : index
    %c0_45 = arith.constant 0 : index
    %c0_46 = arith.constant 0 : index
    %44 = vector.load %arg2[%c1_43, %c2_44, %c0_45, %c0_46] : memref<4x4x16x32xbf16, #tpu.memory_space<vmem>>, vector<1x1x16x32xbf16>
    %45 = vector.shape_cast %44 : vector<1x1x16x32xbf16> to vector<16x32xbf16>
    %c0_47 = arith.constant 0 : index
    %c11_48 = arith.constant 11 : index
    %46 = vector.load %arg1[%c0_47, %c11_48] : memref<32x278xbf16, #tpu.memory_space<vmem>>, vector<32x256xbf16>
    %cst_49 = arith.constant dense<0.000000e+00> : vector<16x256xf32>
    %47 = tpu.matmul %45, %46, %cst_49 {dimension_numbers = #tpu.dot_dimension_numbers<[1], [0], [0], [1], [0, 0, 1, 1], [], []>} : vector<16x32xbf16>, vector<32x256xbf16>, vector<16x256xf32> -> vector<16x256xf32>
    %48 = arith.addf %43, %47 : vector<16x256xf32>
    %c1_50 = arith.constant 1 : index
    %c3_51 = arith.constant 3 : index
    %c0_52 = arith.constant 0 : index
    %c0_53 = arith.constant 0 : index
    %49 = vector.load %arg2[%c1_50, %c3_51, %c0_52, %c0_53] : memref<4x4x16x32xbf16, #tpu.memory_space<vmem>>, vector<1x1x16x32xbf16>
    %50 = vector.shape_cast %49 : vector<1x1x16x32xbf16> to vector<16x32xbf16>
    %c0_54 = arith.constant 0 : index
    %c12 = arith.constant 12 : index
    %51 = vector.load %arg1[%c0_54, %c12] : memref<32x278xbf16, #tpu.memory_space<vmem>>, vector<32x256xbf16>
    %cst_55 = arith.constant dense<0.000000e+00> : vector<16x256xf32>
    %52 = tpu.matmul %50, %51, %cst_55 {dimension_numbers = #tpu.dot_dimension_numbers<[1], [0], [0], [1], [0, 0, 1, 1], [], []>} : vector<16x32xbf16>, vector<32x256xbf16>, vector<16x256xf32> -> vector<16x256xf32>
    %53 = arith.addf %48, %52 : vector<16x256xf32>
    %54 = vector.broadcast %0 : vector<1x256xf32> to vector<16x256xf32>
    %55 = arith.mulf %53, %54 : vector<16x256xf32>
    %cst_56 = arith.constant dense<0.000000e+00> : vector<16xf32>
    %56 = vector.multi_reduction <add>, %55, %cst_56 [1] : vector<16x256xf32> to vector<16xf32>
    %57 = vector.shape_cast %56 : vector<16xf32> to vector<16x1xf32>
    %58 = arith.addf %28, %57 : vector<16x1xf32>
    %59 = arith.mulf %55, %53 : vector<16x256xf32>
    %cst_57 = arith.constant dense<0.000000e+00> : vector<16xf32>
    %60 = vector.multi_reduction <add>, %59, %cst_57 [1] : vector<16x256xf32> to vector<16xf32>
    %61 = vector.shape_cast %60 : vector<16xf32> to vector<16x1xf32>
    %62 = arith.addf %32, %61 : vector<16x1xf32>
    %cst_58 = arith.constant 0.000000e+00 : f32
    %63 = vector.broadcast %cst_58 : f32 to vector<16x256xf32>
    %c2_59 = arith.constant 2 : index
    %c0_60 = arith.constant 0 : index
    %c0_61 = arith.constant 0 : index
    %c0_62 = arith.constant 0 : index
    %64 = vector.load %arg2[%c2_59, %c0_60, %c0_61, %c0_62] : memref<4x4x16x32xbf16, #tpu.memory_space<vmem>>, vector<1x1x16x32xbf16>
    %65 = vector.shape_cast %64 : vector<1x1x16x32xbf16> to vector<16x32xbf16>
    %c0_63 = arith.constant 0 : index
    %c10_64 = arith.constant 10 : index
    %66 = vector.load %arg1[%c0_63, %c10_64] : memref<32x278xbf16, #tpu.memory_space<vmem>>, vector<32x256xbf16>
    %cst_65 = arith.constant dense<0.000000e+00> : vector<16x256xf32>
    %67 = tpu.matmul %65, %66, %cst_65 {dimension_numbers = #tpu.dot_dimension_numbers<[1], [0], [0], [1], [0, 0, 1, 1], [], []>} : vector<16x32xbf16>, vector<32x256xbf16>, vector<16x256xf32> -> vector<16x256xf32>
    %68 = arith.addf %63, %67 : vector<16x256xf32>
    %c2_66 = arith.constant 2 : index
    %c1_67 = arith.constant 1 : index
    %c0_68 = arith.constant 0 : index
    %c0_69 = arith.constant 0 : index
    %69 = vector.load %arg2[%c2_66, %c1_67, %c0_68, %c0_69] : memref<4x4x16x32xbf16, #tpu.memory_space<vmem>>, vector<1x1x16x32xbf16>
    %70 = vector.shape_cast %69 : vector<1x1x16x32xbf16> to vector<16x32xbf16>
    %c0_70 = arith.constant 0 : index
    %c11_71 = arith.constant 11 : index
    %71 = vector.load %arg1[%c0_70, %c11_71] : memref<32x278xbf16, #tpu.memory_space<vmem>>, vector<32x256xbf16>
    %cst_72 = arith.constant dense<0.000000e+00> : vector<16x256xf32>
    %72 = tpu.matmul %70, %71, %cst_72 {dimension_numbers = #tpu.dot_dimension_numbers<[1], [0], [0], [1], [0, 0, 1, 1], [], []>} : vector<16x32xbf16>, vector<32x256xbf16>, vector<16x256xf32> -> vector<16x256xf32>
    %73 = arith.addf %68, %72 : vector<16x256xf32>
    %c2_73 = arith.constant 2 : index
    %c2_74 = arith.constant 2 : index
    %c0_75 = arith.constant 0 : index
    %c0_76 = arith.constant 0 : index
    %74 = vector.load %arg2[%c2_73, %c2_74, %c0_75, %c0_76] : memref<4x4x16x32xbf16, #tpu.memory_space<vmem>>, vector<1x1x16x32xbf16>
    %75 = vector.shape_cast %74 : vector<1x1x16x32xbf16> to vector<16x32xbf16>
    %c0_77 = arith.constant 0 : index
    %c20 = arith.constant 20 : index
    %76 = vector.load %arg1[%c0_77, %c20] : memref<32x278xbf16, #tpu.memory_space<vmem>>, vector<32x256xbf16>
    %cst_78 = arith.constant dense<0.000000e+00> : vector<16x256xf32>
    %77 = tpu.matmul %75, %76, %cst_78 {dimension_numbers = #tpu.dot_dimension_numbers<[1], [0], [0], [1], [0, 0, 1, 1], [], []>} : vector<16x32xbf16>, vector<32x256xbf16>, vector<16x256xf32> -> vector<16x256xf32>
    %78 = arith.addf %73, %77 : vector<16x256xf32>
    %c2_79 = arith.constant 2 : index
    %c3_80 = arith.constant 3 : index
    %c0_81 = arith.constant 0 : index
    %c0_82 = arith.constant 0 : index
    %79 = vector.load %arg2[%c2_79, %c3_80, %c0_81, %c0_82] : memref<4x4x16x32xbf16, #tpu.memory_space<vmem>>, vector<1x1x16x32xbf16>
    %80 = vector.shape_cast %79 : vector<1x1x16x32xbf16> to vector<16x32xbf16>
    %c0_83 = arith.constant 0 : index
    %c21 = arith.constant 21 : index
    %81 = vector.load %arg1[%c0_83, %c21] : memref<32x278xbf16, #tpu.memory_space<vmem>>, vector<32x256xbf16>
    %cst_84 = arith.constant dense<0.000000e+00> : vector<16x256xf32>
    %82 = tpu.matmul %80, %81, %cst_84 {dimension_numbers = #tpu.dot_dimension_numbers<[1], [0], [0], [1], [0, 0, 1, 1], [], []>} : vector<16x32xbf16>, vector<32x256xbf16>, vector<16x256xf32> -> vector<16x256xf32>
    %83 = arith.addf %78, %82 : vector<16x256xf32>
    %84 = vector.broadcast %0 : vector<1x256xf32> to vector<16x256xf32>
    %85 = arith.mulf %83, %84 : vector<16x256xf32>
    %cst_85 = arith.constant dense<0.000000e+00> : vector<16xf32>
    %86 = vector.multi_reduction <add>, %85, %cst_85 [1] : vector<16x256xf32> to vector<16xf32>
    %87 = vector.shape_cast %86 : vector<16xf32> to vector<16x1xf32>
    %88 = arith.addf %58, %87 : vector<16x1xf32>
    %89 = arith.mulf %85, %83 : vector<16x256xf32>
    %cst_86 = arith.constant dense<0.000000e+00> : vector<16xf32>
    %90 = vector.multi_reduction <add>, %89, %cst_86 [1] : vector<16x256xf32> to vector<16xf32>
    %91 = vector.shape_cast %90 : vector<16xf32> to vector<16x1xf32>
    %92 = arith.addf %62, %91 : vector<16x1xf32>
    %cst_87 = arith.constant 0.000000e+00 : f32
    %93 = vector.broadcast %cst_87 : f32 to vector<16x256xf32>
    %c3_88 = arith.constant 3 : index
    %c0_89 = arith.constant 0 : index
    %c0_90 = arith.constant 0 : index
    %c0_91 = arith.constant 0 : index
    %94 = vector.load %arg2[%c3_88, %c0_89, %c0_90, %c0_91] : memref<4x4x16x32xbf16, #tpu.memory_space<vmem>>, vector<1x1x16x32xbf16>
    %95 = vector.shape_cast %94 : vector<1x1x16x32xbf16> to vector<16x32xbf16>
    %c0_92 = arith.constant 0 : index
    %c11_93 = arith.constant 11 : index
    %96 = vector.load %arg1[%c0_92, %c11_93] : memref<32x278xbf16, #tpu.memory_space<vmem>>, vector<32x256xbf16>
    %cst_94 = arith.constant dense<0.000000e+00> : vector<16x256xf32>
    %97 = tpu.matmul %95, %96, %cst_94 {dimension_numbers = #tpu.dot_dimension_numbers<[1], [0], [0], [1], [0, 0, 1, 1], [], []>} : vector<16x32xbf16>, vector<32x256xbf16>, vector<16x256xf32> -> vector<16x256xf32>
    %98 = arith.addf %93, %97 : vector<16x256xf32>
    %c3_95 = arith.constant 3 : index
    %c1_96 = arith.constant 1 : index
    %c0_97 = arith.constant 0 : index
    %c0_98 = arith.constant 0 : index
    %99 = vector.load %arg2[%c3_95, %c1_96, %c0_97, %c0_98] : memref<4x4x16x32xbf16, #tpu.memory_space<vmem>>, vector<1x1x16x32xbf16>
    %100 = vector.shape_cast %99 : vector<1x1x16x32xbf16> to vector<16x32xbf16>
    %c0_99 = arith.constant 0 : index
    %c12_100 = arith.constant 12 : index
    %101 = vector.load %arg1[%c0_99, %c12_100] : memref<32x278xbf16, #tpu.memory_space<vmem>>, vector<32x256xbf16>
    %cst_101 = arith.constant dense<0.000000e+00> : vector<16x256xf32>
    %102 = tpu.matmul %100, %101, %cst_101 {dimension_numbers = #tpu.dot_dimension_numbers<[1], [0], [0], [1], [0, 0, 1, 1], [], []>} : vector<16x32xbf16>, vector<32x256xbf16>, vector<16x256xf32> -> vector<16x256xf32>
    %103 = arith.addf %98, %102 : vector<16x256xf32>
    %c3_102 = arith.constant 3 : index
    %c2_103 = arith.constant 2 : index
    %c0_104 = arith.constant 0 : index
    %c0_105 = arith.constant 0 : index
    %104 = vector.load %arg2[%c3_102, %c2_103, %c0_104, %c0_105] : memref<4x4x16x32xbf16, #tpu.memory_space<vmem>>, vector<1x1x16x32xbf16>
    %105 = vector.shape_cast %104 : vector<1x1x16x32xbf16> to vector<16x32xbf16>
    %c0_106 = arith.constant 0 : index
    %c21_107 = arith.constant 21 : index
    %106 = vector.load %arg1[%c0_106, %c21_107] : memref<32x278xbf16, #tpu.memory_space<vmem>>, vector<32x256xbf16>
    %cst_108 = arith.constant dense<0.000000e+00> : vector<16x256xf32>
    %107 = tpu.matmul %105, %106, %cst_108 {dimension_numbers = #tpu.dot_dimension_numbers<[1], [0], [0], [1], [0, 0, 1, 1], [], []>} : vector<16x32xbf16>, vector<32x256xbf16>, vector<16x256xf32> -> vector<16x256xf32>
    %108 = arith.addf %103, %107 : vector<16x256xf32>
    %c3_109 = arith.constant 3 : index
    %c3_110 = arith.constant 3 : index
    %c0_111 = arith.constant 0 : index
    %c0_112 = arith.constant 0 : index
    %109 = vector.load %arg2[%c3_109, %c3_110, %c0_111, %c0_112] : memref<4x4x16x32xbf16, #tpu.memory_space<vmem>>, vector<1x1x16x32xbf16>
    %110 = vector.shape_cast %109 : vector<1x1x16x32xbf16> to vector<16x32xbf16>
    %c0_113 = arith.constant 0 : index
    %c22 = arith.constant 22 : index
    %111 = vector.load %arg1[%c0_113, %c22] : memref<32x278xbf16, #tpu.memory_space<vmem>>, vector<32x256xbf16>
    %cst_114 = arith.constant dense<0.000000e+00> : vector<16x256xf32>
    %112 = tpu.matmul %110, %111, %cst_114 {dimension_numbers = #tpu.dot_dimension_numbers<[1], [0], [0], [1], [0, 0, 1, 1], [], []>} : vector<16x32xbf16>, vector<32x256xbf16>, vector<16x256xf32> -> vector<16x256xf32>
    %113 = arith.addf %108, %112 : vector<16x256xf32>
    %114 = vector.broadcast %0 : vector<1x256xf32> to vector<16x256xf32>
    %115 = arith.mulf %113, %114 : vector<16x256xf32>
    %cst_115 = arith.constant dense<0.000000e+00> : vector<16xf32>
    %116 = vector.multi_reduction <add>, %115, %cst_115 [1] : vector<16x256xf32> to vector<16xf32>
    %117 = vector.shape_cast %116 : vector<16xf32> to vector<16x1xf32>
    %118 = arith.addf %88, %117 : vector<16x1xf32>
    %119 = arith.mulf %115, %113 : vector<16x256xf32>
    %cst_116 = arith.constant dense<0.000000e+00> : vector<16xf32>
    %120 = vector.multi_reduction <add>, %119, %cst_116 [1] : vector<16x256xf32> to vector<16xf32>
    %121 = vector.shape_cast %120 : vector<16xf32> to vector<16x1xf32>
    %122 = arith.addf %92, %121 : vector<16x1xf32>
    %cst_117 = arith.constant 0.001953125 : f32
    %123 = vector.broadcast %cst_117 : f32 to vector<16x1xf32>
    %124 = arith.mulf %118, %123 : vector<16x1xf32>
    %cst_118 = arith.constant 0.001953125 : f32
    %125 = vector.broadcast %cst_118 : f32 to vector<16x1xf32>
    %126 = arith.mulf %122, %125 : vector<16x1xf32>
    %127 = arith.mulf %124, %124 : vector<16x1xf32>
    %128 = arith.subf %126, %127 : vector<16x1xf32>
    %c0_119 = arith.constant 0 : index
    %c0_120 = arith.constant 0 : index
    %129 = vector.load %arg3[%c0_119, %c0_120] : memref<16x1xf32, #tpu.memory_space<vmem>>, vector<16x1xf32>
    %cst_121 = arith.constant 9.99999974E-6 : f32
    %130 = vector.broadcast %cst_121 : f32 to vector<16x1xf32>
    %131 = arith.addf %128, %130 : vector<16x1xf32>
    %132 = math.rsqrt %131 : vector<16x1xf32>
    %133 = arith.mulf %129, %132 : vector<16x1xf32>
    %c0_122 = arith.constant 0 : index
    %c0_123 = arith.constant 0 : index
    %134 = vector.load %arg4[%c0_122, %c0_123] : memref<16x1xf32, #tpu.memory_space<vmem>>, vector<16x1xf32>
    %135 = arith.mulf %124, %133 : vector<16x1xf32>
    %136 = arith.subf %134, %135 : vector<16x1xf32>
    %137 = vector.broadcast %133 : vector<16x1xf32> to vector<16x256xf32>
    %138 = arith.mulf %23, %137 : vector<16x256xf32>
    %139 = vector.broadcast %136 : vector<16x1xf32> to vector<16x256xf32>
    %140 = arith.addf %138, %139 : vector<16x256xf32>
    %cst_124 = arith.constant 0.000000e+00 : f32
    %141 = vector.broadcast %cst_124 : f32 to vector<16x256xf32>
    %142 = arith.maximumf %140, %141 : vector<16x256xf32>
    %143 = arith.truncf %142 : vector<16x256xf32> to vector<16x256xbf16>
    %c0_125 = arith.constant 0 : index
    %c0_126 = arith.constant 0 : index
    %c0_127 = arith.constant 0 : index
    %144 = vector.load %arg6[%c0_125, %c0_126, %c0_127] : memref<4x16x256xbf16, #tpu.memory_space<vmem>>, vector<1x16x256xbf16>
    %145 = vector.shape_cast %144 : vector<1x16x256xbf16> to vector<16x256xbf16>
    %146 = vector.shape_cast %143 : vector<16x256xbf16> to vector<1x16x256xbf16>
    tpu.vector_store %arg6[%c0_125, %c0_126, %c0_127], %146 {strides = array<i32>} : memref<4x16x256xbf16, #tpu.memory_space<vmem>>, vector<1x16x256xbf16>,
    %147 = vector.broadcast %133 : vector<16x1xf32> to vector<16x256xf32>
    %148 = arith.mulf %53, %147 : vector<16x256xf32>
    %149 = vector.broadcast %136 : vector<16x1xf32> to vector<16x256xf32>
    %150 = arith.addf %148, %149 : vector<16x256xf32>
    %cst_128 = arith.constant 0.000000e+00 : f32
    %151 = vector.broadcast %cst_128 : f32 to vector<16x256xf32>
    %152 = arith.maximumf %150, %151 : vector<16x256xf32>
    %153 = arith.truncf %152 : vector<16x256xf32> to vector<16x256xbf16>
    %c1_129 = arith.constant 1 : index
    %c0_130 = arith.constant 0 : index
    %c0_131 = arith.constant 0 : index
    %154 = vector.load %arg6[%c1_129, %c0_130, %c0_131] : memref<4x16x256xbf16, #tpu.memory_space<vmem>>, vector<1x16x256xbf16>
    %155 = vector.shape_cast %154 : vector<1x16x256xbf16> to vector<16x256xbf16>
    %156 = vector.shape_cast %153 : vector<16x256xbf16> to vector<1x16x256xbf16>
    tpu.vector_store %arg6[%c1_129, %c0_130, %c0_131], %156 {strides = array<i32>} : memref<4x16x256xbf16, #tpu.memory_space<vmem>>, vector<1x16x256xbf16>,
    %157 = vector.broadcast %133 : vector<16x1xf32> to vector<16x256xf32>
    %158 = arith.mulf %83, %157 : vector<16x256xf32>
    %159 = vector.broadcast %136 : vector<16x1xf32> to vector<16x256xf32>
    %160 = arith.addf %158, %159 : vector<16x256xf32>
    %cst_132 = arith.constant 0.000000e+00 : f32
    %161 = vector.broadcast %cst_132 : f32 to vector<16x256xf32>
    %162 = arith.maximumf %160, %161 : vector<16x256xf32>
    %163 = arith.truncf %162 : vector<16x256xf32> to vector<16x256xbf16>
    %c2_133 = arith.constant 2 : index
    %c0_134 = arith.constant 0 : index
    %c0_135 = arith.constant 0 : index
    %164 = vector.load %arg6[%c2_133, %c0_134, %c0_135] : memref<4x16x256xbf16, #tpu.memory_space<vmem>>, vector<1x16x256xbf16>
    %165 = vector.shape_cast %164 : vector<1x16x256xbf16> to vector<16x256xbf16>
    %166 = vector.shape_cast %163 : vector<16x256xbf16> to vector<1x16x256xbf16>
    tpu.vector_store %arg6[%c2_133, %c0_134, %c0_135], %166 {strides = array<i32>} : memref<4x16x256xbf16, #tpu.memory_space<vmem>>, vector<1x16x256xbf16>,
    %167 = vector.broadcast %133 : vector<16x1xf32> to vector<16x256xf32>
    %168 = arith.mulf %113, %167 : vector<16x256xf32>
    %169 = vector.broadcast %136 : vector<16x1xf32> to vector<16x256xf32>
    %170 = arith.addf %168, %169 : vector<16x256xf32>
    %cst_136 = arith.constant 0.000000e+00 : f32
    %171 = vector.broadcast %cst_136 : f32 to vector<16x256xf32>
    %172 = arith.maximumf %170, %171 : vector<16x256xf32>
    %173 = arith.truncf %172 : vector<16x256xf32> to vector<16x256xbf16>
    %c3_137 = arith.constant 3 : index
    %c0_138 = arith.constant 0 : index
    %c0_139 = arith.constant 0 : index
    %174 = vector.load %arg6[%c3_137, %c0_138, %c0_139] : memref<4x16x256xbf16, #tpu.memory_space<vmem>>, vector<1x16x256xbf16>
    %175 = vector.shape_cast %174 : vector<1x16x256xbf16> to vector<16x256xbf16>
    %176 = vector.shape_cast %173 : vector<16x256xbf16> to vector<1x16x256xbf16>
    tpu.vector_store %arg6[%c3_137, %c0_138, %c0_139], %176 {strides = array<i32>} : memref<4x16x256xbf16, #tpu.memory_space<vmem>>, vector<1x16x256xbf16>,
    return
  }
  func.func @transform_0(%arg0: i32) -> (i32, i32) {
    %c0_i32 = arith.constant 0 : i32
    %c0_i32_0 = arith.constant 0 : i32
    %c0_i32_1 = arith.constant 0 : i32
    return %c0_i32, %c0_i32_0 : i32, i32
  }
  func.func @transform_1(%arg0: i32) -> (i32, i32, i32, i32) {
    %c0_i32 = arith.constant 0 : i32
    %c0_i32_0 = arith.constant 0 : i32
    %c0_i32_1 = arith.constant 0 : i32
    %c0_i32_2 = arith.constant 0 : i32
    return %c0_i32, %c0_i32_0, %arg0, %c0_i32_1 : i32, i32, i32, i32
  }
  func.func @transform_2(%arg0: i32) -> (i32, i32) {
    %c0_i32 = arith.constant 0 : i32
    %c0_i32_0 = arith.constant 0 : i32
    return %arg0, %c0_i32 : i32, i32
  }
  func.func @transform_3(%arg0: i32) -> (i32, i32) {
    %c0_i32 = arith.constant 0 : i32
    %c0_i32_0 = arith.constant 0 : i32
    return %arg0, %c0_i32 : i32, i32
  }
  func.func @transform_4(%arg0: i32) -> (i32, i32) {
    %c0_i32 = arith.constant 0 : i32
    %c0_i32_0 = arith.constant 0 : i32
    %c0_i32_1 = arith.constant 0 : i32
    return %c0_i32, %c0_i32_0 : i32, i32
  }
  func.func @transform_5(%arg0: i32) -> (i32, i32, i32) {
    %c0_i32 = arith.constant 0 : i32
    %c0_i32_0 = arith.constant 0 : i32
    %c0_i32_1 = arith.constant 0 : i32
    return %c0_i32, %arg0, %c0_i32_0 : i32, i32, i32
  }
}

module attributes {stable_mosaic.version = 11 : i64} {
  func.func @_convt2x_tanh_kernel(%arg0: memref<16x806xbf16, #tpu.memory_space<vmem>>, %arg1: memref<4x4x3x16xbf16, #tpu.memory_space<vmem>>, %arg2: memref<4x3x768xf32, #tpu.memory_space<vmem>>) attributes {dimension_semantics = [], scalar_prefetch = 0 : i64, scratch_operands = 0 : i64, tpu.core_type = #tpu.core_type<tc>} {
    %cst = arith.constant 0.000000e+00 : f32
    %0 = vector.broadcast %cst : f32 to vector<3x768xf32>
    %c0 = arith.constant 0 : index
    %c0_0 = arith.constant 0 : index
    %c0_1 = arith.constant 0 : index
    %c0_2 = arith.constant 0 : index
    %1 = vector.load %arg1[%c0, %c0_0, %c0_1, %c0_2] : memref<4x4x3x16xbf16, #tpu.memory_space<vmem>>, vector<1x1x3x16xbf16>
    %2 = vector.shape_cast %1 : vector<1x1x3x16xbf16> to vector<3x16xbf16>
    %c0_3 = arith.constant 0 : index
    %c0_4 = arith.constant 0 : index
    %3 = vector.load %arg0[%c0_3, %c0_4] : memref<16x806xbf16, #tpu.memory_space<vmem>>, vector<16x768xbf16>
    %cst_5 = arith.constant dense<0.000000e+00> : vector<3x768xf32>
    %4 = tpu.matmul %2, %3, %cst_5 {dimension_numbers = #tpu.dot_dimension_numbers<[1], [0], [0], [1], [0, 0, 1, 1], [], []>} : vector<3x16xbf16>, vector<16x768xbf16>, vector<3x768xf32> -> vector<3x768xf32>
    %5 = arith.addf %0, %4 : vector<3x768xf32>
    %c0_6 = arith.constant 0 : index
    %c1 = arith.constant 1 : index
    %c0_7 = arith.constant 0 : index
    %c0_8 = arith.constant 0 : index
    %6 = vector.load %arg1[%c0_6, %c1, %c0_7, %c0_8] : memref<4x4x3x16xbf16, #tpu.memory_space<vmem>>, vector<1x1x3x16xbf16>
    %7 = vector.shape_cast %6 : vector<1x1x3x16xbf16> to vector<3x16xbf16>
    %c0_9 = arith.constant 0 : index
    %c1_10 = arith.constant 1 : index
    %8 = vector.load %arg0[%c0_9, %c1_10] : memref<16x806xbf16, #tpu.memory_space<vmem>>, vector<16x768xbf16>
    %cst_11 = arith.constant dense<0.000000e+00> : vector<3x768xf32>
    %9 = tpu.matmul %7, %8, %cst_11 {dimension_numbers = #tpu.dot_dimension_numbers<[1], [0], [0], [1], [0, 0, 1, 1], [], []>} : vector<3x16xbf16>, vector<16x768xbf16>, vector<3x768xf32> -> vector<3x768xf32>
    %10 = arith.addf %5, %9 : vector<3x768xf32>
    %c0_12 = arith.constant 0 : index
    %c2 = arith.constant 2 : index
    %c0_13 = arith.constant 0 : index
    %c0_14 = arith.constant 0 : index
    %11 = vector.load %arg1[%c0_12, %c2, %c0_13, %c0_14] : memref<4x4x3x16xbf16, #tpu.memory_space<vmem>>, vector<1x1x3x16xbf16>
    %12 = vector.shape_cast %11 : vector<1x1x3x16xbf16> to vector<3x16xbf16>
    %c0_15 = arith.constant 0 : index
    %c18 = arith.constant 18 : index
    %13 = vector.load %arg0[%c0_15, %c18] : memref<16x806xbf16, #tpu.memory_space<vmem>>, vector<16x768xbf16>
    %cst_16 = arith.constant dense<0.000000e+00> : vector<3x768xf32>
    %14 = tpu.matmul %12, %13, %cst_16 {dimension_numbers = #tpu.dot_dimension_numbers<[1], [0], [0], [1], [0, 0, 1, 1], [], []>} : vector<3x16xbf16>, vector<16x768xbf16>, vector<3x768xf32> -> vector<3x768xf32>
    %15 = arith.addf %10, %14 : vector<3x768xf32>
    %c0_17 = arith.constant 0 : index
    %c3 = arith.constant 3 : index
    %c0_18 = arith.constant 0 : index
    %c0_19 = arith.constant 0 : index
    %16 = vector.load %arg1[%c0_17, %c3, %c0_18, %c0_19] : memref<4x4x3x16xbf16, #tpu.memory_space<vmem>>, vector<1x1x3x16xbf16>
    %17 = vector.shape_cast %16 : vector<1x1x3x16xbf16> to vector<3x16xbf16>
    %c0_20 = arith.constant 0 : index
    %c19 = arith.constant 19 : index
    %18 = vector.load %arg0[%c0_20, %c19] : memref<16x806xbf16, #tpu.memory_space<vmem>>, vector<16x768xbf16>
    %cst_21 = arith.constant dense<0.000000e+00> : vector<3x768xf32>
    %19 = tpu.matmul %17, %18, %cst_21 {dimension_numbers = #tpu.dot_dimension_numbers<[1], [0], [0], [1], [0, 0, 1, 1], [], []>} : vector<3x16xbf16>, vector<16x768xbf16>, vector<3x768xf32> -> vector<3x768xf32>
    %20 = arith.addf %15, %19 : vector<3x768xf32>
    %21 = math.tanh %20 : vector<3x768xf32>
    %c0_22 = arith.constant 0 : index
    %c0_23 = arith.constant 0 : index
    %c0_24 = arith.constant 0 : index
    %22 = vector.load %arg2[%c0_22, %c0_23, %c0_24] : memref<4x3x768xf32, #tpu.memory_space<vmem>>, vector<1x3x768xf32>
    %23 = vector.shape_cast %22 : vector<1x3x768xf32> to vector<3x768xf32>
    %24 = vector.shape_cast %21 : vector<3x768xf32> to vector<1x3x768xf32>
    tpu.vector_store %arg2[%c0_22, %c0_23, %c0_24], %24 {strides = array<i32>} : memref<4x3x768xf32, #tpu.memory_space<vmem>>, vector<1x3x768xf32>,
    %cst_25 = arith.constant 0.000000e+00 : f32
    %25 = vector.broadcast %cst_25 : f32 to vector<3x768xf32>
    %c1_26 = arith.constant 1 : index
    %c0_27 = arith.constant 0 : index
    %c0_28 = arith.constant 0 : index
    %c0_29 = arith.constant 0 : index
    %26 = vector.load %arg1[%c1_26, %c0_27, %c0_28, %c0_29] : memref<4x4x3x16xbf16, #tpu.memory_space<vmem>>, vector<1x1x3x16xbf16>
    %27 = vector.shape_cast %26 : vector<1x1x3x16xbf16> to vector<3x16xbf16>
    %c0_30 = arith.constant 0 : index
    %c1_31 = arith.constant 1 : index
    %28 = vector.load %arg0[%c0_30, %c1_31] : memref<16x806xbf16, #tpu.memory_space<vmem>>, vector<16x768xbf16>
    %cst_32 = arith.constant dense<0.000000e+00> : vector<3x768xf32>
    %29 = tpu.matmul %27, %28, %cst_32 {dimension_numbers = #tpu.dot_dimension_numbers<[1], [0], [0], [1], [0, 0, 1, 1], [], []>} : vector<3x16xbf16>, vector<16x768xbf16>, vector<3x768xf32> -> vector<3x768xf32>
    %30 = arith.addf %25, %29 : vector<3x768xf32>
    %c1_33 = arith.constant 1 : index
    %c1_34 = arith.constant 1 : index
    %c0_35 = arith.constant 0 : index
    %c0_36 = arith.constant 0 : index
    %31 = vector.load %arg1[%c1_33, %c1_34, %c0_35, %c0_36] : memref<4x4x3x16xbf16, #tpu.memory_space<vmem>>, vector<1x1x3x16xbf16>
    %32 = vector.shape_cast %31 : vector<1x1x3x16xbf16> to vector<3x16xbf16>
    %c0_37 = arith.constant 0 : index
    %c2_38 = arith.constant 2 : index
    %33 = vector.load %arg0[%c0_37, %c2_38] : memref<16x806xbf16, #tpu.memory_space<vmem>>, vector<16x768xbf16>
    %cst_39 = arith.constant dense<0.000000e+00> : vector<3x768xf32>
    %34 = tpu.matmul %32, %33, %cst_39 {dimension_numbers = #tpu.dot_dimension_numbers<[1], [0], [0], [1], [0, 0, 1, 1], [], []>} : vector<3x16xbf16>, vector<16x768xbf16>, vector<3x768xf32> -> vector<3x768xf32>
    %35 = arith.addf %30, %34 : vector<3x768xf32>
    %c1_40 = arith.constant 1 : index
    %c2_41 = arith.constant 2 : index
    %c0_42 = arith.constant 0 : index
    %c0_43 = arith.constant 0 : index
    %36 = vector.load %arg1[%c1_40, %c2_41, %c0_42, %c0_43] : memref<4x4x3x16xbf16, #tpu.memory_space<vmem>>, vector<1x1x3x16xbf16>
    %37 = vector.shape_cast %36 : vector<1x1x3x16xbf16> to vector<3x16xbf16>
    %c0_44 = arith.constant 0 : index
    %c19_45 = arith.constant 19 : index
    %38 = vector.load %arg0[%c0_44, %c19_45] : memref<16x806xbf16, #tpu.memory_space<vmem>>, vector<16x768xbf16>
    %cst_46 = arith.constant dense<0.000000e+00> : vector<3x768xf32>
    %39 = tpu.matmul %37, %38, %cst_46 {dimension_numbers = #tpu.dot_dimension_numbers<[1], [0], [0], [1], [0, 0, 1, 1], [], []>} : vector<3x16xbf16>, vector<16x768xbf16>, vector<3x768xf32> -> vector<3x768xf32>
    %40 = arith.addf %35, %39 : vector<3x768xf32>
    %c1_47 = arith.constant 1 : index
    %c3_48 = arith.constant 3 : index
    %c0_49 = arith.constant 0 : index
    %c0_50 = arith.constant 0 : index
    %41 = vector.load %arg1[%c1_47, %c3_48, %c0_49, %c0_50] : memref<4x4x3x16xbf16, #tpu.memory_space<vmem>>, vector<1x1x3x16xbf16>
    %42 = vector.shape_cast %41 : vector<1x1x3x16xbf16> to vector<3x16xbf16>
    %c0_51 = arith.constant 0 : index
    %c20 = arith.constant 20 : index
    %43 = vector.load %arg0[%c0_51, %c20] : memref<16x806xbf16, #tpu.memory_space<vmem>>, vector<16x768xbf16>
    %cst_52 = arith.constant dense<0.000000e+00> : vector<3x768xf32>
    %44 = tpu.matmul %42, %43, %cst_52 {dimension_numbers = #tpu.dot_dimension_numbers<[1], [0], [0], [1], [0, 0, 1, 1], [], []>} : vector<3x16xbf16>, vector<16x768xbf16>, vector<3x768xf32> -> vector<3x768xf32>
    %45 = arith.addf %40, %44 : vector<3x768xf32>
    %46 = math.tanh %45 : vector<3x768xf32>
    %c1_53 = arith.constant 1 : index
    %c0_54 = arith.constant 0 : index
    %c0_55 = arith.constant 0 : index
    %47 = vector.load %arg2[%c1_53, %c0_54, %c0_55] : memref<4x3x768xf32, #tpu.memory_space<vmem>>, vector<1x3x768xf32>
    %48 = vector.shape_cast %47 : vector<1x3x768xf32> to vector<3x768xf32>
    %49 = vector.shape_cast %46 : vector<3x768xf32> to vector<1x3x768xf32>
    tpu.vector_store %arg2[%c1_53, %c0_54, %c0_55], %49 {strides = array<i32>} : memref<4x3x768xf32, #tpu.memory_space<vmem>>, vector<1x3x768xf32>,
    %cst_56 = arith.constant 0.000000e+00 : f32
    %50 = vector.broadcast %cst_56 : f32 to vector<3x768xf32>
    %c2_57 = arith.constant 2 : index
    %c0_58 = arith.constant 0 : index
    %c0_59 = arith.constant 0 : index
    %c0_60 = arith.constant 0 : index
    %51 = vector.load %arg1[%c2_57, %c0_58, %c0_59, %c0_60] : memref<4x4x3x16xbf16, #tpu.memory_space<vmem>>, vector<1x1x3x16xbf16>
    %52 = vector.shape_cast %51 : vector<1x1x3x16xbf16> to vector<3x16xbf16>
    %c0_61 = arith.constant 0 : index
    %c18_62 = arith.constant 18 : index
    %53 = vector.load %arg0[%c0_61, %c18_62] : memref<16x806xbf16, #tpu.memory_space<vmem>>, vector<16x768xbf16>
    %cst_63 = arith.constant dense<0.000000e+00> : vector<3x768xf32>
    %54 = tpu.matmul %52, %53, %cst_63 {dimension_numbers = #tpu.dot_dimension_numbers<[1], [0], [0], [1], [0, 0, 1, 1], [], []>} : vector<3x16xbf16>, vector<16x768xbf16>, vector<3x768xf32> -> vector<3x768xf32>
    %55 = arith.addf %50, %54 : vector<3x768xf32>
    %c2_64 = arith.constant 2 : index
    %c1_65 = arith.constant 1 : index
    %c0_66 = arith.constant 0 : index
    %c0_67 = arith.constant 0 : index
    %56 = vector.load %arg1[%c2_64, %c1_65, %c0_66, %c0_67] : memref<4x4x3x16xbf16, #tpu.memory_space<vmem>>, vector<1x1x3x16xbf16>
    %57 = vector.shape_cast %56 : vector<1x1x3x16xbf16> to vector<3x16xbf16>
    %c0_68 = arith.constant 0 : index
    %c19_69 = arith.constant 19 : index
    %58 = vector.load %arg0[%c0_68, %c19_69] : memref<16x806xbf16, #tpu.memory_space<vmem>>, vector<16x768xbf16>
    %cst_70 = arith.constant dense<0.000000e+00> : vector<3x768xf32>
    %59 = tpu.matmul %57, %58, %cst_70 {dimension_numbers = #tpu.dot_dimension_numbers<[1], [0], [0], [1], [0, 0, 1, 1], [], []>} : vector<3x16xbf16>, vector<16x768xbf16>, vector<3x768xf32> -> vector<3x768xf32>
    %60 = arith.addf %55, %59 : vector<3x768xf32>
    %c2_71 = arith.constant 2 : index
    %c2_72 = arith.constant 2 : index
    %c0_73 = arith.constant 0 : index
    %c0_74 = arith.constant 0 : index
    %61 = vector.load %arg1[%c2_71, %c2_72, %c0_73, %c0_74] : memref<4x4x3x16xbf16, #tpu.memory_space<vmem>>, vector<1x1x3x16xbf16>
    %62 = vector.shape_cast %61 : vector<1x1x3x16xbf16> to vector<3x16xbf16>
    %c0_75 = arith.constant 0 : index
    %c36 = arith.constant 36 : index
    %63 = vector.load %arg0[%c0_75, %c36] : memref<16x806xbf16, #tpu.memory_space<vmem>>, vector<16x768xbf16>
    %cst_76 = arith.constant dense<0.000000e+00> : vector<3x768xf32>
    %64 = tpu.matmul %62, %63, %cst_76 {dimension_numbers = #tpu.dot_dimension_numbers<[1], [0], [0], [1], [0, 0, 1, 1], [], []>} : vector<3x16xbf16>, vector<16x768xbf16>, vector<3x768xf32> -> vector<3x768xf32>
    %65 = arith.addf %60, %64 : vector<3x768xf32>
    %c2_77 = arith.constant 2 : index
    %c3_78 = arith.constant 3 : index
    %c0_79 = arith.constant 0 : index
    %c0_80 = arith.constant 0 : index
    %66 = vector.load %arg1[%c2_77, %c3_78, %c0_79, %c0_80] : memref<4x4x3x16xbf16, #tpu.memory_space<vmem>>, vector<1x1x3x16xbf16>
    %67 = vector.shape_cast %66 : vector<1x1x3x16xbf16> to vector<3x16xbf16>
    %c0_81 = arith.constant 0 : index
    %c37 = arith.constant 37 : index
    %68 = vector.load %arg0[%c0_81, %c37] : memref<16x806xbf16, #tpu.memory_space<vmem>>, vector<16x768xbf16>
    %cst_82 = arith.constant dense<0.000000e+00> : vector<3x768xf32>
    %69 = tpu.matmul %67, %68, %cst_82 {dimension_numbers = #tpu.dot_dimension_numbers<[1], [0], [0], [1], [0, 0, 1, 1], [], []>} : vector<3x16xbf16>, vector<16x768xbf16>, vector<3x768xf32> -> vector<3x768xf32>
    %70 = arith.addf %65, %69 : vector<3x768xf32>
    %71 = math.tanh %70 : vector<3x768xf32>
    %c2_83 = arith.constant 2 : index
    %c0_84 = arith.constant 0 : index
    %c0_85 = arith.constant 0 : index
    %72 = vector.load %arg2[%c2_83, %c0_84, %c0_85] : memref<4x3x768xf32, #tpu.memory_space<vmem>>, vector<1x3x768xf32>
    %73 = vector.shape_cast %72 : vector<1x3x768xf32> to vector<3x768xf32>
    %74 = vector.shape_cast %71 : vector<3x768xf32> to vector<1x3x768xf32>
    tpu.vector_store %arg2[%c2_83, %c0_84, %c0_85], %74 {strides = array<i32>} : memref<4x3x768xf32, #tpu.memory_space<vmem>>, vector<1x3x768xf32>,
    %cst_86 = arith.constant 0.000000e+00 : f32
    %75 = vector.broadcast %cst_86 : f32 to vector<3x768xf32>
    %c3_87 = arith.constant 3 : index
    %c0_88 = arith.constant 0 : index
    %c0_89 = arith.constant 0 : index
    %c0_90 = arith.constant 0 : index
    %76 = vector.load %arg1[%c3_87, %c0_88, %c0_89, %c0_90] : memref<4x4x3x16xbf16, #tpu.memory_space<vmem>>, vector<1x1x3x16xbf16>
    %77 = vector.shape_cast %76 : vector<1x1x3x16xbf16> to vector<3x16xbf16>
    %c0_91 = arith.constant 0 : index
    %c19_92 = arith.constant 19 : index
    %78 = vector.load %arg0[%c0_91, %c19_92] : memref<16x806xbf16, #tpu.memory_space<vmem>>, vector<16x768xbf16>
    %cst_93 = arith.constant dense<0.000000e+00> : vector<3x768xf32>
    %79 = tpu.matmul %77, %78, %cst_93 {dimension_numbers = #tpu.dot_dimension_numbers<[1], [0], [0], [1], [0, 0, 1, 1], [], []>} : vector<3x16xbf16>, vector<16x768xbf16>, vector<3x768xf32> -> vector<3x768xf32>
    %80 = arith.addf %75, %79 : vector<3x768xf32>
    %c3_94 = arith.constant 3 : index
    %c1_95 = arith.constant 1 : index
    %c0_96 = arith.constant 0 : index
    %c0_97 = arith.constant 0 : index
    %81 = vector.load %arg1[%c3_94, %c1_95, %c0_96, %c0_97] : memref<4x4x3x16xbf16, #tpu.memory_space<vmem>>, vector<1x1x3x16xbf16>
    %82 = vector.shape_cast %81 : vector<1x1x3x16xbf16> to vector<3x16xbf16>
    %c0_98 = arith.constant 0 : index
    %c20_99 = arith.constant 20 : index
    %83 = vector.load %arg0[%c0_98, %c20_99] : memref<16x806xbf16, #tpu.memory_space<vmem>>, vector<16x768xbf16>
    %cst_100 = arith.constant dense<0.000000e+00> : vector<3x768xf32>
    %84 = tpu.matmul %82, %83, %cst_100 {dimension_numbers = #tpu.dot_dimension_numbers<[1], [0], [0], [1], [0, 0, 1, 1], [], []>} : vector<3x16xbf16>, vector<16x768xbf16>, vector<3x768xf32> -> vector<3x768xf32>
    %85 = arith.addf %80, %84 : vector<3x768xf32>
    %c3_101 = arith.constant 3 : index
    %c2_102 = arith.constant 2 : index
    %c0_103 = arith.constant 0 : index
    %c0_104 = arith.constant 0 : index
    %86 = vector.load %arg1[%c3_101, %c2_102, %c0_103, %c0_104] : memref<4x4x3x16xbf16, #tpu.memory_space<vmem>>, vector<1x1x3x16xbf16>
    %87 = vector.shape_cast %86 : vector<1x1x3x16xbf16> to vector<3x16xbf16>
    %c0_105 = arith.constant 0 : index
    %c37_106 = arith.constant 37 : index
    %88 = vector.load %arg0[%c0_105, %c37_106] : memref<16x806xbf16, #tpu.memory_space<vmem>>, vector<16x768xbf16>
    %cst_107 = arith.constant dense<0.000000e+00> : vector<3x768xf32>
    %89 = tpu.matmul %87, %88, %cst_107 {dimension_numbers = #tpu.dot_dimension_numbers<[1], [0], [0], [1], [0, 0, 1, 1], [], []>} : vector<3x16xbf16>, vector<16x768xbf16>, vector<3x768xf32> -> vector<3x768xf32>
    %90 = arith.addf %85, %89 : vector<3x768xf32>
    %c3_108 = arith.constant 3 : index
    %c3_109 = arith.constant 3 : index
    %c0_110 = arith.constant 0 : index
    %c0_111 = arith.constant 0 : index
    %91 = vector.load %arg1[%c3_108, %c3_109, %c0_110, %c0_111] : memref<4x4x3x16xbf16, #tpu.memory_space<vmem>>, vector<1x1x3x16xbf16>
    %92 = vector.shape_cast %91 : vector<1x1x3x16xbf16> to vector<3x16xbf16>
    %c0_112 = arith.constant 0 : index
    %c38 = arith.constant 38 : index
    %93 = vector.load %arg0[%c0_112, %c38] : memref<16x806xbf16, #tpu.memory_space<vmem>>, vector<16x768xbf16>
    %cst_113 = arith.constant dense<0.000000e+00> : vector<3x768xf32>
    %94 = tpu.matmul %92, %93, %cst_113 {dimension_numbers = #tpu.dot_dimension_numbers<[1], [0], [0], [1], [0, 0, 1, 1], [], []>} : vector<3x16xbf16>, vector<16x768xbf16>, vector<3x768xf32> -> vector<3x768xf32>
    %95 = arith.addf %90, %94 : vector<3x768xf32>
    %96 = math.tanh %95 : vector<3x768xf32>
    %c3_114 = arith.constant 3 : index
    %c0_115 = arith.constant 0 : index
    %c0_116 = arith.constant 0 : index
    %97 = vector.load %arg2[%c3_114, %c0_115, %c0_116] : memref<4x3x768xf32, #tpu.memory_space<vmem>>, vector<1x3x768xf32>
    %98 = vector.shape_cast %97 : vector<1x3x768xf32> to vector<3x768xf32>
    %99 = vector.shape_cast %96 : vector<3x768xf32> to vector<1x3x768xf32>
    tpu.vector_store %arg2[%c3_114, %c0_115, %c0_116], %99 {strides = array<i32>} : memref<4x3x768xf32, #tpu.memory_space<vmem>>, vector<1x3x768xf32>,
    return
  }
}

</mosaic_0001>

<bundles_post_ra>
// kernel: image_generator_forward.4
= control target key start
LH: loop header
LB: loop body
LE: loop exit
PB: predicated region body
PF: predicated region fallthrough
CT: control target
= control target key end

     0   :  { %v2608_v3 = vmov 0   ;;  %vm121_vm0 = vcmask 261120   ;;  %vm289_vm1 = vcmask 1041408   ;;  %vm1173_vm2 = vcmask 523264   ;;  %s3754_s1 = inlined_call_operand.vmem [shape: bf16[32,1024], index: 1, kind: input, shape index: {}]   ;;  %s3755_s0 = inlined_call_operand.vmem [shape: bf16[2,32], index: 0, kind: input, shape index: {}]   ;;  %s3756_s4 = inlined_call_operand.vmem [shape: f32[1024,64], index: 4, kind: input, shape index: {}]   ;;  %s3757_s5 = inlined_call_operand.vmem [shape: f32[64,1024], index: 5, kind: input, shape index: {}]   ;;  %s3758_s2 = inlined_call_operand.vmem [shape: f32[1,64], index: 2, kind: input, shape index: {}]   ;;  %s3759_s3 = inlined_call_operand.vmem [shape: f32[1,64], index: 3, kind: input, shape index: {}]   ;;  %s3760_s6 = inlined_call_operand.vmem [shape: bf16[2,1024], index: 6, kind: output, shape index: {}]  }
   0x1   :  { %v25_v0 = vld [vmem:[%s3754_s1] sm:$0xff]  ;;  %v26_v2 = vld [vmem:[%s3754_s1 + $0x8] sm:$0xff]  ;;  %157 = vmatprep.mubr.bf16.mxu0 %v2608_v3  ;;  %198 = vmatprep.mubr.bf16.mxu1 %v2608_v3  ;;  %v27_v15 = vld [vmem:[%s3754_s1 + $0x10] sm:$0xff] }
   0x2   :  { %v29_v1 = vld [vmem:[%s3754_s1 + $0x20] sm:$0xff]  ;;  %v30_v5 = vld [vmem:[%s3754_s1 + $0x28] sm:$0xff]  ;;  %v31_v16 = vld [vmem:[%s3754_s1 + $0x30] sm:$0xff] }
   0x3   :  { %v1908_v4 = vcombine.high %v25_v0, %v29_v1  ;;  %v1907_v6 = vcombine.low %v25_v0, %v29_v1  ;;  %v33_v7 = vld [vmem:[%s3754_s1 + $0x40] sm:$0xff]  ;;  %v1910_v9 = vcombine.high %v26_v2, %v30_v5  ;;  %v1909_v10 = vcombine.low %v26_v2, %v30_v5  ;;  %v34_v12 = vld [vmem:[%s3754_s1 + $0x48] sm:$0xff]  ;;  %v28_v17 = vld [vmem:[%s3754_s1 + $0x18] sm:$0xff] }
   0x4   :  { %v37_v8 = vld [vmem:[%s3754_s1 + $0x60] sm:$0xff]  ;;  %v38_v13 = vld [vmem:[%s3754_s1 + $0x68] sm:$0xff]  ;;  %v32_v19 = vld [vmem:[%s3754_s1 + $0x38] sm:$0xff]  ;;  %v1912_v21 = vcombine.high %v27_v15, %v31_v16  ;;  %v1911_v28 = vcombine.low %v27_v15, %v31_v16 }
   0x5   :  { %v1916_v11 = vcombine.high %v33_v7, %v37_v8  ;;  %125 = vmatprep.subr.bf16.mxu0 %v1908_v4  ;;  %v1918_v14 = vcombine.high %v34_v12, %v38_v13  ;;  %166 = vmatprep.subr.bf16.mxu1 %v1910_v9  ;;  %v1915_v18 = vcombine.low %v33_v7, %v37_v8  ;;  %v35_v23 = vld [vmem:[%s3754_s1 + $0x50] sm:$0xff]  ;;  %v36_v25 = vld [vmem:[%s3754_s1 + $0x58] sm:$0xff]  ;;  %v24_v27 = vld [vmem:[%s3755_s0] sm:$0x1] }
   0x6   :  { %126 = vmatpush1.bf16.msra.mxu0 %v1907_v6  ;;  %167 = vmatpush1.bf16.msra.mxu1 %v1909_v10  ;;  %v1917_v20 = vcombine.low %v34_v12, %v38_v13  ;;  %v1914_v22 = vcombine.high %v28_v17, %v32_v19  ;;  %v39_v24 = vld [vmem:[%s3754_s1 + $0x70] sm:$0xff]  ;;  %v40_v26 = vld [vmem:[%s3754_s1 + $0x78] sm:$0xff]  ;;  %v1913_v29 = vcombine.low %v28_v17, %v32_v19  ;;  %v426_v32 = vld [vmem:[%s3756_s4 + $0x80] sm:$0xff] }
   0x7   :  { %127 = vmatprep.subr.bf16.mxu0 %v1916_v11  ;;  %168 = vmatprep.subr.bf16.mxu1 %v1918_v14  ;;  %v1920_v30 = vcombine.high %v35_v23, %v39_v24  ;;  %v1922_v31 = vcombine.high %v36_v25, %v40_v26  ;;  %v427_v33 = vld [vmem:[%s3756_s4 + $0x88] sm:$0xff]  ;;  %v458_v34 = vld [vmem:[%s3756_s4 + $0x180] sm:$0xff]  ;;  %v1919_v36 = vcombine.low %v35_v23, %v39_v24  ;;  %v428_v44 = vld [vmem:[%s3756_s4 + $0x90] sm:$0xff] }
   0x8   :  { %v459_v35 = vld [vmem:[%s3756_s4 + $0x188] sm:$0xff]  ;;  %v1921_v37 = vcombine.low %v36_v25, %v40_v26  ;;  %v2713_v38 = vpack.c.bf16 %v427_v33, %v426_v32  ;;  %v410_v39 = vld [vmem:[%s3756_s4] sm:$0xff]  ;;  %v429_v45 = vld [vmem:[%s3756_s4 + $0x98] sm:$0xff] }
   0x9   :  { %v411_v40 = vld [vmem:[%s3756_s4 + $0x8] sm:$0xff]  ;;  %v442_v41 = vld [vmem:[%s3756_s4 + $0x100] sm:$0xff]  ;;  %v2725_v42 = vpack.c.bf16 %v459_v35, %v458_v34  ;;  %v460_v46 = vld [vmem:[%s3756_s4 + $0x190] sm:$0xff]  ;;  %v2748_v50 = vpack.c.bf16 %v429_v45, %v428_v44 }
   0xa   :  { %128 = vmatpush1.bf16.msra.mxu0 %v1915_v18  ;;  %169 = vmatpush1.bf16.msra.mxu1 %v1917_v20  ;;  %v443_v43 = vld [vmem:[%s3756_s4 + $0x108] sm:$0xff]  ;;  %v461_v47 = vld [vmem:[%s3756_s4 + $0x198] sm:$0xff]  ;;  %v2743_v48 = vpack.c.bf16 %v411_v40, %v410_v39  ;;  %v412_v51 = vld [vmem:[%s3756_s4 + $0x10] sm:$0xff] }
   0xb   :  { %207 = vmatprep.subr.bf16.mxu0 %v1912_v21  ;;  %248 = vmatprep.subr.bf16.mxu1 %v1914_v22  ;;  %v2746_v49 = vpack.c.bf16 %v443_v43, %v442_v41  ;;  %v413_v52 = vld [vmem:[%s3756_s4 + $0x18] sm:$0xff]  ;;  %v444_v53 = vld [vmem:[%s3756_s4 + $0x110] sm:$0xff]  ;;  %v2760_v54 = vpack.c.bf16 %v461_v47, %v460_v46  ;;  %v430_v56 = vld [vmem:[%s3756_s4 + $0xa0] sm:$0xff] }
   0xc   :  { %v445_v55 = vld [vmem:[%s3756_s4 + $0x118] sm:$0xff]  ;;  %v431_v57 = vld [vmem:[%s3756_s4 + $0xa8] sm:$0xff]  ;;  %v462_v58 = vld [vmem:[%s3756_s4 + $0x1a0] sm:$0xff]  ;;  %v2780_v60 = vpack.c.bf16 %v413_v52, %v412_v51 }
   0xd   :  { %1923 = vmatmul.mubr.msk.bf16.vlgmr.msra.gmra.mrb[0].mxu0 %vm121_vm0, %v24_v27  ;;  %1924 = vmatmul.mubr.msk.bf16.vlgmr.msra.gmra.mrb[0].mxu1 %vm121_vm0, %v24_v27  ;;  %v463_v59 = vld [vmem:[%s3756_s4 + $0x1a8] sm:$0xff]  ;;  %v2784_v61 = vpack.c.bf16 %v445_v55, %v444_v53  ;;  %v2786_v62 = vpack.c.bf16 %v431_v57, %v430_v56  ;;  %v414_v63 = vld [vmem:[%s3756_s4 + $0x20] sm:$0xff]  ;;  %v432_v4 = vld [vmem:[%s3756_s4 + $0xb0] sm:$0xff] }
   0xe   :  { %208 = vmatpush1.bf16.msra.mxu0 %v1911_v28  ;;  %249 = vmatpush1.bf16.msra.mxu1 %v1913_v29  ;;  %v415_v0 = vld [vmem:[%s3756_s4 + $0x28] sm:$0xff]  ;;  %v446_v1 = vld [vmem:[%s3756_s4 + $0x120] sm:$0xff]  ;;  %v2798_v2 = vpack.c.bf16 %v463_v59, %v462_v58  ;;  %v433_v5 = vld [vmem:[%s3756_s4 + $0xb8] sm:$0xff] }
   0xf   :  { %209 = vmatprep.subr.bf16.mxu0 %v1920_v30  ;;  %250 = vmatprep.subr.bf16.mxu1 %v1922_v31  ;;  %v464_v6 = vld [vmem:[%s3756_s4 + $0x1b0] sm:$0xff]  ;;  %v465_v7 = vld [vmem:[%s3756_s4 + $0x1b8] sm:$0xff]  ;;  %v2816_v8 = vpack.c.bf16 %v415_v0, %v414_v63  ;;  %v2822_v10 = vpack.c.bf16 %v433_v5, %v432_v4  ;;  %v434_v16 = vld [vmem:[%s3756_s4 + $0xc0] sm:$0xff] }
  0x10   :  { %239 = vmatprep.mubr.bf16.mxu0 %v2608_v3  ;;  %280 = vmatprep.mubr.bf16.mxu1 %v2608_v3  ;;  %v447_v3 = vld [vmem:[%s3756_s4 + $0x128] sm:$0xff]  ;;  %v416_v11 = vld [vmem:[%s3756_s4 + $0x30] sm:$0xff]  ;;  %v417_v12 = vld [vmem:[%s3756_s4 + $0x38] sm:$0xff]  ;;  %v2834_v14 = vpack.c.bf16 %v465_v7, %v464_v6 }
  0x11   :  { %v2820_v9 = vpack.c.bf16 %v447_v3, %v446_v1  ;;  %v448_v13 = vld [vmem:[%s3756_s4 + $0x130] sm:$0xff]  ;;  %v449_v15 = vld [vmem:[%s3756_s4 + $0x138] sm:$0xff]  ;;  %v435_v17 = vld [vmem:[%s3756_s4 + $0xc8] sm:$0xff]  ;;  %v2852_v20 = vpack.c.bf16 %v417_v12, %v416_v11 }
  0x12   :  { %210 = vmatpush1.bf16.msra.mxu0 %v1919_v36  ;;  %251 = vmatpush1.bf16.msra.mxu1 %v1921_v37  ;;  %v466_v18 = vld [vmem:[%s3756_s4 + $0x1c0] sm:$0xff]  ;;  %v467_v19 = vld [vmem:[%s3756_s4 + $0x1c8] sm:$0xff]  ;;  %v2856_v21 = vpack.c.bf16 %v449_v15, %v448_v13  ;;  %v2858_v22 = vpack.c.bf16 %v435_v17, %v434_v16  ;;  %v436_v30 = vld [vmem:[%s3756_s4 + $0xd0] sm:$0xff] }
  0x13   :  { %2220 = vmatprep.subr.bf16.mxu0 %v2713_v38  ;;  %2252 = vmatprep.subr.bf16.mxu1 %v2725_v42  ;;  %v2861_v23 = vpack.c.bf16 %v467_v19, %v466_v18  ;;  %v418_v24 = vld [vmem:[%s3756_s4 + $0x40] sm:$0xff]  ;;  %v419_v25 = vld [vmem:[%s3756_s4 + $0x48] sm:$0xff]  ;;  %v437_v31 = vld [vmem:[%s3756_s4 + $0xd8] sm:$0xff] }
  0x14   :  { %v450_v26 = vld [vmem:[%s3756_s4 + $0x140] sm:$0xff]  ;;  %v451_v28 = vld [vmem:[%s3756_s4 + $0x148] sm:$0xff]  ;;  %v468_v32 = vld [vmem:[%s3756_s4 + $0x1d0] sm:$0xff]  ;;  %v2894_v33 = vpack.c.bf16 %v437_v31, %v436_v30 }
  0x15   :  { %1925 = vmatmul.mubr.msk.bf16.vlgmr.msra.gmra.mrb[4].mxu0 %vm121_vm0, %v24_v27  ;;  %1926 = vmatmul.mubr.msk.bf16.vlgmr.msra.gmra.mrb[4].mxu1 %vm121_vm0, %v24_v27  ;;  %v2876_v27 = vpack.c.bf16 %v419_v25, %v418_v24  ;;  %v2881_v29 = vpack.c.bf16 %v451_v28, %v450_v26  ;;  %v469_v34 = vld [vmem:[%s3756_s4 + $0x1d8] sm:$0xff]  ;;  %v420_v35 = vld [vmem:[%s3756_s4 + $0x50] sm:$0xff]  ;;  %v438_v44 = vld [vmem:[%s3756_s4 + $0xe0] sm:$0xff] }
  0x16   :  { %2222 = vmatpush3.bf16.msra.mxu0 %v2743_v48  ;;  %2254 = vmatpush3.bf16.msra.mxu1 %v2746_v49  ;;  %v421_v36 = vld [vmem:[%s3756_s4 + $0x58] sm:$0xff]  ;;  %v2905_v37 = vpack.c.bf16 %v469_v34, %v468_v32  ;;  %v452_v40 = vld [vmem:[%s3756_s4 + $0x150] sm:$0xff]  ;;  %v439_v45 = vld [vmem:[%s3756_s4 + $0xe8] sm:$0xff] }
  0x17   :  { %2224 = vmatprep.subr.bf16.mxu0 %v2748_v50  ;;  %2256 = vmatprep.subr.bf16.mxu1 %v2760_v54  ;;  %v2907_v39 = vpack.c.bf16 %v421_v36, %v420_v35  ;;  %v453_v41 = vld [vmem:[%s3756_s4 + $0x158] sm:$0xff]  ;;  %v470_v46 = vld [vmem:[%s3756_s4 + $0x1e0] sm:$0xff]  ;;  %v2930_v47 = vpack.c.bf16 %v439_v45, %v438_v44  ;;  %v471_v51 = vld [vmem:[%s3756_s4 + $0x1e8] sm:$0xff] }
  0x18   :  { %v2916_v43 = vpack.c.bf16 %v453_v41, %v452_v40  ;;  %v422_v52 = vld [vmem:[%s3756_s4 + $0x60] sm:$0xff]  ;;  %v423_v53 = vld [vmem:[%s3756_s4 + $0x68] sm:$0xff]  ;;  %v2941_v55 = vpack.c.bf16 %v471_v51, %v470_v46  ;;  %v440_v63 = vld [vmem:[%s3756_s4 + $0xf0] sm:$0xff] }
  0x19   :  { %v2943_v56 = vpack.c.bf16 %v423_v53, %v422_v52  ;;  %v454_v57 = vld [vmem:[%s3756_s4 + $0x160] sm:$0xff]  ;;  %v455_v58 = vld [vmem:[%s3756_s4 + $0x168] sm:$0xff]  ;;  %v441_v0 = vld [vmem:[%s3756_s4 + $0xf8] sm:$0xff] }
  0x1a   :  { %2226 = vmatpush3.bf16.msra.mxu0 %v2780_v60  ;;  %2258 = vmatpush3.bf16.msra.mxu1 %v2784_v61  ;;  %v2952_v59 = vpack.c.bf16 %v455_v58, %v454_v57  ;;  %v472_v1 = vld [vmem:[%s3756_s4 + $0x1f0] sm:$0xff]  ;;  %v2965_v3 = vpack.c.bf16 %v441_v0, %v440_v63  ;;  %v473_v4 = vld [vmem:[%s3756_s4 + $0x1f8] sm:$0xff]  ;;  %v490_v16 = vld [vmem:[%s3756_s4 + $0x280] sm:$0xff] }
  0x1b   :  { %2228 = vmatprep.subr.bf16.mxu0 %v2786_v62  ;;  %2260 = vmatprep.subr.bf16.mxu1 %v2798_v2  ;;  %v424_v5 = vld [vmem:[%s3756_s4 + $0x70] sm:$0xff]  ;;  %v425_v6 = vld [vmem:[%s3756_s4 + $0x78] sm:$0xff]  ;;  %v2977_v7 = vpack.c.bf16 %v473_v4, %v472_v1  ;;  %v491_v17 = vld [vmem:[%s3756_s4 + $0x288] sm:$0xff] }
  0x1c   :  { %v2979_v11 = vpack.c.bf16 %v425_v6, %v424_v5  ;;  %v456_v12 = vld [vmem:[%s3756_s4 + $0x170] sm:$0xff]  ;;  %v457_v13 = vld [vmem:[%s3756_s4 + $0x178] sm:$0xff]  ;;  %v522_v18 = vld [vmem:[%s3756_s4 + $0x380] sm:$0xff]  ;;  %v3002_v19 = vpack.c.bf16 %v491_v17, %v490_v16 }
  0x1d   :  { %v2988_v15 = vpack.c.bf16 %v457_v13, %v456_v12  ;;  %v523_v24 = vld [vmem:[%s3756_s4 + $0x388] sm:$0xff] }
  0x1e   :  { %2230 = vmatpush3.bf16.msra.mxu0 %v2816_v8  ;;  %2262 = vmatpush3.bf16.msra.mxu1 %v2820_v9  ;;  %3791 = vst [vmem:[#allocation2_spill] sm:$0xff] %v2979_v11  ;;  %3793 = vst [vmem:[#allocation4_spill] sm:$0xff] %v3002_v19  ;;  %v3007_v25 = vpack.c.bf16 %v523_v24, %v522_v18  ;;  %v474_v18 = vld [vmem:[%s3756_s4 + $0x200] sm:$0xff] }
  0x1f   :  { %2232 = vmatprep.subr.bf16.mxu0 %v2822_v10  ;;  %2264 = vmatprep.subr.bf16.mxu1 %v2834_v14  ;;  %3792 = vst [vmem:[#allocation3_spill] sm:$0xff] %v2988_v15 }
  0x20   :  { %3794 = vst [vmem:[#allocation5_spill] sm:$0xff] %v3007_v25 }
  0x22   :  { %2234 = vmatpush3.bf16.msra.mxu0 %v2852_v20  ;;  %2266 = vmatpush3.bf16.msra.mxu1 %v2856_v21 }
  0x23   :  { %2236 = vmatprep.subr.bf16.mxu0 %v2858_v22  ;;  %2268 = vmatprep.subr.bf16.mxu1 %v2861_v23 }
  0x26   :  { %2238 = vmatpush3.bf16.msra.mxu0 %v2876_v27  ;;  %2270 = vmatpush3.bf16.msra.mxu1 %v2881_v29 }
  0x27   :  { %2240 = vmatprep.subr.bf16.mxu0 %v2894_v33  ;;  %2272 = vmatprep.subr.bf16.mxu1 %v2905_v37 }
  0x2a   :  { %2242 = vmatpush3.bf16.msra.mxu0 %v2907_v39  ;;  %2274 = vmatpush3.bf16.msra.mxu1 %v2916_v43 }
  0x2b   :  { %2244 = vmatprep.subr.bf16.mxu0 %v2930_v47  ;;  %2276 = vmatprep.subr.bf16.mxu1 %v2941_v55 }
  0x2e   :  { %2246 = vmatpush3.bf16.msra.mxu0 %v2943_v56  ;;  %2278 = vmatpush3.bf16.msra.mxu1 %v2952_v59 }
  0x2f   :  { %2248 = vmatprep.subr.bf16.mxu0 %v2965_v3  ;;  %2280 = vmatprep.subr.bf16.mxu1 %v2977_v7 }
  0x32   :  { %2250 = vmatpush3.bf16.msra.mxu0 %v2979_v11  ;;  %2282 = vmatpush3.bf16.msra.mxu1 %v2988_v15 }
  0x33   :  { %2284 = vmatprep.subr.bf16.mxu0 %v3002_v19  ;;  %2316 = vmatprep.subr.bf16.mxu1 %v3007_v25  ;;  %v495_v25 = vld [vmem:[%s3756_s4 + $0x2a8] sm:$0xff] }
  0xe0   :  { %v3011_v26 = vpop.f32.mrb[0].mxu0  ;;  %v3017_v31 = vpop.f32.mrb[0].mxu1 }
  0xe1   :  { %3795 = vst [vmem:[#allocation6_spill] sm:$0xff] %v3011_v26  ;;  %v290_v28 = vsel %vm289_vm1, %v3011_v26, 0.0  ;;  %v346_v30 = vmul.f32 %v3011_v26, %v3011_v26  ;;  %3796 = vst [vmem:[#allocation7_spill] sm:$0xff] %v3017_v31  ;;  %v3019_v32 = vpop.f32.mrb[1].mxu0  ;;  %v304_v35 = vsel %vm289_vm1, %v3017_v31, 0.0  ;;  %v348_v36 = vmul.f32 %v3017_v31, %v3017_v31  ;;  %v3027_v41 = vpop.f32.mrb[1].mxu1 }
  0xe2   :  { %3797 = vst [vmem:[#allocation8_spill] sm:$0xff] %v3019_v32  ;;  %v291_v34 = vrot.slane %v290_v28, 4  ;;  %v297_v40 = vsel %vm289_vm1, %v3019_v32, 0.0  ;;  %3798 = vst [vmem:[#allocation9_spill] sm:$0xff] %v3027_v41  ;;  %v163_v44 = vpop.f32.mrb[2].mxu0  ;;  %v305_v46 = vrot.slane %v304_v35, 4 }
  0xe3   :  { %v3030_v45 = vsel %vm289_vm1, %v346_v30, 0.0  ;;  %v298_v51 = vrot.slane %v297_v40, 4  ;;  %v204_v52 = vpop.f32.mrb[2].mxu1  ;;  %v164_v53 = vpop.f32.mrb[3].mxu0  ;;  %v3033_v58 = vsel %vm289_vm1, %v348_v36, 0.0  ;;  %v311_v63 = vsel %vm289_vm1, %v3027_v41, 0.0 }
  0xe4   :  { %v292_v57 = vadd.f32 %v291_v34, %v290_v28  ;;  %v205_v0 = vpop.f32.mrb[3].mxu1  ;;  %v306_v1 = vadd.f32 %v305_v46, %v304_v35  ;;  %v312_v6 = vrot.slane %v311_v63, 4  ;;  %v475_v34 = vld [vmem:[%s3756_s4 + $0x208] sm:$0xff]  ;;  %v492_v35 = vld [vmem:[%s3756_s4 + $0x290] sm:$0xff]  ;;  %v493_v36 = vld [vmem:[%s3756_s4 + $0x298] sm:$0xff] }
  0xe5   :  { %v299_v4 = vadd.f32 %v298_v51, %v297_v40  ;;  %v494_v26 = vld [vmem:[%s3756_s4 + $0x2a0] sm:$0xff] }
  0xe6   :  { %v293_v5 = vrot.slane %v292_v57, 2  ;;  %v307_v12 = vrot.slane %v306_v1, 2  ;;  %v313_v17 = vadd.f32 %v312_v6, %v311_v63  ;;  %v507_v6 = vld [vmem:[%s3756_s4 + $0x308] sm:$0xff] }
  0xe7   :  { %v300_v13 = vrot.slane %v299_v4, 2 }
  0xe8   :  { %v294_v16 = vadd.f32 %v293_v5, %v292_v57  ;;  %v3040_v24 = vpop.f32.mrb[4].mxu0  ;;  %v308_v28 = vadd.f32 %v307_v12, %v306_v1  ;;  %v3053_v44 = vpop.f32.mrb[4].mxu1  ;;  %v314_v51 = vrot.slane %v313_v17, 2  ;;  %v506_v5 = vld [vmem:[%s3756_s4 + $0x300] sm:$0xff]  ;;  %v3065_v12 = vpack.c.bf16 %v493_v36, %v492_v35 }
  0xe9   :  { %3799 = vst [vmem:[#allocation10_spill] sm:$0xff] %v3040_v24  ;;  %v301_v30 = vadd.f32 %v300_v13, %v299_v4  ;;  %v3051_v40 = vpop.f32.mrb[5].mxu0  ;;  %3801 = vst [vmem:[#allocation12_spill] sm:$0xff] %v3053_v44  ;;  %v3055_v52 = vpop.f32.mrb[5].mxu1  ;;  %v3057_v4 = vpack.c.bf16 %v475_v34, %v474_v18  ;;  %v524_v13 = vld [vmem:[%s3756_s4 + $0x390] sm:$0xff]  ;;  %v477_v34 = vld [vmem:[%s3756_s4 + $0x218] sm:$0xff]  ;;  %v350_v35 = vmul.f32 %v3040_v24, %v3040_v24 }
  0xea   :  { %3800 = vst [vmem:[#allocation11_spill] sm:$0xff] %v3051_v40  ;;  %v295_v46 = vrot.slane %v294_v16, 1  ;;  %3802 = vst [vmem:[#allocation13_spill] sm:$0xff] %v3055_v52  ;;  %v245_v53 = vpop.f32.mrb[6].mxu0  ;;  %v286_v0 = vpop.f32.mrb[6].mxu1  ;;  %v315_v1 = vadd.f32 %v314_v51, %v313_v17  ;;  %v525_v17 = vld [vmem:[%s3756_s4 + $0x398] sm:$0xff]  ;;  %v3085_v31 = vpack.c.bf16 %v507_v6, %v506_v5 }
  0xeb   :  { %v302_v57 = vrot.slane %v301_v30, 1  ;;  %v246_v63 = vpop.f32.mrb[7].mxu0  ;;  %v287_v53 = vpop.f32.mrb[7].mxu1  ;;  %v476_v18 = vld [vmem:[%s3756_s4 + $0x210] sm:$0xff]  ;;  %v325_v36 = vsel %vm289_vm1, %v3051_v40, 0.0  ;;  %v3094_v15 = vsel %vm289_vm1, %v350_v35, 0.0  ;;  %v3100_v5 = vpack.c.bf16 %v525_v17, %v524_v13 }
  0xec   :  { %v309_v63 = vrot.slane %v308_v28, 1  ;;  %v316_v51 = vrot.slane %v315_v1, 1  ;;  %v351_v53 = vmul.f32 %v3051_v40, %v3051_v40  ;;  %3803 = vst [vmem:[#allocation14_spill] sm:$0xff] %v3094_v15  ;;  %v3102_v6 = vpack.c.bf16 %v477_v34, %v476_v18  ;;  %v508_v40 = vld [vmem:[%s3756_s4 + $0x310] sm:$0xff]  ;;  %v509_v35 = vld [vmem:[%s3756_s4 + $0x318] sm:$0xff]  ;;  %v527_v13 = vld [vmem:[%s3756_s4 + $0x3a8] sm:$0xff] }
  0xed   :  { %v303_v0 = vadd.f32 %v302_v57, %v301_v30  ;;  %v296_v30 = vadd.f32 %v295_v46, %v294_v16  ;;  %v326_v57 = vrot.slane %v325_v36, 4  ;;  %v352_v16 = vmul.f32 %v3053_v44, %v3053_v44  ;;  %3804 = vst [vmem:[#allocation15_spill] sm:$0xff] %v3100_v5  ;;  %v478_v34 = vld [vmem:[%s3756_s4 + $0x220] sm:$0xff] }
  0xee   :  { %v339_v46 = vsel %vm289_vm1, %v3055_v52, 0.0  ;;  %3805 = vst [vmem:[#allocation16_spill] sm:$0xff] %v3102_v6  ;;  %v310_v11 = vadd.f32 %v309_v63, %v308_v28  ;;  %v3118_v17 = vsel %vm289_vm1, %v351_v53, 0.0  ;;  %v3124_v63 = vpack.c.bf16 %v495_v25, %v494_v26 }
  0xef   :  { %602 = vmatprep.mubr.f32.mxu0 %v303_v0  ;;  %v317_v0 = vadd.f32 %v316_v51, %v315_v1  ;;  %v327_v19 = vadd.f32 %v326_v57, %v325_v36  ;;  %v526_v1 = vld [vmem:[%s3756_s4 + $0x3a0] sm:$0xff]  ;;  %v3121_v18 = vsel %vm289_vm1, %v352_v16, 0.0  ;;  %v340_v28 = vrot.slane %v339_v46, 4  ;;  %v479_v36 = vld [vmem:[%s3756_s4 + $0x228] sm:$0xff]  ;;  %v497_v57 = vld [vmem:[%s3756_s4 + $0x2b8] sm:$0xff] }
  0xf0   :  { %603 = vmatmul.mubr.f32.vlgmr.msra.gmra.mrb[8].mxu0 %v296_v30  ;;  %3806 = vst [vmem:[#allocation17_spill] sm:$0xff] %v3121_v18  ;;  %3807 = vst [vmem:[#allocation18_spill] sm:$0xff] %v3124_v63  ;;  %v496_v30 = vld [vmem:[%s3756_s4 + $0x2b0] sm:$0xff]  ;;  %v353_v26 = vmul.f32 %v3055_v52, %v3055_v52  ;;  %v3141_v53 = vpack.c.bf16 %v509_v35, %v508_v40  ;;  %v3143_v16 = vpack.c.bf16 %v527_v13, %v526_v1  ;;  %v511_v40 = vld [vmem:[%s3756_s4 + $0x328] sm:$0xff] }
  0xf1   :  { %2286 = vmatpush3.bf16.msra.mxu0 %v3057_v4  ;;  %672 = vmatprep.mubr.f32.mxu1 %v317_v0  ;;  %v328_v51 = vrot.slane %v327_v19, 2  ;;  %v341_v25 = vadd.f32 %v340_v28, %v339_v46  ;;  %v3149_v18 = vpack.c.bf16 %v479_v36, %v478_v34  ;;  %v510_v46 = vld [vmem:[%s3756_s4 + $0x320] sm:$0xff]  ;;  %v3164_v13 = vpack.c.bf16 %v497_v57, %v496_v30  ;;  %v529_v28 = vld [vmem:[%s3756_s4 + $0x3b8] sm:$0xff]  ;;  %v480_v34 = vld [vmem:[%s3756_s4 + $0x230] sm:$0xff] }
  0xf2   :  { %2288 = vmatprep.subr.bf16.mxu0 %v3065_v12  ;;  %673 = vmatmul.mubr.f32.vlgmr.msra.gmra.mrb[8].mxu1 %v310_v11  ;;  %3808 = vst [vmem:[#allocation19_spill] sm:$0xff] %v3143_v16  ;;  %v347_v11 = vmul.f32 %v3019_v32, %v3019_v32  ;;  %v3161_v1 = vsel %vm289_vm1, %v353_v26, 0.0  ;;  %v481_v36 = vld [vmem:[%s3756_s4 + $0x238] sm:$0xff]  ;;  %v349_v26 = vmul.f32 %v3027_v41, %v3027_v41  ;;  %v318_v30 = vsel %vm289_vm1, %v3040_v24, 0.0  ;;  %v498_v57 = vld [vmem:[%s3756_s4 + $0x2c0] sm:$0xff]  ;;  %v499_v52 = vld [vmem:[%s3756_s4 + $0x2c8] sm:$0xff] }
  0xf3   :  { %2318 = vmatpush3.bf16.msra.mxu1 %v3085_v31  ;;  %v329_v0 = vadd.f32 %v328_v51, %v327_v19  ;;  %3809 = vst [vmem:[#allocation20_spill] sm:$0xff] %v3149_v18  ;;  %v528_v19 = vld [vmem:[%s3756_s4 + $0x3b0] sm:$0xff]  ;;  %v342_v35 = vrot.slane %v341_v25, 2  ;;  %3810 = vst [vmem:[#allocation21_spill] sm:$0xff] %v3164_v13  ;;  %v3186_v15 = vpack.c.bf16 %v511_v40, %v510_v46  ;;  %v319_v46 = vrot.slane %v318_v30, 4 }
  0xf4   :  { %2320 = vmatprep.subr.bf16.mxu1 %v3100_v5  ;;  %v3191_v24 = vpack.c.bf16 %v529_v28, %v528_v19  ;;  %v3193_v41 = vpack.c.bf16 %v481_v36, %v480_v34  ;;  %v512_v5 = vld [vmem:[%s3756_s4 + $0x330] sm:$0xff]  ;;  %v332_v40 = vsel %vm289_vm1, %v3053_v44, 0.0  ;;  %v3207_v19 = vpack.c.bf16 %v499_v52, %v498_v57  ;;  %v482_v28 = vld [vmem:[%s3756_s4 + $0x240] sm:$0xff]  ;;  %v483_v34 = vld [vmem:[%s3756_s4 + $0x248] sm:$0xff] }
  0xf5   :  { %2290 = vmatpush3.bf16.msra.mxu0 %v3102_v6  ;;  %v330_v51 = vrot.slane %v329_v0, 1  ;;  %v343_v32 = vadd.f32 %v342_v35, %v341_v25  ;;  %v361_v6 = vsel %vm289_vm1, %v347_v11, 0.0  ;;  %v513_v25 = vld [vmem:[%s3756_s4 + $0x338] sm:$0xff]  ;;  %v531_v35 = vld [vmem:[%s3756_s4 + $0x3c8] sm:$0xff]  ;;  %v375_v36 = vsel %vm289_vm1, %v349_v26, 0.0  ;;  %v500_v52 = vld [vmem:[%s3756_s4 + $0x2d0] sm:$0xff] }
  0xf6   :  { %2292 = vmatprep.subr.bf16.mxu0 %v3124_v63  ;;  %3811 = vst [vmem:[#allocation22_spill] sm:$0xff] %v3191_v24  ;;  %3812 = vst [vmem:[#allocation23_spill] sm:$0xff] %v3193_v41  ;;  %v362_v44 = vrot.slane %v361_v6, 4  ;;  %v3232_v26 = vpack.c.bf16 %v483_v34, %v482_v28  ;;  %v484_v28 = vld [vmem:[%s3756_s4 + $0x250] sm:$0xff]  ;;  %v485_v34 = vld [vmem:[%s3756_s4 + $0x258] sm:$0xff] }
  0xf7   :  { %2322 = vmatpush3.bf16.msra.mxu1 %v3141_v53  ;;  %v331_v63 = vadd.f32 %v330_v51, %v329_v0  ;;  %v530_v0 = vld [vmem:[%s3756_s4 + $0x3c0] sm:$0xff]  ;;  %v344_v11 = vrot.slane %v343_v32, 1  ;;  %3813 = vst [vmem:[#allocation24_spill] sm:$0xff] %v3207_v19  ;;  %v501_v51 = vld [vmem:[%s3756_s4 + $0x2d8] sm:$0xff] }
  0xf8   :  { %2324 = vmatprep.subr.bf16.mxu1 %v3143_v16  ;;  %3814 = vst [vmem:[#allocation25_spill] sm:$0xff] %v3232_v26  ;;  %v514_v16 = vld [vmem:[%s3756_s4 + $0x340] sm:$0xff] }
  0xf9   :  { %2294 = vmatpush3.bf16.msra.mxu0 %v3149_v18  ;;  %742 = vmatprep.mubr.f32.mxu0 %v331_v63  ;;  %v345_v57 = vadd.f32 %v344_v11, %v343_v32  ;;  %v333_v18 = vrot.slane %v332_v40, 4  ;;  %v3230_v63 = vpack.c.bf16 %v531_v35, %v530_v0  ;;  %v515_v32 = vld [vmem:[%s3756_s4 + $0x348] sm:$0xff]  ;;  %v320_v11 = vadd.f32 %v319_v46, %v318_v30  ;;  %v533_v35 = vld [vmem:[%s3756_s4 + $0x3d8] sm:$0xff]  ;;  %v502_v30 = vld [vmem:[%s3756_s4 + $0x2e0] sm:$0xff] }
  0xfa   :  { %2296 = vmatprep.subr.bf16.mxu0 %v3164_v13  ;;  %v3226_v13 = vpack.c.bf16 %v513_v25, %v512_v5  ;;  %v532_v5 = vld [vmem:[%s3756_s4 + $0x3d0] sm:$0xff]  ;;  %v376_v25 = vrot.slane %v375_v36, 4  ;;  %v3244_v0 = vpack.c.bf16 %v501_v51, %v500_v52  ;;  %v503_v46 = vld [vmem:[%s3756_s4 + $0x2e8] sm:$0xff]  ;;  %v363_v52 = vadd.f32 %v362_v44, %v361_v6  ;;  %v517_v44 = vld [vmem:[%s3756_s4 + $0x358] sm:$0xff] }
  0xfb   :  { %2326 = vmatpush3.bf16.msra.mxu1 %v3186_v15  ;;  %812 = vmatprep.mubr.f32.mxu1 %v345_v57  ;;  %v3262_v51 = vpack.c.bf16 %v515_v32, %v514_v16  ;;  %v3268_v57 = vpack.c.bf16 %v485_v34, %v484_v28  ;;  %v534_v6 = vld [vmem:[%s3756_s4 + $0x3e0] sm:$0xff]  ;;  %v321_v16 = vrot.slane %v320_v11, 2  ;;  %v535_v32 = vld [vmem:[%s3756_s4 + $0x3e8] sm:$0xff] }
  0xfc   :  { %2328 = vmatprep.subr.bf16.mxu1 %v3191_v24  ;;  %3815 = vst [vmem:[#allocation26_spill] sm:$0xff] %v3244_v0  ;;  %v516_v24 = vld [vmem:[%s3756_s4 + $0x350] sm:$0xff]  ;;  %v364_v34 = vrot.slane %v363_v52, 2 }
  0xfd   :  { %2298 = vmatpush3.bf16.msra.mxu0 %v3193_v41  ;;  %3816 = vst [vmem:[#allocation27_spill] sm:$0xff] %v3262_v51  ;;  %v3266_v41 = vpack.c.bf16 %v533_v35, %v532_v5  ;;  %3818 = vst [vmem:[#allocation29_spill] sm:$0xff] %v3268_v57  ;;  %v486_v5 = vld [vmem:[%s3756_s4 + $0x260] sm:$0xff]  ;;  %v487_v35 = vld [vmem:[%s3756_s4 + $0x268] sm:$0xff]  ;;  %v3298_v28 = vpack.c.bf16 %v517_v44, %v516_v24  ;;  %v322_v44 = vadd.f32 %v321_v16, %v320_v11 }
  0xfe   :  { %2300 = vmatprep.subr.bf16.mxu0 %v3207_v19  ;;  %v334_v19 = vadd.f32 %v333_v18, %v332_v40  ;;  %v377_v18 = vadd.f32 %v376_v25, %v375_v36  ;;  %v3280_v40 = vpack.c.bf16 %v503_v46, %v502_v30  ;;  %v504_v36 = vld [vmem:[%s3756_s4 + $0x2f0] sm:$0xff]  ;;  %v505_v25 = vld [vmem:[%s3756_s4 + $0x2f8] sm:$0xff]  ;;  %v3302_v46 = vpack.c.bf16 %v535_v32, %v534_v6 }
  0xff   :  { %2330 = vmatpush3.bf16.msra.mxu1 %v3226_v13  ;;  %3817 = vst [vmem:[#allocation28_spill] sm:$0xff] %v3266_v41  ;;  %3820 = vst [vmem:[#allocation31_spill] sm:$0xff] %v3298_v28  ;;  %v536_v24 = vld [vmem:[%s3756_s4 + $0x3f0] sm:$0xff]  ;;  %v537_v6 = vld [vmem:[%s3756_s4 + $0x3f8] sm:$0xff]  ;;  %v365_v16 = vadd.f32 %v364_v34, %v363_v52 }
 0x100   :  { %2332 = vmatprep.subr.bf16.mxu1 %v3230_v63  ;;  %3819 = vst [vmem:[#allocation30_spill] sm:$0xff] %v3280_v40  ;;  %v335_v30 = vrot.slane %v334_v19, 2  ;;  %v488_v32 = vld [vmem:[%s3756_s4 + $0x270] sm:$0xff] }
 0x101   :  { %2302 = vmatpush3.bf16.msra.mxu0 %v3232_v26  ;;  %v518_v26 = vld [vmem:[%s3756_s4 + $0x360] sm:$0xff] }
 0x102   :  { %2304 = vmatprep.subr.bf16.mxu0 %v3244_v0  ;;  %v3304_v0 = vpack.c.bf16 %v487_v35, %v486_v5  ;;  %v489_v5 = vld [vmem:[%s3756_s4 + $0x278] sm:$0xff]  ;;  %v378_v35 = vrot.slane %v377_v18, 2 }
 0x103   :  { %2334 = vmatpush3.bf16.msra.mxu1 %v3262_v51  ;;  %v519_v51 = vld [vmem:[%s3756_s4 + $0x368] sm:$0xff] }
 0x104   :  { %2336 = vmatprep.subr.bf16.mxu1 %v3266_v41  ;;  %v3328_v11 = vpack.c.bf16 %v519_v51, %v518_v26  ;;  %v520_v41 = vld [vmem:[%s3756_s4 + $0x370] sm:$0xff]  ;;  %v323_v26 = vrot.slane %v322_v44, 1  ;;  %v366_v51 = vrot.slane %v365_v16, 1 }
 0x105   :  { %2306 = vmatpush3.bf16.msra.mxu0 %v3268_v57  ;;  %v3316_v57 = vpack.c.bf16 %v505_v25, %v504_v36  ;;  %v336_v36 = vadd.f32 %v335_v30, %v334_v19  ;;  %v3332_v25 = vpack.c.bf16 %v537_v6, %v536_v24  ;;  %v379_v19 = vadd.f32 %v378_v35, %v377_v18  ;;  %v3831_v18 = vld [vmem:[#allocation21_spill] sm:$0xff]  ;;  %v3835_v35 = vld [vmem:[#allocation24_spill] sm:$0xff] }
 0x106   :  { %2308 = vmatprep.subr.bf16.mxu0 %v3280_v40  ;;  %v3334_v40 = vpack.c.bf16 %v489_v5, %v488_v32  ;;  %v324_v30 = vadd.f32 %v323_v26, %v322_v44  ;;  %v367_v6 = vadd.f32 %v366_v51, %v365_v16  ;;  %v3834_v44 = vld [vmem:[#allocation23_spill] sm:$0xff]  ;;  %v3836_v16 = vld [vmem:[#allocation25_spill] sm:$0xff]  ;;  %v3839_v51 = vld [vmem:[#allocation28_spill] sm:$0xff] }
 0x107   :  { %2338 = vmatpush3.bf16.msra.mxu1 %v3298_v28  ;;  %v521_v28 = vld [vmem:[%s3756_s4 + $0x378] sm:$0xff]  ;;  %v337_v34 = vrot.slane %v336_v36, 1  ;;  %v380_v24 = vrot.slane %v379_v19, 1  ;;  %v3838_v26 = vld [vmem:[#allocation27_spill] sm:$0xff] }
 0x108   :  { %2340 = vmatprep.subr.bf16.mxu1 %v3302_v46  ;;  %v3344_v52 = vpack.c.bf16 %v521_v28, %v520_v41  ;;  %v3833_v28 = vld [vmem:[#allocation22_spill] sm:$0xff] }
 0x109   :  { %2310 = vmatpush3.bf16.msra.mxu0 %v3304_v0  ;;  %v338_v32 = vadd.f32 %v337_v34, %v336_v36  ;;  %v381_v41 = vadd.f32 %v380_v24, %v379_v19  ;;  %v3840_v34 = vld [vmem:[#allocation29_spill] sm:$0xff]  ;;  %v3841_v24 = vld [vmem:[#allocation30_spill] sm:$0xff] }
 0x10a   :  { %2312 = vmatprep.subr.bf16.mxu0 %v3316_v57 }
 0x10b   :  { %2342 = vmatpush3.bf16.msra.mxu1 %v3328_v11 }
 0x10c   :  { %2344 = vmatprep.subr.bf16.mxu1 %v3332_v25 }
 0x10d   :  { %2314 = vmatpush3.bf16.msra.mxu0 %v3334_v40 }
 0x10e   :  { %2348 = vmatprep.subr.bf16.mxu0 %v2713_v38  ;;  %v355_v38 = vrot.slane %v3030_v45, 4 }
 0x10f   :  { %2346 = vmatpush3.bf16.msra.mxu1 %v3344_v52 }
 0x110   :  { %743 = vmatmul.mubr.f32.vlgmr.msra.gmra.mrb[10].mxu0 %v324_v30  ;;  %2380 = vmatprep.subr.bf16.mxu1 %v2725_v42  ;;  %v390_v42 = vrot.slane %v3118_v17, 4 }
 0x111   :  { %2350 = vmatpush3.bf16.msra.mxu0 %v2743_v48  ;;  %882 = vmatprep.mubr.f32.mxu0 %v367_v6  ;;  %v369_v48 = vrot.slane %v3033_v58, 4 }
 0x112   :  { %2352 = vmatprep.subr.bf16.mxu0 %v2748_v50  ;;  %813 = vmatmul.mubr.f32.vlgmr.msra.gmra.mrb[10].mxu1 %v338_v32  ;;  %v404_v50 = vrot.slane %v3161_v1, 4 }
 0x113   :  { %2382 = vmatpush3.bf16.msra.mxu1 %v2746_v49  ;;  %952 = vmatprep.mubr.f32.mxu1 %v381_v41  ;;  %v356_v49 = vadd.f32 %v355_v38, %v3030_v45  ;;  %v3827_v45 = vld [vmem:[#allocation18_spill] sm:$0xff] }
 0x114   :  { %2384 = vmatprep.subr.bf16.mxu1 %v2760_v54  ;;  %v391_v54 = vadd.f32 %v390_v42, %v3118_v17  ;;  %v3829_v17 = vld [vmem:[#allocation20_spill] sm:$0xff]  ;;  %v1117_v42 = vld [vmem:[%s3757_s5 + $0x40] sm:$0xff] }
 0x115   :  { %2354 = vmatpush3.bf16.msra.mxu0 %v2780_v60  ;;  %v370_v60 = vadd.f32 %v369_v48, %v3033_v58  ;;  %v3828_v58 = vld [vmem:[#allocation19_spill] sm:$0xff] }
 0x116   :  { %2356 = vmatprep.subr.bf16.mxu0 %v2786_v62  ;;  %v405_v62 = vadd.f32 %v404_v50, %v3161_v1  ;;  %v1111_v50 = vld [vmem:[%s3757_s5 + $0x10] sm:$0xff] }
 0x117   :  { %2386 = vmatpush3.bf16.msra.mxu1 %v2784_v61  ;;  %v357_v61 = vrot.slane %v356_v49, 2 }
 0x118   :  { %2388 = vmatprep.subr.bf16.mxu1 %v2798_v2  ;;  %v392_v2 = vrot.slane %v391_v54, 2 }
 0x119   :  { %2358 = vmatpush3.bf16.msra.mxu0 %v2816_v8  ;;  %v371_v8 = vrot.slane %v370_v60, 2 }
 0x11a   :  { %2360 = vmatprep.subr.bf16.mxu0 %v2822_v10  ;;  %v406_v10 = vrot.slane %v405_v62, 2 }
 0x11b   :  { %2390 = vmatpush3.bf16.msra.mxu1 %v2820_v9  ;;  %v358_v9 = vadd.f32 %v357_v61, %v356_v49 }
 0x11c   :  { %2392 = vmatprep.subr.bf16.mxu1 %v2834_v14  ;;  %v393_v14 = vadd.f32 %v392_v2, %v391_v54  ;;  %v1119_v54 = vld [vmem:[%s3757_s5 + $0x50] sm:$0xff]  ;;  %v1128_v2 = vld [vmem:[%s3757_s5 + $0x98] sm:$0xff] }
 0x11d   :  { %2362 = vmatpush3.bf16.msra.mxu0 %v2852_v20  ;;  %v372_v20 = vadd.f32 %v371_v8, %v370_v60  ;;  %v1126_v60 = vld [vmem:[%s3757_s5 + $0x88] sm:$0xff]  ;;  %v3461_v61 = vpack.c.bf16 %v1119_v54, %v1111_v50  ;;  %v1136_v8 = vld [vmem:[%s3757_s5 + $0xd8] sm:$0xff] }
 0x11e   :  { %2364 = vmatprep.subr.bf16.mxu0 %v2858_v22  ;;  %v407_v22 = vadd.f32 %v406_v10, %v405_v62  ;;  %v1134_v62 = vld [vmem:[%s3757_s5 + $0xc8] sm:$0xff]  ;;  %v3476_v10 = vpack.c.bf16 %v1136_v8, %v1128_v2 }
 0x11f   :  { %2394 = vmatpush3.bf16.msra.mxu1 %v2856_v21  ;;  %v359_v21 = vrot.slane %v358_v9, 1 }
 0x120   :  { %2396 = vmatprep.subr.bf16.mxu1 %v2861_v23  ;;  %v394_v23 = vrot.slane %v393_v14, 1 }
 0x121   :  { %2366 = vmatpush3.bf16.msra.mxu0 %v2876_v27  ;;  %v3821_v27 = vld [vmem:[#allocation2_spill] sm:$0xff] }
 0x122   :  { %2368 = vmatprep.subr.bf16.mxu0 %v2894_v33  ;;  %v360_v33 = vadd.f32 %v359_v21, %v358_v9  ;;  %v3474_v9 = vpack.c.bf16 %v1134_v62, %v1126_v60  ;;  %v1127_v21 = vld [vmem:[%s3757_s5 + $0x90] sm:$0xff] }
 0x123   :  { %2398 = vmatpush3.bf16.msra.mxu1 %v2881_v29  ;;  %v373_v29 = vrot.slane %v372_v20, 1 }
 0x124   :  { %2400 = vmatprep.subr.bf16.mxu1 %v2905_v37  ;;  %v3822_v37 = vld [vmem:[#allocation4_spill] sm:$0xff] }
 0x125   :  { %2370 = vmatpush3.bf16.msra.mxu0 %v2907_v39  ;;  %v408_v39 = vrot.slane %v407_v22, 1 }
 0x126   :  { %2372 = vmatprep.subr.bf16.mxu0 %v2930_v47  ;;  %v395_v47 = vadd.f32 %v394_v23, %v393_v14  ;;  %v1125_v14 = vld [vmem:[%s3757_s5 + $0x80] sm:$0xff]  ;;  %v1135_v23 = vld [vmem:[%s3757_s5 + $0xd0] sm:$0xff] }
 0x127   :  { %2402 = vmatpush3.bf16.msra.mxu1 %v2916_v43  ;;  %v3823_v43 = vld [vmem:[#allocation3_spill] sm:$0xff] }
 0x128   :  { %2404 = vmatprep.subr.bf16.mxu1 %v2941_v55  ;;  %v374_v55 = vadd.f32 %v373_v29, %v372_v20  ;;  %v1133_v20 = vld [vmem:[%s3757_s5 + $0xc0] sm:$0xff]  ;;  %v1150_v29 = vld [vmem:[%s3757_s5 + $0x148] sm:$0xff] }
 0x129   :  { %2374 = vmatpush3.bf16.msra.mxu0 %v2943_v56  ;;  %v3824_v56 = vld [vmem:[#allocation5_spill] sm:$0xff] }
 0x12a   :  { %2376 = vmatprep.subr.bf16.mxu0 %v2965_v3  ;;  %v3825_v3 = vld [vmem:[#allocation15_spill] sm:$0xff] }
 0x12b   :  { %2406 = vmatpush3.bf16.msra.mxu1 %v2952_v59  ;;  %v409_v59 = vadd.f32 %v408_v39, %v407_v22  ;;  %v3488_v22 = vpack.c.bf16 %v1133_v20, %v1125_v14  ;;  %v1144_v39 = vld [vmem:[%s3757_s5 + $0x118] sm:$0xff] }
 0x12c   :  { %2408 = vmatprep.subr.bf16.mxu1 %v2977_v7  ;;  %v3826_v7 = vld [vmem:[#allocation16_spill] sm:$0xff] }
 0x12d   :  { %2378 = vmatpush3.bf16.msra.mxu0 %v3821_v27  ;;  %v1142_v27 = vld [vmem:[%s3757_s5 + $0x108] sm:$0xff] }
 0x12e   :  { %2412 = vmatprep.subr.bf16.mxu0 %v3822_v37  ;;  %v3503_v37 = vpack.c.bf16 %v1150_v29, %v1142_v27 }
 0x12f   :  { %2410 = vmatpush3.bf16.msra.mxu1 %v3823_v43  ;;  %v1152_v43 = vld [vmem:[%s3757_s5 + $0x158] sm:$0xff] }
 0x130   :  { %883 = vmatmul.mubr.f32.vlgmr.msra.gmra.mrb[12].mxu0 %v360_v33  ;;  %2444 = vmatprep.subr.bf16.mxu1 %v3824_v56  ;;  %v3501_v33 = vpack.c.bf16 %v1135_v23, %v1127_v21  ;;  %v1149_v56 = vld [vmem:[%s3757_s5 + $0x140] sm:$0xff] }
 0x131   :  { %2414 = vmatpush3.bf16.msra.mxu0 %v3057_v4  ;;  %1022 = vmatprep.mubr.f32.mxu0 %v395_v47  ;;  %v3830_v4 = vld [vmem:[#allocation14_spill] sm:$0xff] }
 0x132   :  { %2416 = vmatprep.subr.bf16.mxu0 %v3065_v12  ;;  %953 = vmatmul.mubr.f32.vlgmr.msra.gmra.mrb[12].mxu1 %v374_v55  ;;  %v383_v1 = vrot.slane %v3830_v4, 4  ;;  %v1141_v47 = vld [vmem:[%s3757_s5 + $0x100] sm:$0xff]  ;;  %v3514_v55 = vpack.c.bf16 %v1152_v43, %v1144_v39 }
 0x133   :  { %2446 = vmatpush3.bf16.msra.mxu1 %v3085_v31  ;;  %1092 = vmatprep.mubr.f32.mxu1 %v409_v59  ;;  %v3832_v31 = vld [vmem:[#allocation17_spill] sm:$0xff]  ;;  %v1143_v59 = vld [vmem:[%s3757_s5 + $0x110] sm:$0xff] }
 0x134   :  { %2448 = vmatprep.subr.bf16.mxu1 %v3825_v3  ;;  %v397_v12 = vrot.slane %v3832_v31, 4  ;;  %v384_v5 = vadd.f32 %v383_v1, %v3830_v4  ;;  %v1151_v3 = vld [vmem:[%s3757_s5 + $0x150] sm:$0xff] }
 0x135   :  { %2418 = vmatpush3.bf16.msra.mxu0 %v3826_v7  ;;  %v3526_v7 = vpack.c.bf16 %v1149_v56, %v1141_v47  ;;  %v3539_v4 = vpack.c.bf16 %v1151_v3, %v1143_v59 }
 0x136   :  { %2420 = vmatprep.subr.bf16.mxu0 %v3827_v45  ;;  %v385_v36 = vrot.slane %v384_v5, 2  ;;  %v1158_v45 = vld [vmem:[%s3757_s5 + $0x188] sm:$0xff] }
 0x137   :  { %2450 = vmatpush3.bf16.msra.mxu1 %v3141_v53  ;;  %v398_v53 = vadd.f32 %v397_v12, %v3832_v31  ;;  %v1157_v31 = vld [vmem:[%s3757_s5 + $0x180] sm:$0xff] }
 0x138   :  { %2452 = vmatprep.subr.bf16.mxu1 %v3828_v58  ;;  %v386_v30 = vadd.f32 %v385_v36, %v384_v5  ;;  %v1166_v58 = vld [vmem:[%s3757_s5 + $0x1c8] sm:$0xff]  ;;  %v1165_v12 = vld [vmem:[%s3757_s5 + $0x1c0] sm:$0xff]  ;;  %v1167_v5 = vld [vmem:[%s3757_s5 + $0x1d0] sm:$0xff] }
 0x139   :  { %2422 = vmatpush3.bf16.msra.mxu0 %v3829_v17  ;;  %v399_v19 = vrot.slane %v398_v53, 2  ;;  %v1160_v17 = vld [vmem:[%s3757_s5 + $0x198] sm:$0xff]  ;;  %v3541_v1 = vpack.c.bf16 %v1166_v58, %v1158_v45 }
 0x13a   :  { %2424 = vmatprep.subr.bf16.mxu0 %v3831_v18  ;;  %v1168_v18 = vld [vmem:[%s3757_s5 + $0x1d8] sm:$0xff] }
 0x13b   :  { %2454 = vmatpush3.bf16.msra.mxu1 %v3186_v15  ;;  %v3837_v15 = vld [vmem:[#allocation26_spill] sm:$0xff]  ;;  %v400_v6 = vadd.f32 %v399_v19, %v398_v53  ;;  %v1122_v53 = vld [vmem:[%s3757_s5 + $0x68] sm:$0xff]  ;;  %v1124_v36 = vld [vmem:[%s3757_s5 + $0x78] sm:$0xff] }
 0x13c   :  { %2456 = vmatprep.subr.bf16.mxu1 %v3833_v28  ;;  %v3553_v28 = vpack.c.bf16 %v1168_v18, %v1160_v17  ;;  %v1102_v17 = vld [vmem:[%s3758_s2] sm:$0x1] }
 0x13d   :  { %2426 = vmatpush3.bf16.msra.mxu0 %v3834_v44  ;;  %v401_v32 = vrot.slane %v400_v6, 1  ;;  %v1159_v44 = vld [vmem:[%s3757_s5 + $0x190] sm:$0xff]  ;;  %v1113_v18 = vld [vmem:[%s3757_s5 + $0x20] sm:$0xff] }
 0x13e   :  { %2428 = vmatprep.subr.bf16.mxu0 %v3835_v35  ;;  %v1114_v35 = vld [vmem:[%s3757_s5 + $0x28] sm:$0xff] }
 0x13f   :  { %2458 = vmatpush3.bf16.msra.mxu1 %v3226_v13  ;;  %v3842_v13 = vld [vmem:[#allocation31_spill] sm:$0xff]  ;;  %v402_v38 = vadd.f32 %v401_v32, %v400_v6  ;;  %v3580_v19 = vpack.c.bf16 %v1122_v53, %v1114_v35  ;;  %v1132_v53 = vld [vmem:[%s3757_s5 + $0xb8] sm:$0xff] }
 0x140   :  { %2460 = vmatprep.subr.bf16.mxu1 %v3230_v63  ;;  %v387_v63 = vrot.slane %v386_v30, 1  ;;  %v1138_v35 = vld [vmem:[%s3757_s5 + $0xe8] sm:$0xff] }
 0x141   :  { %2430 = vmatpush3.bf16.msra.mxu0 %v3836_v16  ;;  %v1116_v16 = vld [vmem:[%s3757_s5 + $0x38] sm:$0xff] }
 0x142   :  { %2432 = vmatprep.subr.bf16.mxu0 %v3837_v15  ;;  %v388_v41 = vadd.f32 %v387_v63, %v386_v30  ;;  %v3574_v15 = vpack.c.bf16 %v1165_v12, %v1157_v31  ;;  %v1121_v31 = vld [vmem:[%s3757_s5 + $0x60] sm:$0xff]  ;;  %v1115_v12 = vld [vmem:[%s3757_s5 + $0x30] sm:$0xff] }
 0x143   :  { %2462 = vmatpush3.bf16.msra.mxu1 %v3838_v26  ;;  %v3578_v26 = vpack.c.bf16 %v1167_v5, %v1159_v44  ;;  %v1123_v44 = vld [vmem:[%s3757_s5 + $0x70] sm:$0xff]  ;;  %v1130_v5 = vld [vmem:[%s3757_s5 + $0xa8] sm:$0xff] }
 0x144   :  { %2464 = vmatprep.subr.bf16.mxu1 %v3839_v51  ;;  %v3583_v51 = vpack.c.bf16 %v1124_v36, %v1116_v16  ;;  %v1140_v16 = vld [vmem:[%s3757_s5 + $0xf8] sm:$0xff] }
 0x145   :  { %2434 = vmatpush3.bf16.msra.mxu0 %v3840_v34 }
 0x146   :  { %2436 = vmatprep.subr.bf16.mxu0 %v3841_v24 }
 0x147   :  { %2466 = vmatpush3.bf16.msra.mxu1 %v3842_v13 }
 0x148   :  { %2468 = vmatprep.subr.bf16.mxu1 %v3302_v46  ;;  %v1112_v46 = vld [vmem:[%s3757_s5 + $0x18] sm:$0xff] }
 0x149   :  { %2438 = vmatpush3.bf16.msra.mxu0 %v3304_v0  ;;  %v1110_v0 = vld [vmem:[%s3757_s5 + $0x8] sm:$0xff] }
 0x14a   :  { %2440 = vmatprep.subr.bf16.mxu0 %v3316_v57  ;;  %v1118_v57 = vld [vmem:[%s3757_s5 + $0x48] sm:$0xff] }
 0x14b   :  { %2470 = vmatpush3.bf16.msra.mxu1 %v3328_v11  ;;  %v3436_v11 = vpack.c.bf16 %v1118_v57, %v1110_v0 }
 0x14c   :  { %2472 = vmatprep.subr.bf16.mxu1 %v3332_v25  ;;  %v1120_v25 = vld [vmem:[%s3757_s5 + $0x58] sm:$0xff] }
 0x14d   :  { %2442 = vmatpush3.bf16.msra.mxu0 %v3334_v40  ;;  %v2609_v40 = vmov 0.0   ;;  %v3447_v48 = vpack.c.bf16 %v1120_v25, %v1112_v46 }
 0x14e   :  { %2476 = vmatprep.subr.bf16.mxu0 %v3436_v11 }
 0x14f   :  { %2474 = vmatpush3.bf16.msra.mxu1 %v3344_v52  ;;  %v1109_v52 = vld [vmem:[%s3757_s5] sm:$0xff] }
 0x150   :  { %1023 = vmatmul.mubr.f32.vlgmr.msra.gmra.mrb[14].mxu0 %v388_v41  ;;  %v3449_v49 = vpack.c.bf16 %v1117_v42, %v1109_v52  ;;  %2492 = vmatprep.subr.bf16.mxu1 %v3447_v48 }
 0x151   :  { %1241 = vmatprep.mubr.f32.mxu0 %v2609_v40 }
 0x152   :  { %1093 = vmatmul.mubr.f32.vlgmr.msra.gmra.mrb[14].mxu1 %v402_v38  ;;  %2478 = vmatpush1.bf16.msra.mxu0 %v3449_v49 }
 0x153   :  { %1312 = vmatprep.mubr.f32.mxu1 %v2609_v40  ;;  %2494 = vmatpush1.bf16.msra.mxu1 %v3461_v61 }
 0x154   :  { %2480 = vmatprep.subr.bf16.mxu0 %v3474_v9  ;;  %2496 = vmatprep.subr.bf16.mxu1 %v3476_v10 }
 0x156   :  { %2482 = vmatpush1.bf16.msra.mxu0 %v3488_v22 }
 0x157   :  { %2498 = vmatpush1.bf16.msra.mxu1 %v3501_v33  ;;  %2484 = vmatprep.subr.bf16.mxu0 %v3503_v37 }
 0x158   :  { %2500 = vmatprep.subr.bf16.mxu1 %v3514_v55 }
 0x15a   :  { %2486 = vmatpush1.bf16.msra.mxu0 %v3526_v7 }
 0x15b   :  { %2502 = vmatpush1.bf16.msra.mxu1 %v3539_v4  ;;  %2488 = vmatprep.subr.bf16.mxu0 %v3541_v1 }
 0x15c   :  { %2504 = vmatprep.subr.bf16.mxu1 %v3553_v28 }
 0x15e   :  { %2490 = vmatpush1.bf16.msra.mxu0 %v3574_v15 }
 0x15f   :  { %2506 = vmatpush1.bf16.msra.mxu1 %v3578_v26  ;;  %2508 = vmatprep.subr.bf16.mxu0 %v3580_v19 }
 0x160   :  { %2524 = vmatprep.subr.bf16.mxu1 %v3583_v51 }
 0x1c3   :  { %v1971_v34 = vpop.f32.mrb[8].mxu0 }
 0x1c4   :  { %v1972_v30 = vpop.f32.mrb[9].mxu0 }
 0x1c5   :  { %v1973_v24 = vadd.f32 %v1972_v30, %v1971_v34  ;;  %v2006_v13 = vpop.f32.mrb[8].mxu1  ;;  %v3616_v34 = vpack.c.bf16 %v1121_v31, %v1113_v18  ;;  %v3618_v30 = vpack.c.bf16 %v1123_v44, %v1115_v12  ;;  %v3846_v18 = vld [vmem:[#allocation9_spill] sm:$0xff] }
 0x1c6   :  { %v2007_v6 = vpop.f32.mrb[9].mxu1 }
 0x1c7   :  { %v2008_v63 = vadd.f32 %v2007_v6, %v2006_v13  ;;  %v1137_v13 = vld [vmem:[%s3757_s5 + $0xe0] sm:$0xff] }
 0x1c9   :  { %v675_v32 = vadd.f32 %v2008_v63, %v1973_v24  ;;  %v1129_v24 = vld [vmem:[%s3757_s5 + $0xa0] sm:$0xff]  ;;  %v3626_v63 = vpack.c.bf16 %v1138_v35, %v1130_v5 }
 0x1e3   :  { %v2041_v41 = vpop.f32.mrb[10].mxu0 }
 0x1e4   :  { %v2042_v38 = vpop.f32.mrb[11].mxu0 }
 0x1e5   :  { %v2043_v0 = vadd.f32 %v2042_v38, %v2041_v41  ;;  %v2076_v57 = vpop.f32.mrb[10].mxu1  ;;  %v1131_v41 = vld [vmem:[%s3757_s5 + $0xb0] sm:$0xff] }
 0x1e6   :  { %v2077_v25 = vpop.f32.mrb[11].mxu1  ;;  %v1139_v38 = vld [vmem:[%s3757_s5 + $0xf0] sm:$0xff] }
 0x1e7   :  { %v745_v46 = vadd.f32 %v2043_v0, %v675_v32  ;;  %v2078_v52 = vadd.f32 %v2077_v25, %v2076_v57  ;;  %v3628_v32 = vpack.c.bf16 %v1140_v16, %v1132_v53  ;;  %v1146_v0 = vld [vmem:[%s3757_s5 + $0x128] sm:$0xff]  ;;  %v1156_v25 = vld [vmem:[%s3757_s5 + $0x178] sm:$0xff] }
 0x1e8   :  { %v1154_v57 = vld [vmem:[%s3757_s5 + $0x168] sm:$0xff] }
 0x1e9   :  { %v815_v42 = vadd.f32 %v2078_v52, %v745_v46  ;;  %v1148_v46 = vld [vmem:[%s3757_s5 + $0x138] sm:$0xff] }
 0x1eb   :  { %v1098_v43 = vmul.f32 0.03125, %v815_v42  ;;  %v3652_v42 = vpack.c.bf16 %v1137_v13, %v1129_v24  ;;  %v3848_v13 = vld [vmem:[#allocation12_spill] sm:$0xff] }
 0x1ed   :  { %v1100_v59 = vmul.f32 %v1098_v43, %v1098_v43 }
 0x203   :  { %v2111_v50 = vpop.f32.mrb[12].mxu0 }
 0x204   :  { %v2112_v54 = vpop.f32.mrb[13].mxu0 }
 0x205   :  { %v2113_v60 = vadd.f32 %v2112_v54, %v2111_v50  ;;  %v2146_v62 = vpop.f32.mrb[12].mxu1  ;;  %v3654_v50 = vpack.c.bf16 %v1139_v38, %v1131_v41  ;;  %v1145_v54 = vld [vmem:[%s3757_s5 + $0x120] sm:$0xff]  ;;  %v3850_v41 = vld [vmem:[#allocation13_spill] sm:$0xff] }
 0x206   :  { %v2147_v2 = vpop.f32.mrb[13].mxu1 }
 0x207   :  { %v2148_v8 = vadd.f32 %v2147_v2, %v2146_v62  ;;  %v3664_v62 = vpack.c.bf16 %v1154_v57, %v1146_v0  ;;  %v3666_v2 = vpack.c.bf16 %v1156_v25, %v1148_v46  ;;  %v2610_v0 = vmov 1966171168  }
 0x208   :  { %v1857_v57 = vunpack.c.l.s4 %v2610_v0 }
 0x209   :  { %v955_v14 = vadd.f32 %v2148_v8, %v2113_v60  ;;  %v1153_v60 = vld [vmem:[%s3757_s5 + $0x160] sm:$0xff]  ;;  %v1147_v8 = vld [vmem:[%s3757_s5 + $0x130] sm:$0xff] }
 0x223   :  { %v2181_v20 = vpop.f32.mrb[14].mxu0 }
 0x224   :  { %v2182_v21 = vpop.f32.mrb[15].mxu0 }
 0x225   :  { %v2183_v23 = vadd.f32 %v2182_v21, %v2181_v20  ;;  %v2216_v27 = vpop.f32.mrb[14].mxu1  ;;  %v1162_v20 = vld [vmem:[%s3757_s5 + $0x1a8] sm:$0xff] }
 0x226   :  { %v2217_v39 = vpop.f32.mrb[15].mxu1  ;;  %v1170_v21 = vld [vmem:[%s3757_s5 + $0x1e8] sm:$0xff] }
 0x227   :  { %v1025_v29 = vadd.f32 %v2183_v23, %v955_v14  ;;  %v2218_v47 = vadd.f32 %v2217_v39, %v2216_v27  ;;  %v1155_v14 = vld [vmem:[%s3757_s5 + $0x170] sm:$0xff]  ;;  %v1164_v23 = vld [vmem:[%s3757_s5 + $0x1b8] sm:$0xff] }
 0x228   :  { %v1172_v27 = vld [vmem:[%s3757_s5 + $0x1f8] sm:$0xff]  ;;  %v2533_v39 = vpack.c.bf16 %v1155_v14, %v1147_v8 }
 0x229   :  { %v1095_v56 = vadd.f32 %v2218_v47, %v1025_v29  ;;  %v2517_v29 = vpack.c.bf16 %v1153_v60, %v1145_v54  ;;  %v2519_v47 = vpack.c.bf16 %v1170_v21, %v1162_v20 }
 0x22b   :  { %v1099_v3 = vmul.f32 0.03125, %v1095_v56  ;;  %v2535_v56 = vpack.c.bf16 %v1172_v27, %v1164_v23 }
 0x22d   :  { %v1101_v45 = vsub.f32 %v1099_v3, %v1100_v59  ;;  %v1169_v59 = vld [vmem:[%s3757_s5 + $0x1e0] sm:$0xff]  ;;  %v1163_v3 = vld [vmem:[%s3757_s5 + $0x1b0] sm:$0xff] }
 0x22f   :  { %v1103_v58 = vadd.f32 1e-05, %v1101_v45  ;;  %v1171_v45 = vld [vmem:[%s3757_s5 + $0x1f0] sm:$0xff] }
 0x231   :  { %2606 = vrsqrt.f32 %v1103_v58 }
 0x23b   :  { %v2607_v36 = vpop.eup %2606 }
 0x23c   :  { %v1105_v6 = vmul.f32 %v2607_v36, %v1102_v17  ;;  %v2537_v17 = vpack.c.bf16 %v1171_v45, %v1163_v3 }
 0x23e   :  { %1927 = vmatmul.mubr.msk.f32.vlgmr.msra.gmra.mrb[16].mxu0 %vm1173_vm2, %v1105_v6  ;;  %1928 = vmatmul.mubr.msk.f32.vlgmr.msra.gmra.mrb[16].mxu1 %vm1173_vm2, %v1105_v6  ;;  %v1107_v52 = vmul.f32 %v1105_v6, %v1098_v43  ;;  %v1161_v43 = vld [vmem:[%s3757_s5 + $0x1a0] sm:$0xff] }
 0x23f   :  { %2510 = vmatpush1.bf16.msra.mxu0 %v3616_v34  ;;  %2526 = vmatpush1.bf16.msra.mxu1 %v3618_v30  ;;  %v2521_v58 = vpack.c.bf16 %v1169_v59, %v1161_v43 }
 0x240   :  { %2512 = vmatprep.subr.bf16.mxu0 %v3626_v63  ;;  %2528 = vmatprep.subr.bf16.mxu1 %v3628_v32 }
 0x241   :  { %1383 = vmatprep.mubr.f32.mxu0 %v2609_v40  ;;  %1454 = vmatprep.mubr.f32.mxu1 %v2609_v40 }
 0x243   :  { %2514 = vmatpush1.bf16.msra.mxu0 %v3652_v42  ;;  %2530 = vmatpush1.bf16.msra.mxu1 %v3654_v50 }
 0x244   :  { %2516 = vmatprep.subr.bf16.mxu0 %v3664_v62  ;;  %2532 = vmatprep.subr.bf16.mxu1 %v3666_v2 }
 0x247   :  { %2518 = vmatpush1.bf16.msra.mxu0 %v2517_v29  ;;  %2534 = vmatpush1.bf16.msra.mxu1 %v2533_v39 }
 0x248   :  { %2520 = vmatprep.subr.bf16.mxu0 %v2519_v47  ;;  %2536 = vmatprep.subr.bf16.mxu1 %v2535_v56 }
 0x24b   :  { %2522 = vmatpush1.bf16.msra.mxu0 %v2521_v58  ;;  %2538 = vmatpush1.bf16.msra.mxu1 %v2537_v17 }
 0x24c   :  { %2540 = vmatprep.subr.bf16.mxu0 %v3436_v11  ;;  %2556 = vmatprep.subr.bf16.mxu1 %v3447_v48  ;;  %v1106_v11 = vld [vmem:[%s3759_s3] sm:$0x1] }
 0x24d   :  { %v1108_v48 = vsub.f32 %v1106_v11, %v1107_v52 }
 0x24e   :  { %1929 = vmatmul.mubr.msk.f32.vlgmr.msra.gmra.mrb[18].mxu0 %vm1173_vm2, %v1105_v6  ;;  %1930 = vmatmul.mubr.msk.f32.vlgmr.msra.gmra.mrb[18].mxu1 %vm1173_vm2, %v1105_v6 }
 0x24f   :  { %2542 = vmatpush1.bf16.msra.mxu0 %v3449_v49  ;;  %2558 = vmatpush1.bf16.msra.mxu1 %v3461_v61  ;;  %v1748_v49 = vlaneseq }
 0x250   :  { %2544 = vmatprep.subr.bf16.mxu0 %v3474_v9  ;;  %2560 = vmatprep.subr.bf16.mxu1 %v3476_v10 }
 0x251   :  { %1528 = vmatprep.mubr.f32.mxu0 %v2609_v40  ;;  %1599 = vmatprep.mubr.f32.mxu1 %v2609_v40 }
 0x253   :  { %2546 = vmatpush1.bf16.msra.mxu0 %v3488_v22  ;;  %2562 = vmatpush1.bf16.msra.mxu1 %v3501_v33 }
 0x254   :  { %2548 = vmatprep.subr.bf16.mxu0 %v3503_v37  ;;  %2564 = vmatprep.subr.bf16.mxu1 %v3514_v55 }
 0x257   :  { %2550 = vmatpush1.bf16.msra.mxu0 %v3526_v7  ;;  %2566 = vmatpush1.bf16.msra.mxu1 %v3539_v4 }
 0x258   :  { %2552 = vmatprep.subr.bf16.mxu0 %v3541_v1  ;;  %2568 = vmatprep.subr.bf16.mxu1 %v3553_v28  ;;  %v3843_v1 = vld [vmem:[#allocation6_spill] sm:$0xff] }
 0x25b   :  { %2554 = vmatpush1.bf16.msra.mxu0 %v3574_v15  ;;  %2570 = vmatpush1.bf16.msra.mxu1 %v3578_v26  ;;  %v3844_v15 = vld [vmem:[#allocation7_spill] sm:$0xff] }
 0x25c   :  { %2572 = vmatprep.subr.bf16.mxu0 %v3580_v19  ;;  %2588 = vmatprep.subr.bf16.mxu1 %v3583_v51  ;;  %v3845_v19 = vld [vmem:[#allocation8_spill] sm:$0xff] }
 0x25e   :  { %1931 = vmatmul.mubr.msk.f32.vlgmr.msra.gmra.mrb[20].mxu0 %vm1173_vm2, %v1108_v48  ;;  %1932 = vmatmul.mubr.msk.f32.vlgmr.msra.gmra.mrb[20].mxu1 %vm1173_vm2, %v1108_v48 }
 0x25f   :  { %2574 = vmatpush1.bf16.msra.mxu0 %v3616_v34  ;;  %2590 = vmatpush1.bf16.msra.mxu1 %v3618_v30  ;;  %v3847_v30 = vld [vmem:[#allocation10_spill] sm:$0xff] }
 0x260   :  { %2576 = vmatprep.subr.bf16.mxu0 %v3626_v63  ;;  %2592 = vmatprep.subr.bf16.mxu1 %v3628_v32  ;;  %v3849_v63 = vld [vmem:[#allocation11_spill] sm:$0xff] }
 0x261   :  { %1670 = vmatprep.mubr.f32.mxu0 %v2609_v40  ;;  %1741 = vmatprep.mubr.f32.mxu1 %v2609_v40  ;;  %v1749_v40 = vshrl.u32 %v1748_v49, 7 }
 0x263   :  { %2578 = vmatpush1.bf16.msra.mxu0 %v3652_v42  ;;  %2594 = vmatpush1.bf16.msra.mxu1 %v3654_v50  ;;  %v1750_v61 = vsub.s32 0, %v1749_v40 }
 0x264   :  { %2580 = vmatprep.subr.bf16.mxu0 %v3664_v62  ;;  %2596 = vmatprep.subr.bf16.mxu1 %v3666_v2  ;;  %v1858_v62 = vunpack.c.0.s8 %v1857_v57 }
 0x267   :  { %2582 = vmatpush1.bf16.msra.mxu0 %v2517_v29  ;;  %2598 = vmatpush1.bf16.msra.mxu1 %v2533_v39  ;;  %v1861_v39 = vsub.s32 %v1858_v62, %v1749_v40 }
 0x268   :  { %2584 = vmatprep.subr.bf16.mxu0 %v2519_v47  ;;  %2600 = vmatprep.subr.bf16.mxu1 %v2535_v56 }
 0x26b   :  { %2586 = vmatpush1.bf16.msra.mxu0 %v2521_v58  ;;  %2602 = vmatpush1.bf16.msra.mxu1 %v2537_v17 }
 0x26e   :  { %1933 = vmatmul.mubr.msk.f32.vlgmr.msra.gmra.mrb[22].mxu0 %vm1173_vm2, %v1108_v48  ;;  %1934 = vmatmul.mubr.msk.f32.vlgmr.msra.gmra.mrb[22].mxu1 %vm1173_vm2, %v1108_v48 }
 0x311   :  { %v1243_v9 = vpop.f32.mrb[16].mxu0  ;;  %v1314_v10 = vpop.f32.mrb[16].mxu1 }
 0x312   :  { %v1751_v22 = vrot.slane %v1243_v9, %v1750_v61  ;;  %v1759_v33 = vrot.slane %v1314_v10, %v1750_v61  ;;  %v1245_v37 = vpop.f32.mrb[17].mxu0  ;;  %v1316_v55 = vpop.f32.mrb[17].mxu1 }
 0x313   :  { %v1755_v7 = vrot.slane %v1245_v37, %v1750_v61  ;;  %v1763_v4 = vrot.slane %v1316_v55, %v1750_v61 }
 0x314   :  { %v1780_v28 = vmul.f32 %v1751_v22, %v3843_v1  ;;  %v1782_v26 = vmul.f32 %v1759_v33, %v3844_v15 }
 0x315   :  { %v1781_v51 = vmul.f32 %v1755_v7, %v3845_v19  ;;  %v1783_v31 = vmul.f32 %v1763_v4, %v3846_v18 }
 0x321   :  { %v1385_v12 = vpop.f32.mrb[18].mxu0  ;;  %v1456_v44 = vpop.f32.mrb[18].mxu1 }
 0x322   :  { %v1767_v5 = vrot.slane %v1385_v12, %v1750_v61  ;;  %v1775_v35 = vrot.slane %v1456_v44, %v1750_v61  ;;  %v1387_v53 = vpop.f32.mrb[19].mxu0  ;;  %v1458_v16 = vpop.f32.mrb[19].mxu1 }
 0x323   :  { %v1771_v36 = vrot.slane %v1387_v53, %v1750_v61  ;;  %v1779_v34 = vrot.slane %v1458_v16, %v1750_v61 }
 0x324   :  { %v1784_v24 = vmul.f32 %v1767_v5, %v3847_v30  ;;  %v1786_v6 = vmul.f32 %v1775_v35, %v3848_v13 }
 0x325   :  { %v1785_v32 = vmul.f32 %v1771_v36, %v3849_v63  ;;  %v1787_v38 = vmul.f32 %v1779_v34, %v3850_v41 }
 0x331   :  { %v1530_v46 = vpop.f32.mrb[20].mxu0  ;;  %v1601_v25 = vpop.f32.mrb[20].mxu1 }
 0x332   :  { %v1791_v52 = vrot.slane %v1530_v46, %v1750_v61  ;;  %v1799_v42 = vrot.slane %v1601_v25, %v1750_v61  ;;  %v1532_v50 = vpop.f32.mrb[21].mxu0  ;;  %v1603_v54 = vpop.f32.mrb[21].mxu1 }
 0x333   :  { %v1795_v60 = vrot.slane %v1532_v50, %v1750_v61  ;;  %v1803_v2 = vrot.slane %v1603_v54, %v1750_v61 }
 0x334   :  { %v1820_v8 = vadd.f32 %v1791_v52, %v1780_v28  ;;  %v1822_v14 = vadd.f32 %v1799_v42, %v1782_v26 }
 0x335   :  { %v1821_v20 = vadd.f32 %v1795_v60, %v1781_v51  ;;  %v1823_v21 = vadd.f32 %v1803_v2, %v1783_v31 }
 0x336   :  { %v1828_v23 = vmax.f32 %v1820_v8, 0.0  ;;  %v1830_v27 = vmax.f32 %v1822_v14, 0.0 }
 0x337   :  { %v1829_v29 = vmax.f32 %v1821_v20, 0.0  ;;  %v1831_v43 = vmax.f32 %v1823_v21, 0.0 }
 0x339   :  { %v1935_v47 = vpack.c.bf16 %v1829_v29, %v1828_v23  ;;  %v1936_v56 = vpack.c.bf16 %v1831_v43, %v1830_v27 }
 0x33b   :  { %v1862_v59 = vrot.slane %v1935_v47, %v1861_v39  ;;  %v1869_v3 = vrot.slane %v1936_v56, %v1861_v39 }
 0x33d   :  { %v1884_v45 = vcombine.low %v1862_v59, %v1869_v3 }
 0x33f   :  { %v1892_v31 = vrot.slane %v1884_v45, %v1861_v39 }
 0x341   :  { %v1672_v58 = vpop.f32.mrb[22].mxu0  ;;  %v1743_v17 = vpop.f32.mrb[22].mxu1 }
 0x342   :  { %v1807_v11 = vrot.slane %v1672_v58, %v1750_v61  ;;  %v1815_v48 = vrot.slane %v1743_v17, %v1750_v61  ;;  %v1674_v49 = vpop.f32.mrb[23].mxu0  ;;  %v1745_v9 = vpop.f32.mrb[23].mxu1 }
 0x343   :  { %v1811_v10 = vrot.slane %v1674_v49, %v1750_v61  ;;  %v1819_v22 = vrot.slane %v1745_v9, %v1750_v61 }
 0x344   :  { %v1824_v33 = vadd.f32 %v1807_v11, %v1784_v24  ;;  %v1826_v37 = vadd.f32 %v1815_v48, %v1786_v6 }
 0x345   :  { %v1825_v55 = vadd.f32 %v1811_v10, %v1785_v32  ;;  %v1827_v7 = vadd.f32 %v1819_v22, %v1787_v38 }
 0x346   :  { %v1832_v4 = vmax.f32 %v1824_v33, 0.0  ;;  %v1834_v40 = vmax.f32 %v1826_v37, 0.0 }
 0x347   :  { %v1833_v1 = vmax.f32 %v1825_v55, 0.0  ;;  %v1835_v28 = vmax.f32 %v1827_v7, 0.0 }
 0x349   :  { %v1937_v15 = vpack.c.bf16 %v1833_v1, %v1832_v4  ;;  %v1938_v26 = vpack.c.bf16 %v1835_v28, %v1834_v40 }
 0x34b   :  { %v1876_v19 = vrot.slane %v1937_v15, %v1861_v39  ;;  %v1883_v51 = vrot.slane %v1938_v26, %v1861_v39 }
 0x34d   :  { %v1885_v18 = vcombine.low %v1876_v19, %v1883_v51 }
 0x34f   :  { %v1899_v12 = vrot.slane %v1885_v18, %v1861_v39 }
 0x351   :  { %v1900_v44 = vcombine.low %v1892_v31, %v1899_v12 }
 0x353   :  { %1902 = vst [vmem:[%s3760_s6] sm:$0xff] %v1900_v44 }

// kernel: image_generator_forward.5
= control target key start
LH: loop header
LB: loop body
LE: loop exit
PB: predicated region body
PF: predicated region fallthrough
CT: control target
= control target key end

     0   :  { %s2488_s18 = smov 0   ;;  %s2490_s19 = smov 0   ;;  %s2946_s0 = inlined_call_operand.vmem [shape: bf16[64,142], index: 0, kind: input, shape index: {}]   ;;  %s2947_s1 = inlined_call_operand.vmem [shape: bf16[4,4,32,64], index: 1, kind: input, shape index: {}]   ;;  %s2948_s2 = inlined_call_operand.vmem [shape: f32[32,1], index: 2, kind: input, shape index: {}]   ;;  %s2949_s3 = inlined_call_operand.vmem [shape: f32[32,1], index: 3, kind: input, shape index: {}]   ;;  %s2950_s4 = inlined_call_operand.vmem [shape: f32[1,128], index: 4, kind: input, shape index: {}]   ;;  %s2951_s5 = inlined_call_operand.vmem [shape: bf16[4,32,128], index: 5, kind: output, shape index: {}]  }
   0x1   :  { %s2492_s20 = smov 0  }
   0x2 LB: > { %s2504_s21 = sadd.s32 4294967295, %s2445_s20   ;;  %s2507_s22 = sadd.s32 1, %s2445_s20   ;;  %s2445_s20 = sphi %s2492_s20, %s2955_s20   ;;  %s2441_s19 = sphi %s2490_s19, %s2954_s19   ;;  %s2437_s18 = sphi %s2488_s18, %s2953_s18  }
   0x3   : > { %s40_s23 = ssub.s32 %s2445_s20, %s2507_s22  ;;  %s43_s24 = sadd.s32 1, %s2441_s19 }
   0x4   : > { %p41_p0 = scmp.eq.s32.totalorder %s40_s23, 0  ;;  %p50_p1 = scmp.ne.s32.totalorder %s2441_s19, %s2437_s18 }
   0x5   : > { %p51_p2 = scmp.eq.s32.totalorder %s2445_s20, 0  ;;  %p153_p3 = scmp.eq.s32.totalorder %s2504_s21, 1 }
   0x6   : > { %s2517_s25 = scalar_select %p41_p0, %s2441_s19, %s43_s24  }
   0x7   : > { %p52_p4 = por %p51_p2, %p50_p1  ;;  %p2519_p5 = por %p153_p3, %p50_p1 }
   0x8   : > { %p1892_p6 = scmp.ge.s32.totalorder %s2445_s20, 2 }
   0xa   : > { %181 = sbr.rel (%p1892_p6) target bundleno = 29 (0x1d), region = 24 }
  0x11   : > { %184 = sbr.rel (!%p52_p4) target bundleno = 29 (0x1d), region = 28  ;;  %s186_s27 = sand.u32 (%p52_p4), 1, %s2441_s19  }
  0x12   : > { %s1997_s28 = sshll.u32 (%p52_p4), %s2445_s20, 3  ;;  %s1893_s29 = sshll.u32 (%p52_p4), %s186_s27, 7 }
  0x13   : > { %s2529_s7 = scalar_lea.vmem (%p52_p4), %s2947_s1, %s1997_s28  ;;  %s188_s8 = scalar_lea.vmem (%p52_p4), [#allocation2], %s1893_s29 }
  0x14   : > { %v207_v0 = vld [vmem:[%s2529_s7] sm:$0xff] (%p52_p4)   ;;  %v211_v1 = vld [vmem:[%s2529_s7 + $0x10] sm:$0xff] (%p52_p4)  }
  0x15   : > { %v215_v2 = vld [vmem:[%s2529_s7 + $0x20] sm:$0xff] (%p52_p4)   ;;  %208 = vst [vmem:[%s188_s8] sm:$0xff] (%p52_p4), %v207_v0   ;;  %212 = vst [vmem:[%s188_s8 + $0x8] sm:$0xff] (%p52_p4), %v211_v1   ;;  %v219_v3 = vld [vmem:[%s2529_s7 + $0x30] sm:$0xff] (%p52_p4)  }
  0x16   : > { %216 = vst [vmem:[%s188_s8 + $0x10] sm:$0xff] (%p52_p4), %v215_v2   ;;  %v223_v4 = vld [vmem:[%s2529_s7 + $0x40] sm:$0xff] (%p52_p4)   ;;  %v227_v5 = vld [vmem:[%s2529_s7 + $0x50] sm:$0xff] (%p52_p4)   ;;  %220 = vst [vmem:[%s188_s8 + $0x18] sm:$0xff] (%p52_p4), %v219_v3  }
  0x17   : > { %224 = vst [vmem:[%s188_s8 + $0x20] sm:$0xff] (%p52_p4), %v223_v4   ;;  %228 = vst [vmem:[%s188_s8 + $0x28] sm:$0xff] (%p52_p4), %v227_v5   ;;  %v231_v6 = vld [vmem:[%s2529_s7 + $0x60] sm:$0xff] (%p52_p4)   ;;  %v235_v7 = vld [vmem:[%s2529_s7 + $0x70] sm:$0xff] (%p52_p4)  }
  0x18   : > { %v239_v8 = vld [vmem:[%s2529_s7 + $0x80] sm:$0xff]   ;;  %232 = vst [vmem:[%s188_s8 + $0x30] sm:$0xff] %v231_v6   ;;  %236 = vst [vmem:[%s188_s8 + $0x38] sm:$0xff] %v235_v7   ;;  %v243_v9 = vld [vmem:[%s2529_s7 + $0x90] sm:$0xff]  }
  0x19   : > { %240 = vst [vmem:[%s188_s8 + $0x40] sm:$0xff] %v239_v8   ;;  %v247_v10 = vld [vmem:[%s2529_s7 + $0xa0] sm:$0xff]   ;;  %v251_v11 = vld [vmem:[%s2529_s7 + $0xb0] sm:$0xff]   ;;  %244 = vst [vmem:[%s188_s8 + $0x48] sm:$0xff] %v243_v9  }
  0x1a   : > { %248 = vst [vmem:[%s188_s8 + $0x50] sm:$0xff] %v247_v10   ;;  %252 = vst [vmem:[%s188_s8 + $0x58] sm:$0xff] %v251_v11   ;;  %v255_v12 = vld [vmem:[%s2529_s7 + $0xc0] sm:$0xff]   ;;  %v259_v13 = vld [vmem:[%s2529_s7 + $0xd0] sm:$0xff]  }
  0x1b   : > { %v263_v14 = vld [vmem:[%s2529_s7 + $0xe0] sm:$0xff]   ;;  %256 = vst [vmem:[%s188_s8 + $0x60] sm:$0xff] %v255_v12   ;;  %260 = vst [vmem:[%s188_s8 + $0x68] sm:$0xff] %v259_v13   ;;  %v267_v15 = vld [vmem:[%s2529_s7 + $0xf0] sm:$0xff]  }
  0x1c   : > { %264 = vst [vmem:[%s188_s8 + $0x70] sm:$0xff] %v263_v14   ;;  %268 = vst [vmem:[%s188_s8 + $0x78] sm:$0xff] %v267_v15  }
  0x1d PF: > { %p1896_p7 = scmp.ge.s32.totalorder %s2445_s20, 1  ;;  %p374_p8 = scmp.lt.s32.totalorder %s2445_s20, 3 }
  0x1f   : > { %p375_p9 = pnand %p1896_p7, %p374_p8 }
  0x20   : > { %v2552_v16 = vld [vmem:[%s2946_s0] ss:$8 sps:$4 sm:$0xff] (!%p375_p9)   ;;  %s2447_s11 = smov (!%p375_p9), 126   ;;  %s2448_s12 = smov (!%p375_p9), 127   ;;  %v2560_v17 = vld [vmem:[%s2946_s0 + $0x4] ss:$8 sps:$4 sm:$0xff] (!%p375_p9)  }
  0x21   : > { %378 = sbr.rel (%p375_p9) target bundleno = 829 (0x33d), region = 77  ;;  %825 = vrot.lane.b32.xlu1 (!%p375_p9), %v2552_v16, %s2447_s11  ;;  %491 = vrot.lane.b32.xlu0 (!%p375_p9), %v2552_v16, %s2448_s12  ;;  %v2449_v18 = vmov (!%p375_p9), 0.0   ;;  %v2567_v19 = vld [vmem:[%s2946_s0 + $0x14] ss:$8 sps:$4 sm:$0xff] (!%p375_p9)   ;;  %v2572_v20 = vld [vmem:[%s2946_s0 + $0x10] ss:$8 sps:$4 sm:$0xff] (!%p375_p9)  }
  0x22   : > { %2110 = vmatprep.subr.bf16.mxu0 (!%p375_p9), %v2449_v18  ;;  %2158 = vmatprep.subr.bf16.mxu1 (!%p375_p9), %v2449_v18  ;;  %s381_s23 = sand.u32 (!%p375_p9), 1, %s2437_s18   ;;  %v2587_v21 = vld [vmem:[%s2946_s0 + $0x24] ss:$8 sps:$4 sm:$0xff] (!%p375_p9)   ;;  %v2592_v22 = vld [vmem:[%s2946_s0 + $0x20] ss:$8 sps:$4 sm:$0xff] (!%p375_p9)   ;;  %vm2450_vm0 = vmmov (!%p375_p9), 0  }
  0x23   : > { %s1897_s30 = sshll.u32 (!%p375_p9), %s381_s23, 7  ;;  %2118 = vmatprep.mubr.msk.bf16.mxu0 (!%p375_p9), %vm2450_vm0, %v2449_v18  ;;  %2166 = vmatprep.mubr.msk.bf16.mxu1 (!%p375_p9), %vm2450_vm0, %v2449_v18  ;;  %v2607_v23 = vld [vmem:[%s2946_s0 + $0x34] ss:$8 sps:$4 sm:$0xff] (!%p375_p9)   ;;  %v2612_v24 = vld [vmem:[%s2946_s0 + $0x30] ss:$8 sps:$4 sm:$0xff] (!%p375_p9)   ;;  %s2451_s13 = smov (!%p375_p9), 122  }
  0x24   : > { %s2596_s6 = scalar_lea.vmem (!%p375_p9), [#allocation2], %s1897_s30  ;;  %s2452_s14 = smov (!%p375_p9), 121   ;;  %vm841_vm1 = vcmask (!%p375_p9), 1031168   ;;  %vm507_vm2 = vcmask (!%p375_p9), 1039360   ;;  %vm516_vm3 = vcmask (!%p375_p9), 523264   ;;  %vm658_vm4 = vcmask (!%p375_p9), 998400  }
  0x25   : > { %827 = vrot.lane.b32.xlu1 (!%p375_p9), %v2560_v17, %s2447_s11  ;;  %493 = vrot.lane.b32.xlu0 (!%p375_p9), %v2560_v17, %s2448_s12  ;;  %s2455_s15 = smov (!%p375_p9), 115   ;;  %s2456_s16 = smov (!%p375_p9), 114   ;;  %v2399_v46 = vld [vmem:[%s2596_s6 + $0x8] sm:$0xff] (!%p375_p9)   ;;  %v2401_v52 = vld [vmem:[%s2946_s0 + $0x10] ss:$8 sps:$4 sm:$0xff] (!%p375_p9)   ;;  %vm737_vm5 = vcmask (!%p375_p9), 990208  }
  0x26   : > { %v2400_v47 = vld [vmem:[%s2946_s0] ss:$8 sps:$4 sm:$0xff] (!%p375_p9)   ;;  %v2404_v58 = vld [vmem:[%s2946_s0 + $0x30] ss:$8 sps:$4 sm:$0xff] (!%p375_p9)   ;;  %vm1021_vm6 = vcmask (!%p375_p9), 982016   ;;  %vm1220_vm7 = vcmask (!%p375_p9), 949248  }
  0x27   : > { %v2402_v51 = vld [vmem:[%s2596_s6 + $0x28] sm:$0xff] (!%p375_p9)   ;;  %v2405_v61 = vld [vmem:[%s2596_s6] sm:$0xff] (!%p375_p9)   ;;  %v2407_v14 = vld [vmem:[%s2596_s6 + $0x10] sm:$0xff] (!%p375_p9)   ;;  %vm1299_vm8 = vcmask (!%p375_p9), 941056   ;;  %vm1552_vm9 = vcmask (!%p375_p9), 932864   ;;  %s1898_s17 = sshll.u32 (!%p375_p9), %s381_s23, 5 }
  0x28   : > { %v2403_v55 = vld [vmem:[%s2946_s0 + $0x20] ss:$8 sps:$4 sm:$0xff]   ;;  %s416_s20 = scalar_lea.vmem [#allocation3], %s1898_s17  ;;  %s2006_s18 = sshll.u32 (%p2519_p5), %s2504_s21, 3 }
  0x29   : > { %497 = vrot.lane.b32.xlu1 %v2567_v19, %s2448_s12  ;;  %495 = vrot.lane.b32.xlu0 %v2572_v20, %s2448_s12  ;;  %v2406_v1 = vld [vmem:[%s2596_s6 + $0x20] sm:$0xff]   ;;  %s1741_s27 = scalar_lea.vmem (%p2519_p5), %s2951_s5, %s2006_s18 }
  0x2d   : > { %831 = vrot.lane.b32.xlu1 %v2567_v19, %s2447_s11  ;;  %829 = vrot.lane.b32.xlu0 %v2572_v20, %s2447_s11 }
  0x31   : > { %501 = vrot.lane.b32.xlu1 %v2587_v21, %s2448_s12  ;;  %499 = vrot.lane.b32.xlu0 %v2592_v22, %s2448_s12 }
  0x35   : > { %835 = vrot.lane.b32.xlu1 %v2587_v21, %s2447_s11  ;;  %833 = vrot.lane.b32.xlu0 %v2592_v22, %s2447_s11 }
  0x39   : > { %505 = vrot.lane.b32.xlu1 %v2607_v23, %s2448_s12  ;;  %503 = vrot.lane.b32.xlu0 %v2612_v24, %s2448_s12  ;;  %s2454_s12 = smov 116  }
  0x3d   : > { %839 = vrot.lane.b32.xlu1 %v2607_v23, %s2447_s11  ;;  %837 = vrot.lane.b32.xlu0 %v2612_v24, %s2447_s11  ;;  %s2453_s11 = smov 120  }
  0x41   : > { %644 = vrot.lane.b32.xlu1 %v2560_v17, %s2451_s13  ;;  %642 = vrot.lane.b32.xlu0 %v2552_v16, %s2451_s13 }
  0x45   : > { %723 = vrot.lane.b32.xlu1 %v2560_v17, %s2452_s14  ;;  %721 = vrot.lane.b32.xlu0 %v2552_v16, %s2452_s14 }
  0x49   : > { %648 = vrot.lane.b32.xlu1 %v2567_v19, %s2451_s13  ;;  %646 = vrot.lane.b32.xlu0 %v2572_v20, %s2451_s13 }
  0x4d   : > { %727 = vrot.lane.b32.xlu1 %v2567_v19, %s2452_s14  ;;  %725 = vrot.lane.b32.xlu0 %v2572_v20, %s2452_s14 }
  0x51   : > { %652 = vrot.lane.b32.xlu1 %v2587_v21, %s2451_s13  ;;  %650 = vrot.lane.b32.xlu0 %v2592_v22, %s2451_s13 }
  0x55   : > { %731 = vrot.lane.b32.xlu1 %v2587_v21, %s2452_s14  ;;  %729 = vrot.lane.b32.xlu0 %v2592_v22, %s2452_s14 }
  0x59   : > { %656 = vrot.lane.b32.xlu1 %v2607_v23, %s2451_s13  ;;  %654 = vrot.lane.b32.xlu0 %v2612_v24, %s2451_s13 }
  0x5d   : > { %735 = vrot.lane.b32.xlu1 %v2607_v23, %s2452_s14  ;;  %733 = vrot.lane.b32.xlu0 %v2612_v24, %s2452_s14 }
  0x61   : > { %1007 = vrot.lane.b32.xlu1 %v2560_v17, %s2453_s11  ;;  %1005 = vrot.lane.b32.xlu0 %v2552_v16, %s2453_s11 }
  0x65   : > { %1011 = vrot.lane.b32.xlu1 %v2567_v19, %s2453_s11  ;;  %1009 = vrot.lane.b32.xlu0 %v2572_v20, %s2453_s11 }
  0x69   : > { %1015 = vrot.lane.b32.xlu1 %v2587_v21, %s2453_s11  ;;  %1013 = vrot.lane.b32.xlu0 %v2592_v22, %s2453_s11 }
  0x6d   : > { %1019 = vrot.lane.b32.xlu1 %v2607_v23, %s2453_s11  ;;  %1017 = vrot.lane.b32.xlu0 %v2612_v24, %s2453_s11 }
  0x71   : > { %1206 = vrot.lane.b32.xlu1 %v2560_v17, %s2454_s12  ;;  %1204 = vrot.lane.b32.xlu0 %v2552_v16, %s2454_s12 }
  0x75   : > { %1285 = vrot.lane.b32.xlu1 %v2560_v17, %s2455_s15  ;;  %1283 = vrot.lane.b32.xlu0 %v2552_v16, %s2455_s15 }
  0x79   : > { %1210 = vrot.lane.b32.xlu1 %v2567_v19, %s2454_s12  ;;  %1208 = vrot.lane.b32.xlu0 %v2572_v20, %s2454_s12 }
  0x7d   : > { %1289 = vrot.lane.b32.xlu1 %v2567_v19, %s2455_s15  ;;  %1287 = vrot.lane.b32.xlu0 %v2572_v20, %s2455_s15 }
  0x81   : > { %1214 = vrot.lane.b32.xlu1 %v2587_v21, %s2454_s12  ;;  %1212 = vrot.lane.b32.xlu0 %v2592_v22, %s2454_s12 }
  0x85   : > { %1293 = vrot.lane.b32.xlu1 %v2587_v21, %s2455_s15  ;;  %1291 = vrot.lane.b32.xlu0 %v2592_v22, %s2455_s15 }
  0x89   : > { %1218 = vrot.lane.b32.xlu1 %v2607_v23, %s2454_s12  ;;  %1216 = vrot.lane.b32.xlu0 %v2612_v24, %s2454_s12 }
  0x8d   : > { %1297 = vrot.lane.b32.xlu1 %v2607_v23, %s2455_s15  ;;  %1295 = vrot.lane.b32.xlu0 %v2612_v24, %s2455_s15 }
  0x91   : > { %1538 = vrot.lane.b32.xlu1 %v2560_v17, %s2456_s16  ;;  %1536 = vrot.lane.b32.xlu0 %v2552_v16, %s2456_s16 }
  0x93   : > { %v826_v25 = vpop.permute.xlu1 %825  ;;  %v492_v26 = vpop.permute.xlu0 %491 }
  0x95   : > { %1542 = vrot.lane.b32.xlu1 %v2567_v19, %s2456_s16  ;;  %1540 = vrot.lane.b32.xlu0 %v2572_v20, %s2456_s16  ;;  %v2408_v19 = vld [vmem:[%s2596_s6 + $0x30] sm:$0xff]  }
  0x97   : > { %v828_v27 = vpop.permute.xlu1 %827  ;;  %v494_v28 = vpop.permute.xlu0 %493 }
  0x98   : > { %v842_v29 = vsel %vm841_vm1, %v826_v25, %v828_v27  ;;  %v508_v30 = vsel %vm507_vm2, %v492_v26, %v494_v28 }
  0x99   : > { %2159 = vmatpush3.bf16.msra.mxu1 %v842_v29  ;;  %2111 = vmatpush3.bf16.msra.mxu0 %v508_v30  ;;  %v2409_v29 = vld [vmem:[%s2596_s6 + $0x18] sm:$0xff]  }
  0x9a   : > { %2112 = vmatprep.subr.bf16.mxu0 %v2449_v18  ;;  %2160 = vmatprep.subr.bf16.mxu1 %v2449_v18 }
  0x9b   : > { %v498_v31 = vpop.permute.xlu1 %497  ;;  %v496_v32 = vpop.permute.xlu0 %495  ;;  %1546 = vrot.lane.b32.xlu1 %v2587_v21, %s2456_s16  ;;  %1544 = vrot.lane.b32.xlu0 %v2592_v22, %s2456_s16 }
  0x9c   : > { %v509_v33 = vsel %vm507_vm2, %v496_v32, %v498_v31 }
  0x9d   : > { %2113 = vmatpush3.bf16.msra.mxu0 %v509_v33 }
  0x9e   : > { %2114 = vmatprep.subr.bf16.mxu0 %v2449_v18 }
  0x9f   : > { %v832_v34 = vpop.permute.xlu1 %831  ;;  %v830_v35 = vpop.permute.xlu0 %829  ;;  %1550 = vrot.lane.b32.xlu1 %v2607_v23, %s2456_s16  ;;  %1548 = vrot.lane.b32.xlu0 %v2612_v24, %s2456_s16 }
  0xa0   : > { %v843_v36 = vsel %vm841_vm1, %v830_v35, %v832_v34 }
  0xa1   : > { %2161 = vmatpush3.bf16.msra.mxu1 %v843_v36 }
  0xa2   : > { %2162 = vmatprep.subr.bf16.mxu1 %v2449_v18 }
  0xa3   : > { %v502_v37 = vpop.permute.xlu1 %501  ;;  %v500_v38 = vpop.permute.xlu0 %499 }
  0xa4   : > { %v510_v39 = vsel %vm507_vm2, %v500_v38, %v502_v37 }
  0xa5   : > { %2115 = vmatpush3.bf16.msra.mxu0 %v510_v39 }
  0xa6   : > { %2116 = vmatprep.subr.bf16.mxu0 %v2449_v18 }
  0xa7   : > { %v836_v40 = vpop.permute.xlu1 %835  ;;  %v834_v41 = vpop.permute.xlu0 %833 }
  0xa8   : > { %v844_v42 = vsel %vm841_vm1, %v834_v41, %v836_v40  ;;  %v2411_v40 = vld [vmem:[%s2596_s6 + $0x48] sm:$0xff]  }
  0xa9   : > { %2163 = vmatpush3.bf16.msra.mxu1 %v844_v42 }
  0xaa   : > { %2164 = vmatprep.subr.bf16.mxu1 %v2449_v18 }
  0xab   : > { %v506_v43 = vpop.permute.xlu1 %505  ;;  %v504_v44 = vpop.permute.xlu0 %503 }
  0xac   : > { %v511_v45 = vsel %vm507_vm2, %v504_v44, %v506_v43  ;;  %v2412_v43 = vld [vmem:[%s2596_s6 + $0x68] sm:$0xff]  }
  0xad   : > { %2117 = vmatpush3.bf16.msra.mxu0 %v511_v45 }
  0xae   : > { %2122 = vmatprep.subr.bf16.mxu0 %v2449_v18 }
  0xaf   : > { %v840_v48 = vpop.permute.xlu1 %839  ;;  %v838_v49 = vpop.permute.xlu0 %837 }
  0xb0   : > { %2119 = vmatmul.mubr.msk.bf16.vlgmr.msra.gmra.mrb[0].mxu0 %vm516_vm3, %v2399_v46  ;;  %v845_v50 = vsel %vm841_vm1, %v838_v49, %v840_v48  ;;  %v2413_v48 = vld [vmem:[%s2596_s6 + $0x40] sm:$0xff]  }
  0xb1   : > { %2123 = vmatpush3.bf16.msra.mxu0 %v2400_v47  ;;  %2165 = vmatpush3.bf16.msra.mxu1 %v845_v50 }
  0xb2   : > { %2124 = vmatprep.subr.bf16.mxu0 %v2449_v18  ;;  %2170 = vmatprep.subr.bf16.mxu1 %v2449_v18 }
  0xb3   : > { %v645_v53 = vpop.permute.xlu1 %644  ;;  %v643_v54 = vpop.permute.xlu0 %642  ;;  %2130 = vmatprep.mubr.msk.bf16.mxu0 %vm2450_vm0, %v2449_v18 }
  0xb4   : > { %2167 = vmatmul.mubr.msk.bf16.vlgmr.msra.gmra.mrb[0].mxu1 %vm516_vm3, %v2402_v51  ;;  %v2717_v0 = vsel %vm658_vm4, %v643_v54, %v645_v53 }
  0xb5   : > { %2125 = vmatpush3.bf16.msra.mxu0 %v2401_v52  ;;  %2171 = vmatpush3.bf16.msra.mxu1 %v508_v30  ;;  %v2414_v52 = vld [vmem:[%s2596_s6 + $0x60] sm:$0xff]  }
  0xb6   : > { %2126 = vmatprep.subr.bf16.mxu0 %v2449_v18  ;;  %2172 = vmatprep.subr.bf16.mxu1 %v2449_v18 }
  0xb7   : > { %v724_v56 = vpop.permute.xlu1 %723  ;;  %v722_v57 = vpop.permute.xlu0 %721  ;;  %2178 = vmatprep.mubr.msk.bf16.mxu1 %vm2450_vm0, %v2449_v18 }
  0xb8   : > { %v2727_v4 = vsel %vm737_vm5, %v722_v57, %v724_v56 }
  0xb9   : > { %2127 = vmatpush3.bf16.msra.mxu0 %v2403_v55  ;;  %2173 = vmatpush3.bf16.msra.mxu1 %v509_v33  ;;  %v2410_v33 = vld [vmem:[%s2596_s6 + $0x38] sm:$0xff]  }
  0xba   : > { %2128 = vmatprep.subr.bf16.mxu0 %v2449_v18  ;;  %2174 = vmatprep.subr.bf16.mxu1 %v2449_v18 }
  0xbb   : > { %v649_v59 = vpop.permute.xlu1 %648  ;;  %v647_v60 = vpop.permute.xlu0 %646 }
  0xbc   : > { %v2730_v5 = vsel %vm658_vm4, %v647_v60, %v649_v59 }
  0xbd   : > { %2129 = vmatpush3.bf16.msra.mxu0 %v2404_v58  ;;  %2175 = vmatpush3.bf16.msra.mxu1 %v510_v39 }
  0xbe   : > { %2134 = vmatprep.subr.bf16.mxu0 %v2449_v18  ;;  %2176 = vmatprep.subr.bf16.mxu1 %v2449_v18 }
  0xbf   : > { %v728_v62 = vpop.permute.xlu1 %727  ;;  %v726_v63 = vpop.permute.xlu0 %725 }
  0xc0   : > { %2131 = vmatmul.mubr.msk.bf16.vlgmr.msra.gmra.mrb[0].mxu0 %vm516_vm3, %v2405_v61  ;;  %v2740_v8 = vsel %vm737_vm5, %v726_v63, %v728_v62  ;;  %v2415_v63 = vld [vmem:[%s2596_s6 + $0x50] sm:$0xff]  }
  0xc1   : > { %2135 = vmatpush3.bf16.msra.mxu0 %v2717_v0  ;;  %2177 = vmatpush3.bf16.msra.mxu1 %v511_v45 }
  0xc2   : > { %2136 = vmatprep.subr.bf16.mxu0 %v2449_v18  ;;  %2182 = vmatprep.subr.bf16.mxu1 %v2449_v18 }
  0xc3   : > { %v653_v2 = vpop.permute.xlu1 %652  ;;  %v651_v3 = vpop.permute.xlu0 %650  ;;  %2142 = vmatprep.mubr.msk.bf16.mxu0 %vm2450_vm0, %v2449_v18 }
  0xc4   : > { %2179 = vmatmul.mubr.msk.bf16.vlgmr.msra.gmra.mrb[0].mxu1 %vm516_vm3, %v2406_v1  ;;  %v2743_v9 = vsel %vm658_vm4, %v651_v3, %v653_v2  ;;  %v2416_v3 = vld [vmem:[%s2596_s6 + $0x70] sm:$0xff]  }
  0xc5   : > { %2137 = vmatpush3.bf16.msra.mxu0 %v2730_v5  ;;  %2183 = vmatpush3.bf16.msra.mxu1 %v2727_v4 }
  0xc6   : > { %2138 = vmatprep.subr.bf16.mxu0 %v2449_v18  ;;  %2184 = vmatprep.subr.bf16.mxu1 %v2449_v18 }
  0xc7   : > { %v732_v6 = vpop.permute.xlu1 %731  ;;  %v730_v7 = vpop.permute.xlu0 %729  ;;  %2190 = vmatprep.mubr.msk.bf16.mxu1 %vm2450_vm0, %v2449_v18 }
  0xc8   : > { %v2750_v12 = vsel %vm737_vm5, %v730_v7, %v732_v6 }
  0xc9   : > { %2139 = vmatpush3.bf16.msra.mxu0 %v2743_v9  ;;  %2185 = vmatpush3.bf16.msra.mxu1 %v2740_v8 }
  0xca   : > { %2140 = vmatprep.subr.bf16.mxu0 %v2449_v18  ;;  %2186 = vmatprep.subr.bf16.mxu1 %v2449_v18 }
  0xcb   : > { %v657_v10 = vpop.permute.xlu1 %656  ;;  %v655_v11 = vpop.permute.xlu0 %654 }
  0xcc   : > { %v2753_v13 = vsel %vm658_vm4, %v655_v11, %v657_v10  ;;  %v2417_v11 = vld [vmem:[%s2596_s6 + $0x58] sm:$0xff]  }
  0xcd   : > { %2141 = vmatpush3.bf16.msra.mxu0 %v2753_v13  ;;  %2187 = vmatpush3.bf16.msra.mxu1 %v2750_v12 }
  0xce   : > { %2146 = vmatprep.subr.bf16.mxu0 %v2449_v18  ;;  %2188 = vmatprep.subr.bf16.mxu1 %v2449_v18 }
  0xcf   : > { %v736_v15 = vpop.permute.xlu1 %735  ;;  %v734_v16 = vpop.permute.xlu0 %733 }
  0xd0   : > { %v2761_v17 = vsel %vm737_vm5, %v734_v16, %v736_v15  ;;  %2143 = vmatmul.mubr.msk.bf16.vlgmr.msra.gmra.mrb[0].mxu0 %vm516_vm3, %v2407_v14  ;;  %v1929_v14 = vld [vmem:[%s2950_s4] ss:$0 sm:$0xff] }
  0xd1   : > { %2147 = vmatpush3.bf16.msra.mxu0 %v2727_v4  ;;  %2189 = vmatpush3.bf16.msra.mxu1 %v2761_v17 }
  0xd2   : > { %2148 = vmatprep.subr.bf16.mxu0 %v2449_v18  ;;  %2194 = vmatprep.subr.bf16.mxu1 %v2449_v18 }
  0xd3   : > { %v1008_v20 = vpop.permute.xlu1 %1007  ;;  %v1006_v21 = vpop.permute.xlu0 %1005  ;;  %2154 = vmatprep.mubr.msk.bf16.mxu0 %vm2450_vm0, %v2449_v18 }
  0xd4   : > { %v1022_v22 = vsel %vm1021_vm6, %v1006_v21, %v1008_v20  ;;  %2191 = vmatmul.mubr.msk.bf16.vlgmr.msra.gmra.mrb[0].mxu1 %vm516_vm3, %v2408_v19 }
  0xd5   : > { %2149 = vmatpush3.bf16.msra.mxu0 %v2740_v8  ;;  %2195 = vmatpush3.bf16.msra.mxu1 %v1022_v22 }
  0xd6   : > { %2150 = vmatprep.subr.bf16.mxu0 %v2449_v18  ;;  %2196 = vmatprep.subr.bf16.mxu1 %v2449_v18 }
  0xd7   : > { %v1012_v23 = vpop.permute.xlu1 %1011  ;;  %v1010_v24 = vpop.permute.xlu0 %1009  ;;  %2202 = vmatprep.mubr.msk.bf16.mxu1 %vm2450_vm0, %v2449_v18 }
  0xd8   : > { %v1023_v25 = vsel %vm1021_vm6, %v1010_v24, %v1012_v23 }
  0xd9   : > { %2151 = vmatpush3.bf16.msra.mxu0 %v2750_v12  ;;  %2197 = vmatpush3.bf16.msra.mxu1 %v1023_v25 }
  0xda   : > { %2152 = vmatprep.subr.bf16.mxu0 %v2449_v18  ;;  %2198 = vmatprep.subr.bf16.mxu1 %v2449_v18 }
  0xdb   : > { %v1016_v26 = vpop.permute.xlu1 %1015  ;;  %v1014_v27 = vpop.permute.xlu0 %1013 }
  0xdc   : > { %v1024_v28 = vsel %vm1021_vm6, %v1014_v27, %v1016_v26 }
  0xdd   : > { %2153 = vmatpush3.bf16.msra.mxu0 %v2761_v17  ;;  %2199 = vmatpush3.bf16.msra.mxu1 %v1024_v28 }
  0xde   : > { %2200 = vmatprep.subr.bf16.mxu1 %v2449_v18  ;;  %2206 = vmatprep.subr.bf16.mxu0 %v2449_v18 }
  0xdf   : > { %v1020_v30 = vpop.permute.xlu1 %1019  ;;  %v1018_v31 = vpop.permute.xlu0 %1017 }
  0xe0   : > { %v1025_v32 = vsel %vm1021_vm6, %v1018_v31, %v1020_v30  ;;  %2155 = vmatmul.mubr.msk.bf16.vlgmr.msra.gmra.mrb[0].mxu0 %vm516_vm3, %v2409_v29 }
  0xe1   : > { %2201 = vmatpush3.bf16.msra.mxu1 %v1025_v32  ;;  %2207 = vmatpush3.bf16.msra.mxu0 %v2727_v4 }
  0xe2   : > { %2208 = vmatprep.subr.bf16.mxu0 %v2449_v18  ;;  %2254 = vmatprep.subr.bf16.mxu1 %v2449_v18 }
  0xe3   : > { %2214 = vmatprep.mubr.msk.bf16.mxu0 %vm2450_vm0, %v2449_v18  ;;  %v1207_v34 = vpop.permute.xlu1 %1206  ;;  %v1205_v35 = vpop.permute.xlu0 %1204 }
  0xe4   : > { %2203 = vmatmul.mubr.msk.bf16.vlgmr.msra.gmra.mrb[0].mxu1 %vm516_vm3, %v2410_v33  ;;  %v1221_v51 = vsel %vm1220_vm7, %v1205_v35, %v1207_v34 }
  0xe5   : > { %2209 = vmatpush3.bf16.msra.mxu0 %v2740_v8  ;;  %2255 = vmatpush3.bf16.msra.mxu1 %v1022_v22 }
  0xe6   : > { %2210 = vmatprep.subr.bf16.mxu0 %v2449_v18  ;;  %2256 = vmatprep.subr.bf16.mxu1 %v2449_v18 }
  0xe7   : > { %2262 = vmatprep.mubr.msk.bf16.mxu1 %vm2450_vm0, %v2449_v18  ;;  %v1286_v36 = vpop.permute.xlu1 %1285  ;;  %v1284_v37 = vpop.permute.xlu0 %1283 }
  0xe8   : > { %v1300_v55 = vsel %vm1299_vm8, %v1284_v37, %v1286_v36 }
  0xe9   : > { %2211 = vmatpush3.bf16.msra.mxu0 %v2750_v12  ;;  %2257 = vmatpush3.bf16.msra.mxu1 %v1023_v25 }
  0xea   : > { %2212 = vmatprep.subr.bf16.mxu0 %v2449_v18  ;;  %2258 = vmatprep.subr.bf16.mxu1 %v2449_v18 }
  0xeb   : > { %v1211_v38 = vpop.permute.xlu1 %1210  ;;  %v1209_v39 = vpop.permute.xlu0 %1208 }
  0xec   : > { %v1222_v56 = vsel %vm1220_vm7, %v1209_v39, %v1211_v38 }
  0xed   : > { %2213 = vmatpush3.bf16.msra.mxu0 %v2761_v17  ;;  %2259 = vmatpush3.bf16.msra.mxu1 %v1024_v28 }
  0xee   : > { %2218 = vmatprep.subr.bf16.mxu0 %v2449_v18  ;;  %2260 = vmatprep.subr.bf16.mxu1 %v2449_v18 }
  0xef   : > { %v1290_v41 = vpop.permute.xlu1 %1289  ;;  %v1288_v42 = vpop.permute.xlu0 %1287 }
  0xf0   : > { %2215 = vmatmul.mubr.msk.bf16.vlgmr.msra.gmra.mrb[4].mxu0 %vm516_vm3, %v2411_v40  ;;  %v1301_v57 = vsel %vm1299_vm8, %v1288_v42, %v1290_v41 }
  0xf1   : > { %2219 = vmatpush3.bf16.msra.mxu0 %v2717_v0  ;;  %2261 = vmatpush3.bf16.msra.mxu1 %v1025_v32 }
  0xf2   : > { %2220 = vmatprep.subr.bf16.mxu0 %v2449_v18  ;;  %2266 = vmatprep.subr.bf16.mxu1 %v2449_v18 }
  0xf3   : > { %2226 = vmatprep.mubr.msk.bf16.mxu0 %vm2450_vm0, %v2449_v18  ;;  %v1215_v44 = vpop.permute.xlu1 %1214  ;;  %v1213_v45 = vpop.permute.xlu0 %1212 }
  0xf4   : > { %2263 = vmatmul.mubr.msk.bf16.vlgmr.msra.gmra.mrb[4].mxu1 %vm516_vm3, %v2412_v43  ;;  %v1223_v58 = vsel %vm1220_vm7, %v1213_v45, %v1215_v44 }
  0xf5   : > { %2221 = vmatpush3.bf16.msra.mxu0 %v2730_v5  ;;  %2267 = vmatpush3.bf16.msra.mxu1 %v2727_v4 }
  0xf6   : > { %2222 = vmatprep.subr.bf16.mxu0 %v2449_v18  ;;  %2268 = vmatprep.subr.bf16.mxu1 %v2449_v18 }
  0xf7   : > { %2274 = vmatprep.mubr.msk.bf16.mxu1 %vm2450_vm0, %v2449_v18  ;;  %v1294_v46 = vpop.permute.xlu1 %1293  ;;  %v1292_v47 = vpop.permute.xlu0 %1291 }
  0xf8   : > { %v1302_v62 = vsel %vm1299_vm8, %v1292_v47, %v1294_v46  ;;  %v2457_v47 = vmov 0  }
  0xf9   : > { %2223 = vmatpush3.bf16.msra.mxu0 %v2743_v9  ;;  %2269 = vmatpush3.bf16.msra.mxu1 %v2740_v8 }
  0xfa   : > { %2224 = vmatprep.subr.bf16.mxu0 %v2449_v18  ;;  %2270 = vmatprep.subr.bf16.mxu1 %v2449_v18 }
  0xfb   : > { %v1219_v49 = vpop.permute.xlu1 %1218  ;;  %v1217_v50 = vpop.permute.xlu0 %1216  ;;  %2385 = vset.pattern.permute.xlu1 %v2457_v47  ;;  %2386 = vset.pattern.permute.xlu0 %v2457_v47 }
  0xfc   : > { %v1224_v61 = vsel %vm1220_vm7, %v1217_v50, %v1219_v49 }
  0xfd   : > { %2225 = vmatpush3.bf16.msra.mxu0 %v2753_v13  ;;  %2271 = vmatpush3.bf16.msra.mxu1 %v2750_v12  ;;  %v2418_v13 = vld [vmem:[%s2596_s6 + $0x78] sm:$0xff]   ;;  %s1899_s6 = sshll.u32 %s2504_s21, 1 }
  0xfe   : > { %2230 = vmatprep.subr.bf16.mxu0 %v2449_v18  ;;  %2272 = vmatprep.subr.bf16.mxu1 %v2449_v18  ;;  %p419_p10 = scmp.lt.s32.totalorder %s1899_s6, 3 }
  0xff   : > { %v1298_v53 = vpop.permute.xlu1 %1297  ;;  %v1296_v54 = vpop.permute.xlu0 %1295 }
 0x100   : > { %2227 = vmatmul.mubr.msk.bf16.vlgmr.msra.gmra.mrb[4].mxu0 %vm516_vm3, %v2413_v48  ;;  %v1303_v0 = vsel %vm1299_vm8, %v1296_v54, %v1298_v53  ;;  %s2957_s6 = smov (!%p419_p10, %s1899_s6), 3 }
 0x101   : > { %2231 = vmatpush3.bf16.msra.mxu0 %v1221_v51  ;;  %2273 = vmatpush3.bf16.msra.mxu1 %v2761_v17  ;;  %s1900_s10 = sshll.u32 %s2957_s6, 3 }
 0x102   : > { %2232 = vmatprep.subr.bf16.mxu0 %v2449_v18  ;;  %2278 = vmatprep.subr.bf16.mxu1 %v2449_v18  ;;  %s422_s11 = scalar_lea.vmem %s2948_s2, %s1900_s10  ;;  %s428_s16 = scalar_lea.vmem %s2949_s3, %s1900_s10 }
 0x103   : > { %2238 = vmatprep.mubr.msk.bf16.mxu0 %vm2450_vm0, %v2449_v18  ;;  %v1539_v59 = vpop.permute.xlu1 %1538  ;;  %v1537_v60 = vpop.permute.xlu0 %1536 }
 0x104   : > { %2275 = vmatmul.mubr.msk.bf16.vlgmr.msra.gmra.mrb[4].mxu1 %vm516_vm3, %v2414_v52  ;;  %v1553_v4 = vsel %vm1552_vm9, %v1537_v60, %v1539_v59 }
 0x105   : > { %2233 = vmatpush3.bf16.msra.mxu0 %v1222_v56  ;;  %2279 = vmatpush3.bf16.msra.mxu1 %v1300_v55 }
 0x106   : > { %2234 = vmatprep.subr.bf16.mxu0 %v2449_v18  ;;  %2280 = vmatprep.subr.bf16.mxu1 %v2449_v18 }
 0x107   : > { %2286 = vmatprep.mubr.msk.bf16.mxu1 %vm2450_vm0, %v2449_v18  ;;  %v1543_v1 = vpop.permute.xlu1 %1542  ;;  %v1541_v2 = vpop.permute.xlu0 %1540 }
 0x108   : > { %v1554_v7 = vsel %vm1552_vm9, %v1541_v2, %v1543_v1 }
 0x109   : > { %2235 = vmatpush3.bf16.msra.mxu0 %v1223_v58  ;;  %2281 = vmatpush3.bf16.msra.mxu1 %v1301_v57 }
 0x10a   : > { %2236 = vmatprep.subr.bf16.mxu0 %v2449_v18  ;;  %2282 = vmatprep.subr.bf16.mxu1 %v2449_v18 }
 0x10d   : > { %2237 = vmatpush3.bf16.msra.mxu0 %v1224_v61  ;;  %2283 = vmatpush3.bf16.msra.mxu1 %v1302_v62  ;;  %v1547_v5 = vpop.permute.xlu1 %1546  ;;  %v1545_v6 = vpop.permute.xlu0 %1544 }
 0x10e   : > { %2242 = vmatprep.subr.bf16.mxu0 %v2449_v18  ;;  %2284 = vmatprep.subr.bf16.mxu1 %v2449_v18  ;;  %v1555_v8 = vsel %vm1552_vm9, %v1545_v6, %v1547_v5 }
 0x110   : > { %2239 = vmatmul.mubr.msk.bf16.vlgmr.msra.gmra.mrb[4].mxu0 %vm516_vm3, %v2415_v63 }
 0x111   : > { %2243 = vmatpush3.bf16.msra.mxu0 %v1300_v55  ;;  %2285 = vmatpush3.bf16.msra.mxu1 %v1303_v0  ;;  %v1551_v9 = vpop.permute.xlu1 %1550  ;;  %v1549_v10 = vpop.permute.xlu0 %1548 }
 0x112   : > { %2244 = vmatprep.subr.bf16.mxu0 %v2449_v18  ;;  %2290 = vmatprep.subr.bf16.mxu1 %v2449_v18  ;;  %v1556_v12 = vsel %vm1552_vm9, %v1549_v10, %v1551_v9 }
 0x113   : > { %2250 = vmatprep.mubr.msk.bf16.mxu0 %vm2450_vm0, %v2449_v18 }
 0x114   : > { %2287 = vmatmul.mubr.msk.bf16.vlgmr.msra.gmra.mrb[4].mxu1 %vm516_vm3, %v2416_v3 }
 0x115   : > { %2245 = vmatpush3.bf16.msra.mxu0 %v1301_v57  ;;  %2291 = vmatpush3.bf16.msra.mxu1 %v1553_v4 }
 0x116   : > { %2246 = vmatprep.subr.bf16.mxu0 %v2449_v18  ;;  %2292 = vmatprep.subr.bf16.mxu1 %v2449_v18 }
 0x117   : > { %2298 = vmatprep.mubr.msk.bf16.mxu1 %vm2450_vm0, %v2449_v18 }
 0x119   : > { %2247 = vmatpush3.bf16.msra.mxu0 %v1302_v62  ;;  %2293 = vmatpush3.bf16.msra.mxu1 %v1554_v7 }
 0x11a   : > { %2248 = vmatprep.subr.bf16.mxu0 %v2449_v18  ;;  %2294 = vmatprep.subr.bf16.mxu1 %v2449_v18 }
 0x11d   : > { %2249 = vmatpush3.bf16.msra.mxu0 %v1303_v0  ;;  %2295 = vmatpush3.bf16.msra.mxu1 %v1555_v8 }
 0x11e   : > { %2296 = vmatprep.subr.bf16.mxu1 %v2449_v18 }
 0x120   : > { %2251 = vmatmul.mubr.msk.bf16.vlgmr.msra.gmra.mrb[4].mxu0 %vm516_vm3, %v2417_v11 }
 0x121   : > { %2297 = vmatpush3.bf16.msra.mxu1 %v1556_v12 }
 0x124   : > { %2299 = vmatmul.mubr.msk.bf16.vlgmr.msra.gmra.mrb[4].mxu1 %vm516_vm3, %v2418_v13 }
 0x1b3   : > { %v2881_v15 = vpop.f32.mrb[0].mxu0 }
 0x1b4   : > { %v2156_v16 = vpop.f32.mrb[1].mxu0  ;;  %v798_v17 = vmul.f32 %v1929_v14, %v2881_v15 }
 0x1b5   : > { %v2884_v19 = vpop.f32.mrb[2].mxu0 }
 0x1b6   : > { %800 = vadd.xlane.f32.xlu0 %v798_v17  ;;  %v2157_v20 = vpop.f32.mrb[3].mxu0  ;;  %v799_v18 = vmul.f32 %v1929_v14, %v2884_v19  ;;  %v806_v26 = vmul.f32 %v798_v17, %v2881_v15 }
 0x1b7   : > { %v2887_v21 = vpop.f32.mrb[0].mxu1 }
 0x1b8   : > { %v2204_v22 = vpop.f32.mrb[1].mxu1  ;;  %802 = vadd.xlane.f32.xlu1 %v799_v18  ;;  %v1076_v23 = vmul.f32 %v1929_v14, %v2887_v21  ;;  %v807_v29 = vmul.f32 %v799_v18, %v2884_v19 }
 0x1b9   : > { %v2890_v24 = vpop.f32.mrb[2].mxu1 }
 0x1ba   : > { %v2205_v25 = vpop.f32.mrb[3].mxu1  ;;  %1078 = vadd.xlane.f32.xlu0 %v1076_v23  ;;  %v1077_v27 = vmul.f32 %v1929_v14, %v2890_v24  ;;  %v1084_v28 = vmul.f32 %v1076_v23, %v2887_v21 }
 0x1bc   : > { %808 = vadd.xlane.f32.xlu1 %v806_v26  ;;  %v1085_v30 = vmul.f32 %v1077_v27, %v2890_v24  ;;  %v1631_v26 = vld [vmem:[%s422_s11] sm:$0xff] }
 0x1be   : > { %1080 = vadd.xlane.f32.xlu0 %v1077_v27 }
 0x1c0   : > { %1086 = vadd.xlane.f32.xlu1 %v1084_v28  ;;  %v1632_v28 = vld [vmem:[%s422_s11 + $0x8] sm:$0xff] }
 0x1c2   : > { %810 = vadd.xlane.f32.xlu0 %v807_v29 }
 0x1c6   : > { %1088 = vadd.xlane.f32.xlu0 %v1085_v30 }
 0x1f3   : > { %v2897_v31 = vpop.f32.mrb[4].mxu0 }
 0x1f4   : > { %v2252_v32 = vpop.f32.mrb[5].mxu0  ;;  %v1354_v33 = vmul.f32 %v1929_v14, %v2897_v31 }
 0x1f5   : > { %v2900_v34 = vpop.f32.mrb[6].mxu0  ;;  %v1639_v32 = vld [vmem:[%s428_s16] sm:$0xff] }
 0x1f6   : > { %1356 = vadd.xlane.f32.xlu1 %v1354_v33  ;;  %v2253_v35 = vpop.f32.mrb[7].mxu0  ;;  %v1355_v36 = vmul.f32 %v1929_v14, %v2900_v34  ;;  %v1362_v43 = vmul.f32 %v1354_v33, %v2897_v31 }
 0x1f7   : > { %v2903_v37 = vpop.f32.mrb[4].mxu1 }
 0x1f8   : > { %v2300_v38 = vpop.f32.mrb[5].mxu1  ;;  %1358 = vadd.xlane.f32.xlu0 %v1355_v36  ;;  %v1607_v39 = vmul.f32 %v1929_v14, %v2903_v37  ;;  %v1363_v44 = vmul.f32 %v1355_v36, %v2900_v34 }
 0x1f9   : > { %v2906_v40 = vpop.f32.mrb[6].mxu1 }
 0x1fa   : > { %v2301_v41 = vpop.f32.mrb[7].mxu1  ;;  %1609 = vadd.xlane.f32.xlu1 %v1607_v39  ;;  %v1608_v42 = vmul.f32 %v1929_v14, %v2906_v40  ;;  %v1615_v45 = vmul.f32 %v1607_v39, %v2903_v37  ;;  %v1640_v39 = vld [vmem:[%s428_s16 + $0x8] sm:$0xff] }
 0x1fc   : > { %1611 = vadd.xlane.f32.xlu0 %v1608_v42  ;;  %v1616_v46 = vmul.f32 %v1608_v42, %v2906_v40 }
 0x1fe   : > { %1364 = vadd.xlane.f32.xlu1 %v1362_v43 }
 0x200   : > { %1366 = vadd.xlane.f32.xlu0 %v1363_v44 }
 0x202   : > { %1617 = vadd.xlane.f32.xlu1 %v1615_v45 }
 0x204   : > { %1619 = vadd.xlane.f32.xlu0 %v1616_v46 }
 0x243   : > { %v801_v48 = vpop.xlane.xlu0 %800 }
 0x245   : > { %v803_v50 = vpop.xlane.xlu1 %802 }
 0x247   : > { %v1079_v49 = vpop.xlane.xlu0 %1078 }
 0x248   : > { %v1082_v58 = vadd.f32 %v1079_v49, %v801_v48 }
 0x249   : > { %v809_v52 = vpop.xlane.xlu1 %808 }
 0x24b   : > { %v1081_v51 = vpop.xlane.xlu0 %1080 }
 0x24c   : > { %v1083_v60 = vadd.f32 %v1081_v51, %v803_v50 }
 0x24d   : > { %v1087_v54 = vpop.xlane.xlu1 %1086 }
 0x24e   : > { %v1090_v2 = vadd.f32 %v1087_v54, %v809_v52 }
 0x24f   : > { %v811_v53 = vpop.xlane.xlu0 %810 }
 0x253   : > { %v1089_v55 = vpop.xlane.xlu0 %1088 }
 0x254   : > { %v1091_v5 = vadd.f32 %v1089_v55, %v811_v53 }
 0x283   : > { %v1357_v56 = vpop.xlane.xlu1 %1356 }
 0x284   : > { %v1360_v61 = vadd.f32 %v1357_v56, %v1082_v58 }
 0x285   : > { %v1359_v57 = vpop.xlane.xlu0 %1358 }
 0x286   : > { %v1361_v63 = vadd.f32 %v1359_v57, %v1083_v60 }
 0x287   : > { %v1610_v59 = vpop.xlane.xlu1 %1609 }
 0x288   : > { %v1613_v0 = vadd.f32 %v1610_v59, %v1360_v61 }
 0x289   : > { %v1612_v62 = vpop.xlane.xlu0 %1611 }
 0x28a   : > { %v1614_v3 = vadd.f32 %v1612_v62, %v1361_v63  ;;  %v1623_v6 = vmul.f32 0.0078125, %v1613_v0 }
 0x28b   : > { %v1365_v1 = vpop.xlane.xlu1 %1364 }
 0x28c   : > { %v1368_v7 = vadd.f32 %v1365_v1, %v1090_v2  ;;  %v1624_v9 = vmul.f32 0.0078125, %v1614_v3  ;;  %v1627_v13 = vmul.f32 %v1623_v6, %v1623_v6 }
 0x28d   : > { %v1367_v4 = vpop.xlane.xlu0 %1366 }
 0x28e   : > { %v1369_v10 = vadd.f32 %v1367_v4, %v1091_v5  ;;  %v1628_v17 = vmul.f32 %v1624_v9, %v1624_v9 }
 0x28f   : > { %v1618_v8 = vpop.xlane.xlu1 %1617 }
 0x290   : > { %v1621_v11 = vadd.f32 %v1618_v8, %v1368_v7 }
 0x291   : > { %v1620_v12 = vpop.xlane.xlu0 %1619 }
 0x292   : > { %v1625_v14 = vmul.f32 0.0078125, %v1621_v11  ;;  %v1622_v16 = vadd.f32 %v1620_v12, %v1369_v10 }
 0x294   : > { %v1629_v20 = vsub.f32 %v1625_v14, %v1627_v13  ;;  %v1626_v18 = vmul.f32 0.0078125, %v1622_v16 }
 0x296   : > { %v1633_v22 = vadd.f32 1e-05, %v1629_v20  ;;  %v1630_v23 = vsub.f32 %v1626_v18, %v1628_v17 }
 0x298   : > { %2419 = vrsqrt.f32 %v1633_v22  ;;  %v1634_v25 = vadd.f32 1e-05, %v1630_v23 }
 0x29a   : > { %2421 = vrsqrt.f32 %v1634_v25 }
 0x2a2   : > { %v2420_v27 = vpop.eup %2419 }
 0x2a3   : > { %v1637_v29 = vmul.f32 %v2420_v27, %v1631_v26 }
 0x2a4   : > { %v2422_v30 = vpop.eup %2421 }
 0x2a5   : > { %1647 = vperm.xlu1 %2385, %v1637_v29   ;;  %v1638_v33 = vmul.f32 %v2422_v30, %v1632_v28  ;;  %v1641_v35 = vmul.f32 %v1637_v29, %v1623_v6 }
 0x2a7   : > { %1652 = vperm.xlu0 %2386, %v1638_v33   ;;  %v1643_v36 = vsub.f32 %v1639_v32, %v1641_v35  ;;  %v1642_v38 = vmul.f32 %v1638_v33, %v1624_v9 }
 0x2a9   : > { %1659 = vperm.xlu1 %2385, %v1643_v36   ;;  %v1644_v41 = vsub.f32 %v1640_v39, %v1642_v38 }
 0x2ad   : > { %1664 = vperm.xlu1 %2385, %v1644_v41  }
 0x324   : > { %v1648_v42 = vpop.permute.xlu1 %1647 }
 0x325   : > { %v1655_v43 = vmul.f32 %v1648_v42, %v2881_v15  ;;  %v1681_v44 = vmul.f32 %v1648_v42, %v2887_v21  ;;  %v1698_v45 = vmul.f32 %v1648_v42, %v2897_v31  ;;  %v1715_v46 = vmul.f32 %v1648_v42, %v2903_v37 }
 0x326   : > { %v1653_v47 = vpop.permute.xlu0 %1652 }
 0x327   : > { %v1656_v53 = vmul.f32 %v1653_v47, %v2884_v19  ;;  %v1682_v54 = vmul.f32 %v1653_v47, %v2890_v24  ;;  %v1699_v55 = vmul.f32 %v1653_v47, %v2900_v34  ;;  %v1716_v15 = vmul.f32 %v1653_v47, %v2906_v40 }
 0x328   : > { %v1660_v48 = vpop.permute.xlu1 %1659 }
 0x329   : > { %v1667_v49 = vadd.f32 %v1660_v48, %v1655_v43  ;;  %v1683_v50 = vadd.f32 %v1681_v44, %v1660_v48  ;;  %v1700_v51 = vadd.f32 %v1698_v45, %v1660_v48  ;;  %v1717_v52 = vadd.f32 %v1715_v46, %v1660_v48 }
 0x32b   : > { %v1669_v58 = vmax.f32 %v1667_v49, 0.0  ;;  %v1685_v59 = vmax.f32 %v1683_v50, 0.0  ;;  %v1702_v60 = vmax.f32 %v1700_v51, 0.0  ;;  %v1719_v61 = vmax.f32 %v1717_v52, 0.0 }
 0x32c   : > { %v1665_v56 = vpop.permute.xlu1 %1664 }
 0x32d   : > { %v1668_v21 = vadd.f32 %v1665_v56, %v1656_v53  ;;  %v1684_v31 = vadd.f32 %v1682_v54, %v1665_v56  ;;  %v1701_v37 = vadd.f32 %v1699_v55, %v1665_v56  ;;  %v1718_v57 = vadd.f32 %v1716_v15, %v1665_v56 }
 0x32e   : > { %1738 = sbr.rel (!%p2519_p5) target bundleno = 829 (0x33d), region = 85 }
 0x32f   : > { %v1670_v62 = vmax.f32 %v1668_v21, 0.0  ;;  %v1686_v63 = vmax.f32 %v1684_v31, 0.0  ;;  %v1703_v19 = vmax.f32 %v1701_v37, 0.0  ;;  %v1720_v0 = vmax.f32 %v1718_v57, 0.0 }
 0x331   : > { %v2010_v24 = vpack.c.bf16 %v1670_v62, %v1669_v58  ;;  %v2015_v1 = vpack.c.bf16 %v1686_v63, %v1685_v59  ;;  %v2020_v34 = vpack.c.bf16 %v1703_v19, %v1702_v60  ;;  %v2025_v2 = vpack.c.bf16 %v1720_v0, %v1719_v61 }
 0x333   : > { %2011 = vst [vmem:[%s416_s20] sm:$0xff] %v2010_v24   ;;  %2027 = vst [vmem:[%s416_s20 + $0x8] sm:$0xff] %v2015_v1  }
 0x334   : > { %2028 = vst [vmem:[%s416_s20 + $0x10] sm:$0xff] %v2020_v34   ;;  %2029 = vst [vmem:[%s416_s20 + $0x18] sm:$0xff] %v2025_v2  }
 0x33a   : > { %v1757_v40 = vld [vmem:[%s416_s20] sm:$0xff]   ;;  %v1761_v3 = vld [vmem:[%s416_s20 + $0x8] sm:$0xff]  }
 0x33b   : > { %v1765_v4 = vld [vmem:[%s416_s20 + $0x10] sm:$0xff]   ;;  %v1769_v5 = vld [vmem:[%s416_s20 + $0x18] sm:$0xff]   ;;  %1758 = vst [vmem:[%s1741_s27] sm:$0xff] %v1757_v40   ;;  %1762 = vst [vmem:[%s1741_s27 + $0x10] sm:$0xff] %v1761_v3  }
 0x33c   : > { %1766 = vst [vmem:[%s1741_s27 + $0x20] sm:$0xff] %v1765_v4   ;;  %1770 = vst [vmem:[%s1741_s27 + $0x30] sm:$0xff] %v1769_v5  }
 0x33d PF: > { %p12_p11 = scmp.ge.s32.totalorder %s2507_s22, 4   ;;  %s2953_s18 = smov %s2441_s19 }
 0x33e   : > { %s2954_s19 = smov %s2517_s25  ;;  %s2955_s20 = smov %s2507_s22 }
 0x33f   :  { %14 = sbr.rel (!%p12_p11) target bundleno = 2 (0x2), region = 181 }

// kernel: image_generator_forward.6
= control target key start
LH: loop header
LB: loop body
LE: loop exit
PB: predicated region body
PF: predicated region fallthrough
CT: control target
= control target key end

     0   :  { %s1561_s22 = smov 127   ;;  %s1562_s25 = smov 126   ;;  %v1563_v3 = vmov 0   ;;  %vm78_vm0 = vcmask 1039360   ;;  %vm405_vm1 = vcmask 1031168   ;;  %vm87_vm2 = vcmask 261120   ;;  %s1949_s0 = inlined_call_operand.vmem [shape: bf16[32,278], index: 0, kind: input, shape index: {}]   ;;  %s1950_s1 = inlined_call_operand.vmem [shape: bf16[4,4,16,32], index: 1, kind: input, shape index: {}]   ;;  %s1951_s4 = inlined_call_operand.vmem [shape: f32[1,256], index: 4, kind: input, shape index: {}]   ;;  %s1952_s2 = inlined_call_operand.vmem [shape: f32[16,1], index: 2, kind: input, shape index: {}]   ;;  %s1953_s3 = inlined_call_operand.vmem [shape: f32[16,1], index: 3, kind: input, shape index: {}]   ;;  %s1954_s5 = inlined_call_operand.vmem [shape: bf16[4,16,256], index: 5, kind: output, shape index: {}]  }
   0x1   :  { %v1603_v0 = vld [vmem:[%s1949_s0 + $0x4] ss:$12 sps:$4 sm:$0xff]   ;;  %v1608_v1 = vld [vmem:[%s1949_s0] ss:$12 sps:$4 sm:$0xff]   ;;  %v1536_v2 = vld [vmem:[%s1949_s0 + $0x8] ss:$12 sps:$4 sm:$0xff]   ;;  %123 = vmatprep.mubr.bf16.mxu0 %v1563_v3  ;;  %449 = vmatprep.mubr.bf16.mxu1 %v1563_v3 }
   0x2   :  { %68 = vrot.lane.b32.xlu0 %v1603_v0, %s1561_s22  ;;  %66 = vrot.lane.b32.xlu1 %v1608_v1, %s1561_s22  ;;  %v1620_v4 = vld [vmem:[%s1949_s0 + $0x1c] ss:$12 sps:$4 sm:$0xff]   ;;  %v1539_v5 = vld [vmem:[%s1949_s0 + $0x20] ss:$12 sps:$4 sm:$0xff]   ;;  %s1564_s7 = smov 118   ;;  %s1565_s8 = smov 117  }
   0x3   :  { %1531 = vset.pattern.permute.xlu1 %v1563_v3  ;;  %1532 = vset.pattern.permute.xlu0 %v1563_v3  ;;  %v1632_v6 = vld [vmem:[%s1949_s0 + $0x18] ss:$12 sps:$4 sm:$0xff]   ;;  %s1566_s0 = smov 116   ;;  %s1567_s9 = smov 108   ;;  %v1541_v23 = vld [vmem:[%s1950_s1 + $0x8] sm:$0xff]   ;;  %vm209_vm3 = vcmask 965632  }
   0x4   :  { %s1568_s10 = smov 107   ;;  %s1569_s11 = smov 106   ;;  %v1542_v28 = vld [vmem:[%s1950_s1 + $0x28] sm:$0xff]   ;;  %v1543_v34 = vld [vmem:[%s1950_s1] sm:$0xff]   ;;  %vm288_vm4 = vcmask 957440   ;;  %v1545_v47 = vld [vmem:[%s1950_s1 + $0x10] sm:$0xff]  }
   0x5   :  { %v1544_v39 = vld [vmem:[%s1950_s1 + $0x20] sm:$0xff]   ;;  %v1546_v52 = vld [vmem:[%s1950_s1 + $0x30] sm:$0xff]   ;;  %vm589_vm5 = vcmask 949248   ;;  %v1547_v59 = vld [vmem:[%s1950_s1 + $0x18] sm:$0xff]   ;;  %vm800_vm6 = vcmask 883712   ;;  %vm879_vm7 = vcmask 875520  }
   0x6   :  { %70 = vrot.lane.b32.xlu0 %v1536_v2, %s1561_s22  ;;  %395 = vrot.lane.b32.xlu1 %v1603_v0, %s1562_s25  ;;  %vm1148_vm8 = vcmask 867328  }
   0xa   :  { %397 = vrot.lane.b32.xlu0 %v1536_v2, %s1562_s25  ;;  %393 = vrot.lane.b32.xlu1 %v1608_v1, %s1562_s25 }
   0xe   :  { %74 = vrot.lane.b32.xlu0 %v1620_v4, %s1561_s22  ;;  %76 = vrot.lane.b32.xlu1 %v1539_v5, %s1561_s22 }
  0x12   :  { %72 = vrot.lane.b32.xlu0 %v1632_v6, %s1561_s22  ;;  %401 = vrot.lane.b32.xlu1 %v1620_v4, %s1562_s25 }
  0x16   :  { %403 = vrot.lane.b32.xlu0 %v1539_v5, %s1562_s25  ;;  %399 = vrot.lane.b32.xlu1 %v1632_v6, %s1562_s25 }
  0x1a   :  { %199 = vrot.lane.b32.xlu0 %v1603_v0, %s1564_s7  ;;  %201 = vrot.lane.b32.xlu1 %v1536_v2, %s1564_s7 }
  0x1e   :  { %197 = vrot.lane.b32.xlu0 %v1608_v1, %s1564_s7  ;;  %278 = vrot.lane.b32.xlu1 %v1603_v0, %s1565_s8 }
  0x22   :  { %280 = vrot.lane.b32.xlu0 %v1536_v2, %s1565_s8  ;;  %276 = vrot.lane.b32.xlu1 %v1608_v1, %s1565_s8 }
  0x26   :  { %205 = vrot.lane.b32.xlu0 %v1620_v4, %s1564_s7  ;;  %207 = vrot.lane.b32.xlu1 %v1539_v5, %s1564_s7 }
  0x2a   :  { %203 = vrot.lane.b32.xlu0 %v1632_v6, %s1564_s7  ;;  %284 = vrot.lane.b32.xlu1 %v1620_v4, %s1565_s8 }
  0x2e   :  { %286 = vrot.lane.b32.xlu0 %v1539_v5, %s1565_s8  ;;  %282 = vrot.lane.b32.xlu1 %v1632_v6, %s1565_s8 }
  0x32   :  { %579 = vrot.lane.b32.xlu0 %v1603_v0, %s1566_s0  ;;  %581 = vrot.lane.b32.xlu1 %v1536_v2, %s1566_s0 }
  0x36   :  { %577 = vrot.lane.b32.xlu0 %v1608_v1, %s1566_s0  ;;  %585 = vrot.lane.b32.xlu1 %v1620_v4, %s1566_s0 }
  0x3a   :  { %587 = vrot.lane.b32.xlu0 %v1539_v5, %s1566_s0  ;;  %583 = vrot.lane.b32.xlu1 %v1632_v6, %s1566_s0 }
  0x3e   :  { %790 = vrot.lane.b32.xlu0 %v1603_v0, %s1567_s9  ;;  %792 = vrot.lane.b32.xlu1 %v1536_v2, %s1567_s9 }
  0x42   :  { %788 = vrot.lane.b32.xlu0 %v1608_v1, %s1567_s9  ;;  %869 = vrot.lane.b32.xlu1 %v1603_v0, %s1568_s10 }
  0x46   :  { %871 = vrot.lane.b32.xlu0 %v1536_v2, %s1568_s10  ;;  %867 = vrot.lane.b32.xlu1 %v1608_v1, %s1568_s10 }
  0x4a   :  { %796 = vrot.lane.b32.xlu0 %v1620_v4, %s1567_s9  ;;  %798 = vrot.lane.b32.xlu1 %v1539_v5, %s1567_s9 }
  0x4e   :  { %794 = vrot.lane.b32.xlu0 %v1632_v6, %s1567_s9  ;;  %875 = vrot.lane.b32.xlu1 %v1620_v4, %s1568_s10 }
  0x52   :  { %877 = vrot.lane.b32.xlu0 %v1539_v5, %s1568_s10  ;;  %873 = vrot.lane.b32.xlu1 %v1632_v6, %s1568_s10 }
  0x56   :  { %1138 = vrot.lane.b32.xlu0 %v1603_v0, %s1569_s11  ;;  %1140 = vrot.lane.b32.xlu1 %v1536_v2, %s1569_s11  ;;  %v1549_v2 = vld [vmem:[%s1950_s1 + $0x48] sm:$0xff]  }
  0x5a   :  { %1136 = vrot.lane.b32.xlu0 %v1608_v1, %s1569_s11  ;;  %1144 = vrot.lane.b32.xlu1 %v1620_v4, %s1569_s11 }
  0x5e   :  { %1146 = vrot.lane.b32.xlu0 %v1539_v5, %s1569_s11  ;;  %1142 = vrot.lane.b32.xlu1 %v1632_v6, %s1569_s11 }
  0x74   :  { %v69_v7 = vpop.permute.xlu0 %68  ;;  %v67_v8 = vpop.permute.xlu1 %66 }
  0x75   :  { %v79_v12 = vsel %vm78_vm0, %v67_v8, %v69_v7 }
  0x78   :  { %v71_v9 = vpop.permute.xlu0 %70  ;;  %v396_v10 = vpop.permute.xlu1 %395 }
  0x79   :  { %v80_v11 = vsel %vm78_vm0, %v69_v7, %v71_v9  ;;  %v1550_v7 = vld [vmem:[%s1950_s1 + $0x68] sm:$0xff]  }
  0x7a   :  { %91 = vmatprep.subr.bf16.mxu0 %v80_v11 }
  0x7b   :  { %92 = vmatpush1.bf16.msra.mxu0 %v79_v12 }
  0x7c   :  { %v398_v13 = vpop.permute.xlu0 %397  ;;  %v394_v14 = vpop.permute.xlu1 %393 }
  0x7d   :  { %v407_v15 = vsel %vm405_vm1, %v396_v10, %v398_v13  ;;  %v406_v16 = vsel %vm405_vm1, %v394_v14, %v396_v10  ;;  %v1551_v13 = vld [vmem:[%s1950_s1 + $0x40] sm:$0xff]  }
  0x7e   :  { %417 = vmatprep.subr.bf16.mxu1 %v407_v15 }
  0x7f   :  { %418 = vmatpush1.bf16.msra.mxu1 %v406_v16 }
  0x80   :  { %v75_v17 = vpop.permute.xlu0 %74  ;;  %v77_v18 = vpop.permute.xlu1 %76 }
  0x81   :  { %v82_v19 = vsel %vm78_vm0, %v75_v17, %v77_v18 }
  0x82   :  { %93 = vmatprep.subr.bf16.mxu0 %v82_v19 }
  0x84   :  { %v73_v20 = vpop.permute.xlu0 %72  ;;  %v402_v21 = vpop.permute.xlu1 %401 }
  0x85   :  { %v81_v22 = vsel %vm78_vm0, %v73_v20, %v75_v17 }
  0x86   :  { %94 = vmatpush1.bf16.msra.mxu0 %v81_v22 }
  0x87   :  { %146 = vmatprep.subr.bf16.mxu0 %v1603_v0  ;;  %v1548_v0 = vld [vmem:[%s1950_s1 + $0x38] sm:$0xff]  }
  0x88   :  { %v404_v24 = vpop.permute.xlu0 %403  ;;  %v400_v25 = vpop.permute.xlu1 %399 }
  0x89   :  { %1393 = vmatmul.mubr.msk.bf16.vlgmr.msra.gmra.mrb[0].mxu0 %vm87_vm2, %v1541_v23  ;;  %v409_v26 = vsel %vm405_vm1, %v402_v21, %v404_v24  ;;  %v408_v27 = vsel %vm405_vm1, %v400_v25, %v402_v21 }
  0x8a   :  { %147 = vmatpush1.bf16.msra.mxu0 %v1608_v1  ;;  %419 = vmatprep.subr.bf16.mxu1 %v409_v26 }
  0x8b   :  { %420 = vmatpush1.bf16.msra.mxu1 %v408_v27  ;;  %148 = vmatprep.subr.bf16.mxu0 %v1620_v4  ;;  %v1553_v27 = vld [vmem:[%s1950_s1 + $0x50] sm:$0xff]  }
  0x8c   :  { %v200_v29 = vpop.permute.xlu0 %199  ;;  %468 = vmatprep.subr.bf16.mxu1 %v80_v11  ;;  %178 = vmatprep.mubr.bf16.mxu0 %v1563_v3  ;;  %v202_v30 = vpop.permute.xlu1 %201 }
  0x8d   :  { %v1684_v31 = vsel %vm209_vm3, %v200_v29, %v202_v30 }
  0x8e   :  { %149 = vmatpush1.bf16.msra.mxu0 %v1632_v6  ;;  %1409 = vmatmul.mubr.msk.bf16.vlgmr.msra.gmra.mrb[0].mxu1 %vm87_vm2, %v1542_v28 }
  0x8f   :  { %221 = vmatprep.subr.bf16.mxu0 %v1684_v31  ;;  %469 = vmatpush1.bf16.msra.mxu1 %v79_v12 }
  0x90   :  { %v198_v32 = vpop.permute.xlu0 %197  ;;  %470 = vmatprep.subr.bf16.mxu1 %v82_v19  ;;  %500 = vmatprep.mubr.bf16.mxu1 %v1563_v3  ;;  %v279_v33 = vpop.permute.xlu1 %278  ;;  %v1552_v19 = vld [vmem:[%s1950_s1 + $0x60] sm:$0xff]  }
  0x91   :  { %v1692_v36 = vsel %vm209_vm3, %v198_v32, %v200_v29  ;;  %v1554_v32 = vld [vmem:[%s1950_s1 + $0x70] sm:$0xff]  }
  0x93   :  { %471 = vmatpush1.bf16.msra.mxu1 %v81_v22 }
  0x94   :  { %v281_v35 = vpop.permute.xlu0 %280  ;;  %v277_v38 = vpop.permute.xlu1 %276 }
  0x95   :  { %v1695_v37 = vsel %vm288_vm4, %v279_v33, %v281_v35  ;;  %1395 = vmatmul.mubr.msk.bf16.vlgmr.msra.gmra.mrb[0].mxu0 %vm87_vm2, %v1543_v34  ;;  %v1705_v42 = vsel %vm288_vm4, %v277_v38, %v279_v33  ;;  %v1555_v38 = vld [vmem:[%s1950_s1 + $0x58] sm:$0xff]  }
  0x96   :  { %222 = vmatpush1.bf16.msra.mxu0 %v1692_v36  ;;  %522 = vmatprep.subr.bf16.mxu1 %v1695_v37 }
  0x97   :  { %253 = vmatprep.mubr.bf16.mxu0 %v1563_v3 }
  0x98   :  { %v206_v40 = vpop.permute.xlu0 %205  ;;  %v208_v41 = vpop.permute.xlu1 %207 }
  0x99   :  { %v1708_v43 = vsel %vm209_vm3, %v206_v40, %v208_v41 }
  0x9a   :  { %1411 = vmatmul.mubr.msk.bf16.vlgmr.msra.gmra.mrb[0].mxu1 %vm87_vm2, %v1544_v39  ;;  %223 = vmatprep.subr.bf16.mxu0 %v1708_v43  ;;  %v1556_v39 = vld [vmem:[%s1950_s1 + $0x78] sm:$0xff]  }
  0x9b   :  { %523 = vmatpush1.bf16.msra.mxu1 %v1705_v42  ;;  %554 = vmatprep.mubr.bf16.mxu1 %v1563_v3 }
  0x9c   :  { %v204_v44 = vpop.permute.xlu0 %203  ;;  %v285_v46 = vpop.permute.xlu1 %284 }
  0x9d   :  { %v1715_v45 = vsel %vm209_vm3, %v204_v44, %v206_v40  ;;  %v348_v40 = vlaneseq }
  0x9e   :  { %224 = vmatpush1.bf16.msra.mxu0 %v1715_v45 }
  0x9f   :  { %300 = vmatprep.subr.bf16.mxu0 %v1695_v37  ;;  %v349_v41 = vshrl.u32 %v348_v40, 7 }
  0xa0   :  { %v287_v48 = vpop.permute.xlu0 %286  ;;  %v283_v50 = vpop.permute.xlu1 %282 }
  0xa1   :  { %v292_v49 = vsel %vm288_vm4, %v285_v46, %v287_v48  ;;  %1399 = vmatmul.mubr.msk.bf16.vlgmr.msra.gmra.mrb[0].mxu0 %vm87_vm2, %v1545_v47  ;;  %v1725_v51 = vsel %vm288_vm4, %v283_v50, %v285_v46 }
  0xa2   :  { %301 = vmatpush1.bf16.msra.mxu0 %v1705_v42  ;;  %524 = vmatprep.subr.bf16.mxu1 %v292_v49 }
  0xa3   :  { %302 = vmatprep.subr.bf16.mxu0 %v292_v49  ;;  %525 = vmatpush1.bf16.msra.mxu1 %v1725_v51 }
  0xa4   :  { %v580_v53 = vpop.permute.xlu0 %579  ;;  %332 = vmatprep.mubr.bf16.mxu0 %v1563_v3  ;;  %v582_v54 = vpop.permute.xlu1 %581 }
  0xa5   :  { %v591_v55 = vsel %vm589_vm5, %v580_v53, %v582_v54 }
  0xa6   :  { %303 = vmatpush1.bf16.msra.mxu0 %v1725_v51  ;;  %1415 = vmatmul.mubr.msk.bf16.vlgmr.msra.gmra.mrb[0].mxu1 %vm87_vm2, %v1546_v52 }
  0xa7   :  { %601 = vmatprep.subr.bf16.mxu1 %v591_v55  ;;  %686 = vmatprep.subr.bf16.mxu0 %v1695_v37 }
  0xa8   :  { %v578_v56 = vpop.permute.xlu0 %577  ;;  %633 = vmatprep.mubr.bf16.mxu1 %v1563_v3  ;;  %v586_v58 = vpop.permute.xlu1 %585 }
  0xa9   :  { %v590_v57 = vsel %vm589_vm5, %v578_v56, %v580_v53 }
  0xaa   :  { %602 = vmatpush1.bf16.msra.mxu1 %v590_v57 }
  0xac   :  { %v588_v60 = vpop.permute.xlu0 %587  ;;  %v584_v61 = vpop.permute.xlu1 %583 }
  0xad   :  { %1403 = vmatmul.mubr.msk.bf16.vlgmr.msra.gmra.mrb[0].mxu0 %vm87_vm2, %v1547_v59  ;;  %v593_v62 = vsel %vm589_vm5, %v586_v58, %v588_v60  ;;  %v592_v63 = vsel %vm589_vm5, %v584_v61, %v586_v58 }
  0xae   :  { %687 = vmatpush1.bf16.msra.mxu0 %v1705_v42  ;;  %603 = vmatprep.subr.bf16.mxu1 %v593_v62 }
  0xaf   :  { %688 = vmatprep.subr.bf16.mxu0 %v292_v49  ;;  %604 = vmatpush1.bf16.msra.mxu1 %v592_v63 }
  0xb0   :  { %976 = vmatprep.subr.bf16.mxu1 %v591_v55  ;;  %v791_v1 = vpop.permute.xlu0 %790  ;;  %718 = vmatprep.mubr.bf16.mxu0 %v1563_v3  ;;  %v793_v4 = vpop.permute.xlu1 %792 }
  0xb1   :  { %v802_v8 = vsel %vm800_vm6, %v791_v1, %v793_v4 }
  0xb2   :  { %689 = vmatpush1.bf16.msra.mxu0 %v1725_v51  ;;  %1419 = vmatmul.mubr.msk.bf16.vlgmr.msra.gmra.mrb[0].mxu1 %vm87_vm2, %v1548_v0 }
  0xb3   :  { %737 = vmatprep.subr.bf16.mxu0 %v1684_v31  ;;  %977 = vmatpush1.bf16.msra.mxu1 %v590_v57 }
  0xb4   :  { %978 = vmatprep.subr.bf16.mxu1 %v593_v62  ;;  %v789_v5 = vpop.permute.xlu0 %788  ;;  %1008 = vmatprep.mubr.bf16.mxu1 %v1563_v3  ;;  %v870_v6 = vpop.permute.xlu1 %869 }
  0xb5   :  { %1425 = vmatmul.mubr.msk.bf16.vlgmr.msra.gmra.mrb[4].mxu0 %vm87_vm2, %v1549_v2  ;;  %v801_v17 = vsel %vm800_vm6, %v789_v5, %v791_v1 }
  0xb6   :  { %738 = vmatpush1.bf16.msra.mxu0 %v1692_v36  ;;  %769 = vmatprep.mubr.bf16.mxu0 %v1563_v3 }
  0xb7   :  { %739 = vmatprep.subr.bf16.mxu0 %v1708_v43  ;;  %979 = vmatpush1.bf16.msra.mxu1 %v592_v63  ;;  %v354_v43 = vsub.s32 1, %v349_v41 }
  0xb8   :  { %1027 = vmatprep.subr.bf16.mxu1 %v1695_v37  ;;  %v872_v9 = vpop.permute.xlu0 %871  ;;  %v868_v10 = vpop.permute.xlu1 %867 }
  0xb9   :  { %v881_v12 = vsel %vm879_vm7, %v870_v6, %v872_v9  ;;  %v880_v24 = vsel %vm879_vm7, %v868_v10, %v870_v6 }
  0xba   :  { %740 = vmatpush1.bf16.msra.mxu0 %v1715_v45  ;;  %1441 = vmatmul.mubr.msk.bf16.vlgmr.msra.gmra.mrb[4].mxu1 %vm87_vm2, %v1550_v7 }
  0xbb   :  { %812 = vmatprep.subr.bf16.mxu0 %v802_v8  ;;  %1028 = vmatpush1.bf16.msra.mxu1 %v1705_v42  ;;  %v350_v42 = vsub.s32 0, %v349_v41 }
  0xbc   :  { %1029 = vmatprep.subr.bf16.mxu1 %v292_v49  ;;  %v797_v11 = vpop.permute.xlu0 %796  ;;  %1059 = vmatprep.mubr.bf16.mxu1 %v1563_v3  ;;  %v799_v14 = vpop.permute.xlu1 %798 }
  0xbd   :  { %v804_v16 = vsel %vm800_vm6, %v797_v11, %v799_v14 }
  0xbf   :  { %1030 = vmatpush1.bf16.msra.mxu1 %v1725_v51 }
  0xc0   :  { %1081 = vmatprep.subr.bf16.mxu1 %v881_v12  ;;  %v795_v15 = vpop.permute.xlu0 %794  ;;  %v876_v18 = vpop.permute.xlu1 %875 }
  0xc1   :  { %1427 = vmatmul.mubr.msk.bf16.vlgmr.msra.gmra.mrb[4].mxu0 %vm87_vm2, %v1551_v13  ;;  %v803_v20 = vsel %vm800_vm6, %v795_v15, %v797_v11 }
  0xc2   :  { %813 = vmatpush1.bf16.msra.mxu0 %v801_v17  ;;  %844 = vmatprep.mubr.bf16.mxu0 %v1563_v3 }
  0xc3   :  { %814 = vmatprep.subr.bf16.mxu0 %v804_v16 }
  0xc4   :  { %v878_v21 = vpop.permute.xlu0 %877  ;;  %v874_v22 = vpop.permute.xlu1 %873 }
  0xc5   :  { %v883_v23 = vsel %vm879_vm7, %v876_v18, %v878_v21  ;;  %v882_v25 = vsel %vm879_vm7, %v874_v22, %v876_v18 }
  0xc6   :  { %815 = vmatpush1.bf16.msra.mxu0 %v803_v20  ;;  %1443 = vmatmul.mubr.msk.bf16.vlgmr.msra.gmra.mrb[4].mxu1 %vm87_vm2, %v1552_v19 }
  0xc7   :  { %891 = vmatprep.subr.bf16.mxu0 %v881_v12  ;;  %1082 = vmatpush1.bf16.msra.mxu1 %v880_v24 }
  0xc8   :  { %1083 = vmatprep.subr.bf16.mxu1 %v883_v23  ;;  %v1139_v26 = vpop.permute.xlu0 %1138  ;;  %1113 = vmatprep.mubr.bf16.mxu1 %v1563_v3  ;;  %v1141_v28 = vpop.permute.xlu1 %1140 }
  0xc9   :  { %v1150_v29 = vsel %vm1148_vm8, %v1139_v26, %v1141_v28 }
  0xcb   :  { %1084 = vmatpush1.bf16.msra.mxu1 %v882_v25 }
  0xcc   :  { %v1137_v30 = vpop.permute.xlu0 %1136  ;;  %1160 = vmatprep.subr.bf16.mxu1 %v1150_v29  ;;  %v1145_v31 = vpop.permute.xlu1 %1144 }
  0xcd   :  { %1431 = vmatmul.mubr.msk.bf16.vlgmr.msra.gmra.mrb[4].mxu0 %vm87_vm2, %v1553_v27  ;;  %v1149_v33 = vsel %vm1148_vm8, %v1137_v30, %v1139_v26 }
  0xce   :  { %892 = vmatpush1.bf16.msra.mxu0 %v880_v24  ;;  %923 = vmatprep.mubr.bf16.mxu0 %v1563_v3 }
  0xcf   :  { %893 = vmatprep.subr.bf16.mxu0 %v883_v23 }
  0xd0   :  { %v1147_v34 = vpop.permute.xlu0 %1146  ;;  %v1143_v35 = vpop.permute.xlu1 %1142 }
  0xd1   :  { %v1152_v36 = vsel %vm1148_vm8, %v1145_v31, %v1147_v34  ;;  %v1151_v37 = vsel %vm1148_vm8, %v1143_v35, %v1145_v31 }
  0xd2   :  { %894 = vmatpush1.bf16.msra.mxu0 %v882_v25  ;;  %1447 = vmatmul.mubr.msk.bf16.vlgmr.msra.gmra.mrb[4].mxu1 %vm87_vm2, %v1554_v32 }
  0xd3   :  { %1161 = vmatpush1.bf16.msra.mxu1 %v1149_v33  ;;  %1192 = vmatprep.mubr.bf16.mxu1 %v1563_v3  ;;  %v21_v3 = vld [vmem:[%s1951_s4] sm:$0x3] }
  0xd4   :  { %1162 = vmatprep.subr.bf16.mxu1 %v1152_v36  ;;  %v1813_v44 = vrot.slane %v21_v3, %v350_v42  ;;  %v1815_v45 = vrot.slane %v21_v3, %v354_v43 }
  0xd7   :  { %1163 = vmatpush1.bf16.msra.mxu1 %v1151_v37 }
  0xd9   :  { %1435 = vmatmul.mubr.msk.bf16.vlgmr.msra.gmra.mrb[4].mxu0 %vm87_vm2, %v1555_v38 }
  0xde   :  { %1451 = vmatmul.mubr.msk.bf16.vlgmr.msra.gmra.mrb[4].mxu1 %vm87_vm2, %v1556_v39 }
 0x180   :  { %v1817_v46 = vpop.f32.mrb[0].mxu0 }
 0x181   :  { %v1819_v47 = vpop.f32.mrb[1].mxu0  ;;  %v358_v48 = vmul.f32 %v1813_v44, %v1817_v46 }
 0x182   :  { %v1823_v49 = vpop.f32.mrb[2].mxu0  ;;  %v359_v50 = vmul.f32 %v1815_v45, %v1819_v47 }
 0x183   :  { %v1827_v51 = vpop.f32.mrb[3].mxu0  ;;  %v360_v52 = vmul.f32 %v1813_v44, %v1823_v49  ;;  %v370_v53 = vmul.f32 %v358_v48, %v1817_v46 }
 0x184   :  { %v362_v54 = vadd.f32 %v359_v50, %v358_v48  ;;  %v361_v55 = vmul.f32 %v1815_v45, %v1827_v51  ;;  %v371_v56 = vmul.f32 %v359_v50, %v1819_v47 }
 0x185   :  { %v1835_v57 = vpop.f32.mrb[0].mxu1  ;;  %v372_v58 = vmul.f32 %v360_v52, %v1823_v49 }
 0x186   :  { %363 = vadd.xlane.f32.xlu0 %v362_v54  ;;  %v1838_v59 = vpop.f32.mrb[1].mxu1  ;;  %v365_v60 = vadd.f32 %v361_v55, %v360_v52  ;;  %v648_v61 = vmul.f32 %v1835_v57, %v1813_v44  ;;  %v374_v62 = vadd.f32 %v371_v56, %v370_v53  ;;  %v373_v63 = vmul.f32 %v361_v55, %v1827_v51 }
 0x187   :  { %v1843_v0 = vpop.f32.mrb[2].mxu1  ;;  %v649_v1 = vmul.f32 %v1838_v59, %v1815_v45 }
 0x188   :  { %366 = vadd.xlane.f32.xlu1 %v365_v60  ;;  %v1847_v2 = vpop.f32.mrb[3].mxu1  ;;  %v650_v4 = vmul.f32 %v1843_v0, %v1813_v44  ;;  %v660_v5 = vmul.f32 %v648_v61, %v1835_v57  ;;  %v377_v6 = vadd.f32 %v373_v63, %v372_v58 }
 0x189   :  { %v652_v7 = vadd.f32 %v649_v1, %v648_v61  ;;  %v651_v8 = vmul.f32 %v1847_v2, %v1815_v45  ;;  %v661_v9 = vmul.f32 %v649_v1, %v1838_v59 }
 0x18a   :  { %v662_v10 = vmul.f32 %v650_v4, %v1843_v0 }
 0x18b   :  { %653 = vadd.xlane.f32.xlu0 %v652_v7  ;;  %v655_v11 = vadd.f32 %v651_v8, %v650_v4  ;;  %v664_v12 = vadd.f32 %v661_v9, %v660_v5  ;;  %v663_v13 = vmul.f32 %v651_v8, %v1847_v2 }
 0x18c   :  { %375 = vadd.xlane.f32.xlu1 %v374_v62 }
 0x18d   :  { %v667_v14 = vadd.f32 %v663_v13, %v662_v10 }
 0x18f   :  { %656 = vadd.xlane.f32.xlu0 %v655_v11 }
 0x190   :  { %665 = vadd.xlane.f32.xlu1 %v664_v12 }
 0x193   :  { %378 = vadd.xlane.f32.xlu0 %v377_v6 }
 0x197   :  { %668 = vadd.xlane.f32.xlu0 %v667_v14 }
 0x1ac   :  { %v1857_v15 = vpop.f32.mrb[4].mxu0 }
 0x1ad   :  { %v1859_v16 = vpop.f32.mrb[5].mxu0  ;;  %v938_v17 = vmul.f32 %v1857_v15, %v1813_v44 }
 0x1ae   :  { %v1863_v18 = vpop.f32.mrb[6].mxu0  ;;  %v939_v19 = vmul.f32 %v1859_v16, %v1815_v45 }
 0x1af   :  { %v1867_v20 = vpop.f32.mrb[7].mxu0  ;;  %v940_v21 = vmul.f32 %v1863_v18, %v1813_v44  ;;  %v950_v22 = vmul.f32 %v938_v17, %v1857_v15 }
 0x1b0   :  { %v941_v23 = vmul.f32 %v1867_v20, %v1815_v45  ;;  %v942_v24 = vadd.f32 %v939_v19, %v938_v17  ;;  %v951_v25 = vmul.f32 %v939_v19, %v1859_v16 }
 0x1b1   :  { %v1875_v26 = vpop.f32.mrb[4].mxu1  ;;  %v952_v27 = vmul.f32 %v940_v21, %v1863_v18 }
 0x1b2   :  { %v953_v28 = vmul.f32 %v941_v23, %v1867_v20  ;;  %943 = vadd.xlane.f32.xlu1 %v942_v24  ;;  %v1879_v29 = vpop.f32.mrb[5].mxu1  ;;  %v945_v30 = vadd.f32 %v941_v23, %v940_v21  ;;  %v1207_v31 = vmul.f32 %v1875_v26, %v1813_v44  ;;  %v954_v32 = vadd.f32 %v951_v25, %v950_v22 }
 0x1b3   :  { %v1883_v33 = vpop.f32.mrb[6].mxu1  ;;  %v1208_v34 = vmul.f32 %v1879_v29, %v1815_v45 }
 0x1b4   :  { %946 = vadd.xlane.f32.xlu0 %v945_v30  ;;  %v1887_v35 = vpop.f32.mrb[7].mxu1  ;;  %v1209_v36 = vmul.f32 %v1883_v33, %v1813_v44  ;;  %v957_v37 = vadd.f32 %v953_v28, %v952_v27  ;;  %v1219_v38 = vmul.f32 %v1207_v31, %v1875_v26 }
 0x1b5   :  { %v1210_v39 = vmul.f32 %v1887_v35, %v1815_v45  ;;  %v1211_v40 = vadd.f32 %v1208_v34, %v1207_v31  ;;  %v1220_v41 = vmul.f32 %v1208_v34, %v1879_v29 }
 0x1b6   :  { %v1221_v42 = vmul.f32 %v1209_v36, %v1883_v33 }
 0x1b7   :  { %v1222_v3 = vmul.f32 %v1210_v39, %v1887_v35  ;;  %1212 = vadd.xlane.f32.xlu1 %v1211_v40  ;;  %v1214_v43 = vadd.f32 %v1210_v39, %v1209_v36  ;;  %v1223_v48 = vadd.f32 %v1220_v41, %v1219_v38  ;;  %v1240_v39 = vld [vmem:[%s1952_s2 + $0x8] sm:$0xff] }
 0x1b9   :  { %1215 = vadd.xlane.f32.xlu0 %v1214_v43  ;;  %v1226_v50 = vadd.f32 %v1222_v3, %v1221_v42  ;;  %v1247_v42 = vld [vmem:[%s1953_s3] sm:$0xff] }
 0x1bb   :  { %955 = vadd.xlane.f32.xlu1 %v954_v32 }
 0x1bd   :  { %958 = vadd.xlane.f32.xlu0 %v957_v37  ;;  %v1239_v37 = vld [vmem:[%s1952_s2] sm:$0xff] }
 0x1bf   :  { %1224 = vadd.xlane.f32.xlu1 %v1223_v48 }
 0x1c1   :  { %1227 = vadd.xlane.f32.xlu0 %v1226_v50 }
 0x213   :  { %v364_v44 = vpop.xlane.xlu0 %363 }
 0x215   :  { %v367_v53 = vpop.xlane.xlu1 %366 }
 0x218   :  { %v654_v52 = vpop.xlane.xlu0 %653 }
 0x219   :  { %v376_v54 = vpop.xlane.xlu1 %375  ;;  %v658_v62 = vadd.f32 %v654_v52, %v364_v44  ;;  %v1248_v44 = vld [vmem:[%s1953_s3 + $0x8] sm:$0xff] }
 0x21c   :  { %v657_v45 = vpop.xlane.xlu0 %656 }
 0x21d   :  { %v666_v56 = vpop.xlane.xlu1 %665  ;;  %v659_v1 = vadd.f32 %v657_v45, %v367_v53 }
 0x21e   :  { %v670_v9 = vadd.f32 %v666_v56, %v376_v54 }
 0x220   :  { %v379_v55 = vpop.xlane.xlu0 %378 }
 0x224   :  { %v669_v58 = vpop.xlane.xlu0 %668 }
 0x225   :  { %v671_v12 = vadd.f32 %v669_v58, %v379_v55 }
 0x23f   :  { %v944_v60 = vpop.xlane.xlu1 %943 }
 0x240   :  { %v948_v4 = vadd.f32 %v944_v60, %v658_v62 }
 0x241   :  { %v947_v61 = vpop.xlane.xlu0 %946 }
 0x242   :  { %v949_v6 = vadd.f32 %v947_v61, %v659_v1 }
 0x244   :  { %v1213_v63 = vpop.xlane.xlu1 %1212 }
 0x245   :  { %v1217_v7 = vadd.f32 %v1213_v63, %v948_v4 }
 0x246   :  { %v1216_v5 = vpop.xlane.xlu0 %1215 }
 0x247   :  { %v1218_v10 = vadd.f32 %v1216_v5, %v949_v6  ;;  %v1231_v13 = vmul.f32 0.001953125, %v1217_v7 }
 0x248   :  { %v956_v8 = vpop.xlane.xlu1 %955 }
 0x249   :  { %v960_v14 = vadd.f32 %v956_v8, %v670_v9  ;;  %v1232_v19 = vmul.f32 0.001953125, %v1218_v10  ;;  %v1235_v24 = vmul.f32 %v1231_v13, %v1231_v13 }
 0x24a   :  { %v959_v11 = vpop.xlane.xlu0 %958 }
 0x24b   :  { %v961_v21 = vadd.f32 %v959_v11, %v671_v12  ;;  %v1236_v28 = vmul.f32 %v1232_v19, %v1232_v19 }
 0x24c   :  { %v1225_v17 = vpop.xlane.xlu1 %1224 }
 0x24d   :  { %v1229_v22 = vadd.f32 %v1225_v17, %v960_v14 }
 0x24e   :  { %v1228_v23 = vpop.xlane.xlu0 %1227 }
 0x24f   :  { %v1233_v25 = vmul.f32 0.001953125, %v1229_v22  ;;  %v1230_v27 = vadd.f32 %v1228_v23, %v961_v21 }
 0x251   :  { %v1237_v30 = vsub.f32 %v1233_v25, %v1235_v24  ;;  %v1234_v31 = vmul.f32 0.001953125, %v1230_v27 }
 0x253   :  { %v1241_v32 = vadd.f32 1e-05, %v1237_v30  ;;  %v1238_v34 = vsub.f32 %v1234_v31, %v1236_v28 }
 0x255   :  { %1557 = vrsqrt.f32 %v1241_v32  ;;  %v1242_v36 = vadd.f32 1e-05, %v1238_v34 }
 0x257   :  { %1559 = vrsqrt.f32 %v1242_v36 }
 0x25f   :  { %v1558_v38 = vpop.eup %1557 }
 0x260   :  { %v1245_v40 = vmul.f32 %v1558_v38, %v1239_v37 }
 0x261   :  { %v1560_v41 = vpop.eup %1559 }
 0x262   :  { %1255 = vperm.xlu1 %1531, %v1245_v40   ;;  %v1246_v3 = vmul.f32 %v1560_v41, %v1240_v39  ;;  %v1249_v43 = vmul.f32 %v1245_v40, %v1231_v13 }
 0x264   :  { %1260 = vperm.xlu0 %1532, %v1246_v3   ;;  %v1251_v48 = vsub.f32 %v1247_v42, %v1249_v43  ;;  %v1250_v50 = vmul.f32 %v1246_v3, %v1232_v19 }
 0x266   :  { %1269 = vperm.xlu1 %1531, %v1251_v48   ;;  %v1252_v52 = vsub.f32 %v1248_v44, %v1250_v50 }
 0x26a   :  { %1274 = vperm.xlu1 %1531, %v1252_v52  }
 0x2e1   :  { %v1256_v53 = vpop.permute.xlu1 %1255 }
 0x2e2   :  { %v1263_v45 = vmul.f32 %v1256_v53, %v1817_v46  ;;  %v1264_v54 = vmul.f32 %v1256_v53, %v1819_v47  ;;  %v1299_v55 = vmul.f32 %v1256_v53, %v1835_v57  ;;  %v1300_v56 = vmul.f32 %v1256_v53, %v1838_v59 }
 0x2e3   :  { %v1326_v58 = vmul.f32 %v1256_v53, %v1857_v15  ;;  %v1327_v60 = vmul.f32 %v1256_v53, %v1859_v16  ;;  %v1353_v61 = vmul.f32 %v1256_v53, %v1875_v26  ;;  %v1354_v62 = vmul.f32 %v1256_v53, %v1879_v29  ;;  %v1261_v63 = vpop.permute.xlu0 %1260 }
 0x2e4   :  { %v1265_v1 = vmul.f32 %v1261_v63, %v1823_v49  ;;  %v1266_v4 = vmul.f32 %v1261_v63, %v1827_v51  ;;  %v1301_v46 = vmul.f32 %v1261_v63, %v1843_v0  ;;  %v1302_v47 = vmul.f32 %v1261_v63, %v1847_v2 }
 0x2e5   :  { %v1328_v57 = vmul.f32 %v1261_v63, %v1863_v18  ;;  %v1329_v59 = vmul.f32 %v1261_v63, %v1867_v20  ;;  %v1355_v15 = vmul.f32 %v1261_v63, %v1883_v33  ;;  %v1356_v16 = vmul.f32 %v1261_v63, %v1887_v35  ;;  %v1270_v26 = vpop.permute.xlu1 %1269 }
 0x2e6   :  { %v1277_v5 = vadd.f32 %v1270_v26, %v1263_v45  ;;  %v1278_v29 = vadd.f32 %v1270_v26, %v1264_v54  ;;  %v1303_v6 = vadd.f32 %v1299_v55, %v1270_v26  ;;  %v1304_v7 = vadd.f32 %v1300_v56, %v1270_v26 }
 0x2e7   :  { %v1330_v49 = vadd.f32 %v1326_v58, %v1270_v26  ;;  %v1331_v8 = vadd.f32 %v1327_v60, %v1270_v26  ;;  %v1357_v51 = vadd.f32 %v1353_v61, %v1270_v26  ;;  %v1358_v9 = vadd.f32 %v1354_v62, %v1270_v26 }
 0x2e8   :  { %v1281_v0 = vmax.f32 %v1277_v5, 0.0  ;;  %v1282_v10 = vmax.f32 %v1278_v29, 0.0  ;;  %v1307_v2 = vmax.f32 %v1303_v6, 0.0  ;;  %v1308_v11 = vmax.f32 %v1304_v7, 0.0 }
 0x2e9   :  { %v1334_v18 = vmax.f32 %v1330_v49, 0.0  ;;  %v1335_v12 = vmax.f32 %v1331_v8, 0.0  ;;  %v1361_v20 = vmax.f32 %v1357_v51, 0.0  ;;  %v1362_v13 = vmax.f32 %v1358_v9, 0.0  ;;  %v1275_v33 = vpop.permute.xlu1 %1274 }
 0x2ea   :  { %v1466_v14 = vpack.c.bf16 %v1282_v10, %v1281_v0  ;;  %v1468_v35 = vpack.c.bf16 %v1308_v11, %v1307_v2  ;;  %v1279_v17 = vadd.f32 %v1275_v33, %v1265_v1  ;;  %v1280_v19 = vadd.f32 %v1275_v33, %v1266_v4 }
 0x2eb   :  { %v1470_v21 = vpack.c.bf16 %v1335_v12, %v1334_v18  ;;  %v1472_v22 = vpack.c.bf16 %v1362_v13, %v1361_v20  ;;  %v1305_v23 = vadd.f32 %v1301_v46, %v1275_v33  ;;  %v1306_v24 = vadd.f32 %v1302_v47, %v1275_v33 }
 0x2ec   :  { %1297 = vst [vmem:[%s1954_s5] sm:$0xff] %v1466_v14  ;;  %1456 = vst [vmem:[%s1954_s5 + $0x10] sm:$0xff] %v1468_v35  ;;  %v1283_v25 = vmax.f32 %v1279_v17, 0.0  ;;  %v1284_v27 = vmax.f32 %v1280_v19, 0.0  ;;  %v1332_v28 = vadd.f32 %v1328_v57, %v1275_v33  ;;  %v1333_v30 = vadd.f32 %v1329_v59, %v1275_v33 }
 0x2ed   :  { %1460 = vst [vmem:[%s1954_s5 + $0x20] sm:$0xff] %v1470_v21  ;;  %1464 = vst [vmem:[%s1954_s5 + $0x30] sm:$0xff] %v1472_v22  ;;  %v1309_v31 = vmax.f32 %v1305_v23, 0.0  ;;  %v1310_v32 = vmax.f32 %v1306_v24, 0.0  ;;  %v1359_v34 = vadd.f32 %v1355_v15, %v1275_v33  ;;  %v1360_v36 = vadd.f32 %v1356_v16, %v1275_v33 }
 0x2ee   :  { %v1467_v37 = vpack.c.bf16 %v1284_v27, %v1283_v25  ;;  %v1336_v38 = vmax.f32 %v1332_v28, 0.0  ;;  %v1337_v39 = vmax.f32 %v1333_v30, 0.0 }
 0x2ef   :  { %v1469_v40 = vpack.c.bf16 %v1310_v32, %v1309_v31  ;;  %v1363_v41 = vmax.f32 %v1359_v34, 0.0  ;;  %v1364_v42 = vmax.f32 %v1360_v36, 0.0 }
 0x2f0   :  { %1298 = vst [vmem:[%s1954_s5 + $0x8] sm:$0xff] %v1467_v37  ;;  %v1471_v3 = vpack.c.bf16 %v1337_v39, %v1336_v38 }
 0x2f1   :  { %1457 = vst [vmem:[%s1954_s5 + $0x18] sm:$0xff] %v1469_v40  ;;  %v1473_v43 = vpack.c.bf16 %v1364_v42, %v1363_v41 }
 0x2f2   :  { %1461 = vst [vmem:[%s1954_s5 + $0x28] sm:$0xff] %v1471_v3 }
 0x2f3   :  { %1465 = vst [vmem:[%s1954_s5 + $0x38] sm:$0xff] %v1473_v43 }

// kernel: image_generator_forward.7
= control target key start
LH: loop header
LB: loop body
LE: loop exit
PB: predicated region body
PF: predicated region fallthrough
CT: control target
= control target key end

     0   :  { %v3065_v1 = vmov 0   ;;  %s3066_s11 = smov 126   ;;  %s3067_s12 = smov 127   ;;  %vm66_vm0 = vcmask 1039360   ;;  %vm736_vm1 = vcmask 1031168   ;;  %vm79_vm2 = vcmask 130048   ;;  %s3593_s0 = inlined_call_operand.vmem [shape: bf16[16,806], index: 0, kind: input, shape index: {}]   ;;  %s3594_s1 = inlined_call_operand.vmem [shape: bf16[4,4,3,16], index: 1, kind: input, shape index: {}]   ;;  %s3595_s2 = inlined_call_operand.vmem [shape: f32[4,3,768], index: 2, kind: output, shape index: {}]  }
   0x1   :  { %v3092_v0 = vld [vmem:[%s3593_s0 + $0x4] ss:$28 sps:$4 sm:$0xff]   ;;  %115 = vmatprep.mubr.bf16.mxu0 %v3065_v1  ;;  %784 = vmatprep.mubr.bf16.mxu1 %v3065_v1  ;;  %v3115_v4 = vld [vmem:[%s3593_s0 + $0x10] ss:$28 sps:$4 sm:$0xff]   ;;  %v3012_v6 = vld [vmem:[%s3593_s0 + $0x18] ss:$28 sps:$4 sm:$0xff]  }
   0x2   :  { %724 = vrot.lane.b32.xlu1 %v3092_v0, %s3066_s11  ;;  %54 = vrot.lane.b32.xlu0 %v3092_v0, %s3067_s12  ;;  %v3101_v2 = vld [vmem:[%s3593_s0 + $0x8] ss:$28 sps:$4 sm:$0xff]   ;;  %v3108_v3 = vld [vmem:[%s3593_s0] ss:$28 sps:$4 sm:$0xff]   ;;  %s3068_s27 = smov 110   ;;  %s3069_s28 = smov 109  }
   0x3   :  { %v3120_v5 = vld [vmem:[%s3593_s0 + $0xc] ss:$28 sps:$4 sm:$0xff]   ;;  %v3132_v7 = vld [vmem:[%s3593_s0 + $0x14] ss:$28 sps:$4 sm:$0xff]   ;;  %s3070_s29 = smov 108   ;;  %s3071_s13 = smov 92  }
   0x4   :  { %v3014_v8 = vld [vmem:[%s3593_s0 + $0x18] ss:$28 sps:$4 sm:$0xff]   ;;  %v2751_v21 = vld [vmem:[%s3594_s1 + $0x2] sm:$0x3]  ;;  %v2774_v22 = vld [vmem:[%s3594_s1 + $0xa] sm:$0x3] }
   0x5   :  { %v3222_v11 = vld [vmem:[%s3593_s0 + $0x18] ss:$28 sps:$4 sm:$0xff]   ;;  %v12_v45 = vld [vmem:[%s3594_s1] sm:$0x3]  ;;  %v2773_v48 = vld [vmem:[%s3594_s1 + $0x8] sm:$0x3] }
   0x6   :  { %726 = vrot.lane.b32.xlu1 %v3101_v2, %s3066_s11  ;;  %56 = vrot.lane.b32.xlu0 %v3101_v2, %s3067_s12  ;;  %v3233_v16 = vld [vmem:[%s3593_s0 + $0x18] ss:$28 sps:$4 sm:$0xff]   ;;  %vm354_vm3 = vcmask 900096   ;;  %s3072_s14 = smov 91   ;;  %vm515_vm4 = vcmask 891904   ;;  %s3073_s19 = smov 90  }
   0x7   :  { %vm1203_vm5 = vcmask 883712   ;;  %vm1731_vm6 = vcmask 752640   ;;  %vm1892_vm7 = vcmask 744448   ;;  %vm2580_vm8 = vcmask 736256  }
   0xa   :  { %722 = vrot.lane.b32.xlu1 %v3108_v3, %s3066_s11  ;;  %52 = vrot.lane.b32.xlu0 %v3108_v3, %s3067_s12 }
   0xe   :  { %60 = vrot.lane.b32.xlu1 %v3115_v4, %s3067_s12  ;;  %58 = vrot.lane.b32.xlu0 %v3120_v5, %s3067_s12 }
  0x12   :  { %730 = vrot.lane.b32.xlu1 %v3115_v4, %s3066_s11  ;;  %728 = vrot.lane.b32.xlu0 %v3120_v5, %s3066_s11 }
  0x16   :  { %64 = vrot.lane.b32.xlu1 %v3012_v6, %s3067_s12  ;;  %62 = vrot.lane.b32.xlu0 %v3132_v7, %s3067_s12 }
  0x1a   :  { %734 = vrot.lane.b32.xlu1 %v3014_v8, %s3066_s11  ;;  %732 = vrot.lane.b32.xlu0 %v3132_v7, %s3066_s11 }
  0x1e   :  { %879 = vrot.lane.b32.xlu1 %v3101_v2, %s3067_s12  ;;  %877 = vrot.lane.b32.xlu0 %v3092_v0, %s3067_s12 }
  0x22   :  { %881 = vrot.lane.b32.xlu1 %v3120_v5, %s3067_s12  ;;  %875 = vrot.lane.b32.xlu0 %v3108_v3, %s3067_s12 }
  0x26   :  { %885 = vrot.lane.b32.xlu1 %v3132_v7, %s3067_s12  ;;  %883 = vrot.lane.b32.xlu0 %v3115_v4, %s3067_s12 }
  0x2a   :  { %342 = vrot.lane.b32.xlu1 %v3092_v0, %s3068_s27  ;;  %887 = vrot.lane.b32.xlu0 %v3014_v8, %s3067_s12 }
  0x2e   :  { %1031 = vrot.lane.b32.xlu1 %v3092_v0, %s3069_s28  ;;  %344 = vrot.lane.b32.xlu0 %v3101_v2, %s3068_s27 }
  0x32   :  { %340 = vrot.lane.b32.xlu1 %v3108_v3, %s3068_s27  ;;  %1033 = vrot.lane.b32.xlu0 %v3101_v2, %s3069_s28 }
  0x36   :  { %346 = vrot.lane.b32.xlu1 %v3120_v5, %s3068_s27  ;;  %1029 = vrot.lane.b32.xlu0 %v3108_v3, %s3069_s28 }
  0x3a   :  { %1035 = vrot.lane.b32.xlu1 %v3120_v5, %s3069_s28  ;;  %348 = vrot.lane.b32.xlu0 %v3115_v4, %s3068_s27 }
  0x3e   :  { %350 = vrot.lane.b32.xlu1 %v3132_v7, %s3068_s27  ;;  %1037 = vrot.lane.b32.xlu0 %v3115_v4, %s3069_s28 }
  0x42   :  { %1039 = vrot.lane.b32.xlu1 %v3132_v7, %s3069_s28  ;;  %352 = vrot.lane.b32.xlu0 %v3012_v6, %s3068_s27 }
  0x46   :  { %503 = vrot.lane.b32.xlu1 %v3092_v0, %s3069_s28  ;;  %1041 = vrot.lane.b32.xlu0 %v3014_v8, %s3069_s28 }
  0x4a   :  { %1191 = vrot.lane.b32.xlu1 %v3092_v0, %s3070_s29  ;;  %505 = vrot.lane.b32.xlu0 %v3101_v2, %s3069_s28 }
  0x4e   :  { %501 = vrot.lane.b32.xlu1 %v3108_v3, %s3069_s28  ;;  %1193 = vrot.lane.b32.xlu0 %v3101_v2, %s3070_s29 }
  0x52   :  { %507 = vrot.lane.b32.xlu1 %v3120_v5, %s3069_s28  ;;  %1189 = vrot.lane.b32.xlu0 %v3108_v3, %s3070_s29 }
  0x56   :  { %1195 = vrot.lane.b32.xlu1 %v3120_v5, %s3070_s29  ;;  %509 = vrot.lane.b32.xlu0 %v3115_v4, %s3069_s28 }
  0x5a   :  { %511 = vrot.lane.b32.xlu1 %v3132_v7, %s3069_s28  ;;  %1197 = vrot.lane.b32.xlu0 %v3115_v4, %s3070_s29 }
  0x5e   :  { %1199 = vrot.lane.b32.xlu1 %v3132_v7, %s3070_s29  ;;  %513 = vrot.lane.b32.xlu0 %v3012_v6, %s3069_s28 }
  0x62   :  { %1413 = vrot.lane.b32.xlu1 %v3092_v0, %s3069_s28  ;;  %1201 = vrot.lane.b32.xlu0 %v3014_v8, %s3070_s29 }
  0x66   :  { %2102 = vrot.lane.b32.xlu1 %v3092_v0, %s3070_s29  ;;  %1415 = vrot.lane.b32.xlu0 %v3101_v2, %s3069_s28 }
  0x6a   :  { %1411 = vrot.lane.b32.xlu1 %v3108_v3, %s3069_s28  ;;  %2104 = vrot.lane.b32.xlu0 %v3101_v2, %s3070_s29 }
  0x6e   :  { %1417 = vrot.lane.b32.xlu1 %v3120_v5, %s3069_s28  ;;  %2100 = vrot.lane.b32.xlu0 %v3108_v3, %s3070_s29 }
  0x72   :  { %2106 = vrot.lane.b32.xlu1 %v3120_v5, %s3070_s29  ;;  %1419 = vrot.lane.b32.xlu0 %v3115_v4, %s3069_s28 }
  0x74   :  { %v725_v9 = vpop.permute.xlu1 %724  ;;  %v55_v10 = vpop.permute.xlu0 %54 }
  0x76   :  { %1421 = vrot.lane.b32.xlu1 %v3132_v7, %s3069_s28  ;;  %2108 = vrot.lane.b32.xlu0 %v3115_v4, %s3070_s29 }
  0x78   :  { %v727_v12 = vpop.permute.xlu1 %726  ;;  %v57_v13 = vpop.permute.xlu0 %56 }
  0x79   :  { %v68_v14 = vsel %vm66_vm0, %v55_v10, %v57_v13  ;;  %v738_v15 = vsel %vm736_vm1, %v725_v9, %v727_v12 }
  0x7a   :  { %83 = vmatprep.subr.bf16.mxu0 %v68_v14  ;;  %752 = vmatprep.subr.bf16.mxu1 %v738_v15 }
  0x7b   :  { %2110 = vrot.lane.b32.xlu1 %v3132_v7, %s3070_s29  ;;  %1423 = vrot.lane.b32.xlu0 %v3222_v11, %s3069_s28 }
  0x7c   :  { %v723_v17 = vpop.permute.xlu1 %722  ;;  %v53_v18 = vpop.permute.xlu0 %52 }
  0x7d   :  { %v737_v19 = vsel %vm736_vm1, %v723_v17, %v725_v9  ;;  %v67_v20 = vsel %vm66_vm0, %v53_v18, %v55_v10  ;;  %v2788_v17 = vld [vmem:[%s3594_s1 + $0xc] sm:$0x3] }
  0x7e   :  { %753 = vmatpush1.bf16.msra.mxu1 %v737_v19  ;;  %84 = vmatpush1.bf16.msra.mxu0 %v67_v20 }
  0x7f   :  { %1565 = vrot.lane.b32.xlu1 %v3092_v0, %s3068_s27  ;;  %2112 = vrot.lane.b32.xlu0 %v3233_v16, %s3070_s29 }
  0x80   :  { %v61_v23 = vpop.permute.xlu1 %60  ;;  %v59_v24 = vpop.permute.xlu0 %58 }
  0x81   :  { %2759 = vmatmul.mubr.msk.bf16.vlgmr.msra.gmra.mrb[0].mxu0 %vm79_vm2, %v2751_v21  ;;  %2782 = vmatmul.mubr.msk.bf16.vlgmr.msra.gmra.mrb[0].mxu1 %vm79_vm2, %v2774_v22  ;;  %v70_v25 = vsel %vm66_vm0, %v59_v24, %v61_v23  ;;  %v69_v26 = vsel %vm66_vm0, %v57_v13, %v59_v24 }
  0x82   :  { %124 = vmatprep.subr.bf16.mxu0 %v70_v25  ;;  %156 = vmatprep.mubr.bf16.mxu0 %v3065_v1 }
  0x83   :  { %2254 = vrot.lane.b32.xlu1 %v3092_v0, %s3069_s28  ;;  %1567 = vrot.lane.b32.xlu0 %v3101_v2, %s3068_s27 }
  0x84   :  { %125 = vmatpush1.bf16.msra.mxu0 %v69_v26  ;;  %v731_v27 = vpop.permute.xlu1 %730  ;;  %v729_v28 = vpop.permute.xlu0 %728  ;;  %825 = vmatprep.mubr.bf16.mxu1 %v3065_v1 }
  0x85   :  { %v739_v29 = vsel %vm736_vm1, %v727_v12, %v729_v28  ;;  %v740_v30 = vsel %vm736_vm1, %v729_v28, %v731_v27  ;;  %v2765_v12 = vld [vmem:[%s3594_s1 + $0x4] sm:$0x3] }
  0x86   :  { %793 = vmatprep.subr.bf16.mxu1 %v740_v30 }
  0x87   :  { %1563 = vrot.lane.b32.xlu1 %v3108_v3, %s3068_s27  ;;  %2256 = vrot.lane.b32.xlu0 %v3101_v2, %s3069_s28 }
  0x88   :  { %794 = vmatpush1.bf16.msra.mxu1 %v739_v29  ;;  %v65_v31 = vpop.permute.xlu1 %64  ;;  %v63_v32 = vpop.permute.xlu0 %62 }
  0x89   :  { %v71_v33 = vsel %vm66_vm0, %v61_v23, %v63_v32  ;;  %2760 = vmatmul.mubr.msk.bf16.vlgmr.msra.gmra.mrb[4].mxu0 %vm79_vm2, %v2751_v21  ;;  %v72_v34 = vsel %vm66_vm0, %v63_v32, %v65_v31 }
  0x8a   :  { %165 = vmatprep.subr.bf16.mxu0 %v72_v34  ;;  %197 = vmatprep.mubr.bf16.mxu0 %v3065_v1 }
  0x8b   :  { %1569 = vrot.lane.b32.xlu1 %v3120_v5, %s3068_s27  ;;  %2252 = vrot.lane.b32.xlu0 %v3108_v3, %s3069_s28 }
  0x8c   :  { %2783 = vmatmul.mubr.msk.bf16.vlgmr.msra.gmra.mrb[4].mxu1 %vm79_vm2, %v2774_v22  ;;  %166 = vmatpush1.bf16.msra.mxu0 %v71_v33  ;;  %v735_v35 = vpop.permute.xlu1 %734  ;;  %v733_v36 = vpop.permute.xlu0 %732 }
  0x8d   :  { %v741_v37 = vsel %vm736_vm1, %v731_v27, %v733_v36  ;;  %v742_v38 = vsel %vm736_vm1, %v733_v36, %v735_v35  ;;  %866 = vmatprep.mubr.bf16.mxu1 %v3065_v1  ;;  %215 = vmatprep.subr.bf16.mxu0 %v3092_v0  ;;  %v2769_v36 = vld [vmem:[%s3594_s1 + $0x6] sm:$0x3] }
  0x8e   :  { %834 = vmatprep.subr.bf16.mxu1 %v742_v38 }
  0x8f   :  { %2258 = vrot.lane.b32.xlu1 %v3120_v5, %s3069_s28  ;;  %1571 = vrot.lane.b32.xlu0 %v3115_v4, %s3068_s27 }
  0x90   :  { %835 = vmatpush1.bf16.msra.mxu1 %v741_v37  ;;  %v880_v39 = vpop.permute.xlu1 %879  ;;  %v878_v40 = vpop.permute.xlu0 %877 }
  0x91   :  { %2761 = vmatmul.mubr.msk.bf16.vlgmr.msra.gmra.mrb[8].mxu0 %vm79_vm2, %v2751_v21  ;;  %v890_v41 = vsel %vm66_vm0, %v878_v40, %v880_v39 }
  0x92   :  { %904 = vmatprep.subr.bf16.mxu1 %v890_v41  ;;  %216 = vmatpush1.bf16.msra.mxu0 %v3108_v3 }
  0x93   :  { %1573 = vrot.lane.b32.xlu1 %v3132_v7, %s3068_s27  ;;  %2260 = vrot.lane.b32.xlu0 %v3115_v4, %s3069_s28 }
  0x94   :  { %2784 = vmatmul.mubr.msk.bf16.vlgmr.msra.gmra.mrb[8].mxu1 %vm79_vm2, %v2774_v22  ;;  %v882_v42 = vpop.permute.xlu1 %881  ;;  %v876_v43 = vpop.permute.xlu0 %875  ;;  %247 = vmatprep.mubr.bf16.mxu0 %v3065_v1 }
  0x95   :  { %v889_v44 = vsel %vm66_vm0, %v876_v43, %v878_v40  ;;  %936 = vmatprep.mubr.bf16.mxu1 %v3065_v1  ;;  %256 = vmatprep.subr.bf16.mxu0 %v3120_v5  ;;  %v891_v50 = vsel %vm66_vm0, %v880_v39, %v882_v42  ;;  %v2792_v39 = vld [vmem:[%s3594_s1 + $0xe] sm:$0x3] }
  0x96   :  { %905 = vmatpush1.bf16.msra.mxu1 %v889_v44 }
  0x97   :  { %2262 = vrot.lane.b32.xlu1 %v3132_v7, %s3069_s28  ;;  %1575 = vrot.lane.b32.xlu0 %v3222_v11, %s3068_s27 }
  0x98   :  { %v886_v46 = vpop.permute.xlu1 %885  ;;  %v884_v47 = vpop.permute.xlu0 %883 }
  0x99   :  { %2762 = vmatmul.mubr.msk.bf16.vlgmr.msra.gmra.mrb[0].mxu0 %vm79_vm2, %v12_v45  ;;  %v892_v49 = vsel %vm66_vm0, %v882_v42, %v884_v47  ;;  %v893_v57 = vsel %vm66_vm0, %v884_v47, %v886_v46 }
  0x9a   :  { %945 = vmatprep.subr.bf16.mxu1 %v892_v49  ;;  %257 = vmatpush1.bf16.msra.mxu0 %v3101_v2 }
  0x9b   :  { %1719 = vrot.lane.b32.xlu1 %v3092_v0, %s3071_s13  ;;  %2264 = vrot.lane.b32.xlu0 %v3233_v16, %s3069_s28 }
  0x9c   :  { %2785 = vmatmul.mubr.msk.bf16.vlgmr.msra.gmra.mrb[0].mxu1 %vm79_vm2, %v2773_v48  ;;  %v343_v51 = vpop.permute.xlu1 %342  ;;  %v888_v52 = vpop.permute.xlu0 %887  ;;  %288 = vmatprep.mubr.bf16.mxu0 %v3065_v1 }
  0x9d   :  { %946 = vmatpush1.bf16.msra.mxu1 %v891_v50  ;;  %v894_v53 = vsel %vm66_vm0, %v886_v46, %v888_v52  ;;  %297 = vmatprep.subr.bf16.mxu0 %v3132_v7 }
  0x9e   :  { %986 = vmatprep.subr.bf16.mxu1 %v894_v53  ;;  %977 = vmatprep.mubr.bf16.mxu1 %v3065_v1 }
  0x9f   :  { %2408 = vrot.lane.b32.xlu1 %v3092_v0, %s3072_s14  ;;  %1721 = vrot.lane.b32.xlu0 %v3101_v2, %s3071_s13 }
  0xa0   :  { %v1032_v54 = vpop.permute.xlu1 %1031  ;;  %v345_v55 = vpop.permute.xlu0 %344 }
  0xa1   :  { %2763 = vmatmul.mubr.msk.bf16.vlgmr.msra.gmra.mrb[4].mxu0 %vm79_vm2, %v12_v45  ;;  %v356_v56 = vsel %vm354_vm3, %v343_v51, %v345_v55 }
  0xa2   :  { %298 = vmatpush1.bf16.msra.mxu0 %v3115_v4  ;;  %329 = vmatprep.mubr.bf16.mxu0 %v3065_v1 }
  0xa3   :  { %1717 = vrot.lane.b32.xlu1 %v3108_v3, %s3071_s13  ;;  %2410 = vrot.lane.b32.xlu0 %v3101_v2, %s3072_s14 }
  0xa4   :  { %370 = vmatprep.subr.bf16.mxu0 %v356_v56  ;;  %2786 = vmatmul.mubr.msk.bf16.vlgmr.msra.gmra.mrb[4].mxu1 %vm79_vm2, %v2773_v48  ;;  %v341_v58 = vpop.permute.xlu1 %340  ;;  %v1034_v59 = vpop.permute.xlu0 %1033 }
  0xa5   :  { %987 = vmatpush1.bf16.msra.mxu1 %v893_v57  ;;  %v1044_v60 = vsel %vm515_vm4, %v1032_v54, %v1034_v59  ;;  %1018 = vmatprep.mubr.bf16.mxu1 %v3065_v1  ;;  %v355_v63 = vsel %vm354_vm3, %v341_v58, %v343_v51 }
  0xa6   :  { %1058 = vmatprep.subr.bf16.mxu1 %v1044_v60 }
  0xa7   :  { %1723 = vrot.lane.b32.xlu1 %v3120_v5, %s3071_s13  ;;  %2406 = vrot.lane.b32.xlu0 %v3108_v3, %s3072_s14 }
  0xa8   :  { %v347_v61 = vpop.permute.xlu1 %346  ;;  %v1030_v62 = vpop.permute.xlu0 %1029 }
  0xa9   :  { %2764 = vmatmul.mubr.msk.bf16.vlgmr.msra.gmra.mrb[8].mxu0 %vm79_vm2, %v12_v45  ;;  %v1043_v6 = vsel %vm515_vm4, %v1030_v62, %v1032_v54  ;;  %v357_v15 = vsel %vm354_vm3, %v345_v55, %v347_v61  ;;  %v2800_v55 = vld [vmem:[%s3594_s1 + $0x12] sm:$0x3] }
  0xaa   :  { %371 = vmatpush1.bf16.msra.mxu0 %v355_v63  ;;  %402 = vmatprep.mubr.bf16.mxu0 %v3065_v1 }
  0xab   :  { %2412 = vrot.lane.b32.xlu1 %v3120_v5, %s3072_s14  ;;  %1725 = vrot.lane.b32.xlu0 %v3115_v4, %s3071_s13 }
  0xac   :  { %2787 = vmatmul.mubr.msk.bf16.vlgmr.msra.gmra.mrb[8].mxu1 %vm79_vm2, %v2773_v48  ;;  %v1036_v8 = vpop.permute.xlu1 %1035  ;;  %v349_v9 = vpop.permute.xlu0 %348 }
  0xad   :  { %1059 = vmatpush1.bf16.msra.mxu1 %v1043_v6  ;;  %v358_v10 = vsel %vm354_vm3, %v347_v61, %v349_v9  ;;  %1090 = vmatprep.mubr.bf16.mxu1 %v3065_v1  ;;  %v1045_v19 = vsel %vm515_vm4, %v1034_v59, %v1036_v8  ;;  %v2826_v59 = vld [vmem:[%s3594_s1 + $0x1a] sm:$0x3] }
  0xae   :  { %411 = vmatprep.subr.bf16.mxu0 %v358_v10 }
  0xaf   :  { %1727 = vrot.lane.b32.xlu1 %v3132_v7, %s3071_s13  ;;  %2414 = vrot.lane.b32.xlu0 %v3115_v4, %s3072_s14 }
  0xb0   :  { %v351_v13 = vpop.permute.xlu1 %350  ;;  %v1038_v14 = vpop.permute.xlu0 %1037 }
  0xb1   :  { %2766 = vmatmul.mubr.msk.bf16.vlgmr.msra.gmra.mrb[0].mxu0 %vm79_vm2, %v2765_v12  ;;  %v1046_v18 = vsel %vm515_vm4, %v1036_v8, %v1038_v14  ;;  %v359_v25 = vsel %vm354_vm3, %v349_v9, %v351_v13 }
  0xb2   :  { %412 = vmatpush1.bf16.msra.mxu0 %v357_v15  ;;  %1099 = vmatprep.subr.bf16.mxu1 %v1046_v18 }
  0xb3   :  { %2416 = vrot.lane.b32.xlu1 %v3132_v7, %s3072_s14  ;;  %1729 = vrot.lane.b32.xlu0 %v3222_v11, %s3071_s13 }
  0xb4   :  { %2789 = vmatmul.mubr.msk.bf16.vlgmr.msra.gmra.mrb[0].mxu1 %vm79_vm2, %v2788_v17  ;;  %v1040_v20 = vpop.permute.xlu1 %1039  ;;  %v353_v21 = vpop.permute.xlu0 %352  ;;  %443 = vmatprep.mubr.bf16.mxu0 %v3065_v1 }
  0xb5   :  { %1100 = vmatpush1.bf16.msra.mxu1 %v1045_v19  ;;  %v360_v22 = vsel %vm354_vm3, %v351_v13, %v353_v21  ;;  %1131 = vmatprep.mubr.bf16.mxu1 %v3065_v1  ;;  %v1047_v27 = vsel %vm515_vm4, %v1038_v14, %v1040_v20 }
  0xb6   :  { %452 = vmatprep.subr.bf16.mxu0 %v360_v22 }
  0xb7   :  { %1880 = vrot.lane.b32.xlu1 %v3092_v0, %s3072_s14  ;;  %2418 = vrot.lane.b32.xlu0 %v3233_v16, %s3072_s14 }
  0xb8   :  { %v504_v23 = vpop.permute.xlu1 %503  ;;  %v1042_v24 = vpop.permute.xlu0 %1041 }
  0xb9   :  { %2767 = vmatmul.mubr.msk.bf16.vlgmr.msra.gmra.mrb[4].mxu0 %vm79_vm2, %v2765_v12  ;;  %v1048_v26 = vsel %vm515_vm4, %v1040_v20, %v1042_v24 }
  0xba   :  { %453 = vmatpush1.bf16.msra.mxu0 %v359_v25  ;;  %1140 = vmatprep.subr.bf16.mxu1 %v1048_v26 }
  0xbb   :  { %2568 = vrot.lane.b32.xlu1 %v3092_v0, %s3073_s19  ;;  %1882 = vrot.lane.b32.xlu0 %v3101_v2, %s3072_s14 }
  0xbc   :  { %2790 = vmatmul.mubr.msk.bf16.vlgmr.msra.gmra.mrb[4].mxu1 %vm79_vm2, %v2788_v17  ;;  %v1192_v28 = vpop.permute.xlu1 %1191  ;;  %v506_v29 = vpop.permute.xlu0 %505  ;;  %484 = vmatprep.mubr.bf16.mxu0 %v3065_v1 }
  0xbd   :  { %1141 = vmatpush1.bf16.msra.mxu1 %v1047_v27  ;;  %v517_v30 = vsel %vm515_vm4, %v504_v23, %v506_v29  ;;  %1172 = vmatprep.mubr.bf16.mxu1 %v3065_v1 }
  0xbe   :  { %531 = vmatprep.subr.bf16.mxu0 %v517_v30 }
  0xbf   :  { %1878 = vrot.lane.b32.xlu1 %v3108_v3, %s3072_s14  ;;  %2570 = vrot.lane.b32.xlu0 %v3101_v2, %s3073_s19 }
  0xc0   :  { %v502_v0 = vpop.permute.xlu1 %501  ;;  %v1194_v31 = vpop.permute.xlu0 %1193 }
  0xc1   :  { %v516_v32 = vsel %vm515_vm4, %v502_v0, %v504_v23  ;;  %2768 = vmatmul.mubr.msk.bf16.vlgmr.msra.gmra.mrb[8].mxu0 %vm79_vm2, %v2765_v12  ;;  %v1205_v33 = vsel %vm1203_vm5, %v1192_v28, %v1194_v31 }
  0xc2   :  { %532 = vmatpush1.bf16.msra.mxu0 %v516_v32  ;;  %1219 = vmatprep.subr.bf16.mxu1 %v1205_v33 }
  0xc3   :  { %1884 = vrot.lane.b32.xlu1 %v3120_v5, %s3072_s14  ;;  %2566 = vrot.lane.b32.xlu0 %v3108_v3, %s3073_s19 }
  0xc4   :  { %2791 = vmatmul.mubr.msk.bf16.vlgmr.msra.gmra.mrb[8].mxu1 %vm79_vm2, %v2788_v17  ;;  %v508_v34 = vpop.permute.xlu1 %507  ;;  %v1190_v2 = vpop.permute.xlu0 %1189  ;;  %563 = vmatprep.mubr.bf16.mxu0 %v3065_v1 }
  0xc5   :  { %v1204_v35 = vsel %vm1203_vm5, %v1190_v2, %v1192_v28  ;;  %1251 = vmatprep.mubr.bf16.mxu1 %v3065_v1  ;;  %v518_v40 = vsel %vm515_vm4, %v506_v29, %v508_v34  ;;  %v2799_v28 = vld [vmem:[%s3594_s1 + $0x10] sm:$0x3] }
  0xc6   :  { %1220 = vmatpush1.bf16.msra.mxu1 %v1204_v35 }
  0xc7   :  { %2572 = vrot.lane.b32.xlu1 %v3120_v5, %s3073_s19  ;;  %1886 = vrot.lane.b32.xlu0 %v3115_v4, %s3072_s14 }
  0xc8   :  { %v1196_v3 = vpop.permute.xlu1 %1195  ;;  %v510_v37 = vpop.permute.xlu0 %509 }
  0xc9   :  { %2770 = vmatmul.mubr.msk.bf16.vlgmr.msra.gmra.mrb[0].mxu0 %vm79_vm2, %v2769_v36  ;;  %v519_v38 = vsel %vm515_vm4, %v508_v34, %v510_v37  ;;  %v1206_v43 = vsel %vm1203_vm5, %v1194_v31, %v1196_v3  ;;  %v2825_v31 = vld [vmem:[%s3594_s1 + $0x18] sm:$0x3] }
  0xca   :  { %572 = vmatprep.subr.bf16.mxu0 %v519_v38  ;;  %604 = vmatprep.mubr.bf16.mxu0 %v3065_v1 }
  0xcb   :  { %1888 = vrot.lane.b32.xlu1 %v3132_v7, %s3072_s14  ;;  %2574 = vrot.lane.b32.xlu0 %v3115_v4, %s3073_s19 }
  0xcc   :  { %2793 = vmatmul.mubr.msk.bf16.vlgmr.msra.gmra.mrb[0].mxu1 %vm79_vm2, %v2792_v39  ;;  %573 = vmatpush1.bf16.msra.mxu0 %v518_v40  ;;  %v512_v5 = vpop.permute.xlu1 %511  ;;  %v1198_v41 = vpop.permute.xlu0 %1197 }
  0xcd   :  { %v1207_v42 = vsel %vm1203_vm5, %v1196_v3, %v1198_v41  ;;  %1292 = vmatprep.mubr.bf16.mxu1 %v3065_v1  ;;  %v520_v46 = vsel %vm515_vm4, %v510_v37, %v512_v5 }
  0xce   :  { %1260 = vmatprep.subr.bf16.mxu1 %v1207_v42 }
  0xcf   :  { %2576 = vrot.lane.b32.xlu1 %v3132_v7, %s3073_s19  ;;  %1890 = vrot.lane.b32.xlu0 %v3222_v11, %s3072_s14 }
  0xd0   :  { %1261 = vmatpush1.bf16.msra.mxu1 %v1206_v43  ;;  %v1200_v4 = vpop.permute.xlu1 %1199  ;;  %v514_v44 = vpop.permute.xlu0 %513 }
  0xd1   :  { %2771 = vmatmul.mubr.msk.bf16.vlgmr.msra.gmra.mrb[4].mxu0 %vm79_vm2, %v2769_v36  ;;  %v521_v45 = vsel %vm515_vm4, %v512_v5, %v514_v44  ;;  %v1208_v48 = vsel %vm1203_vm5, %v1198_v41, %v1200_v4 }
  0xd2   :  { %613 = vmatprep.subr.bf16.mxu0 %v521_v45  ;;  %645 = vmatprep.mubr.bf16.mxu0 %v3065_v1 }
  0xd3   :  { %2578 = vrot.lane.b32.xlu0 %v3233_v16, %s3073_s19  ;;  %614 = vmatpush1.bf16.msra.mxu0 %v520_v46 }
  0xd4   :  { %2794 = vmatmul.mubr.msk.bf16.vlgmr.msra.gmra.mrb[4].mxu1 %vm79_vm2, %v2792_v39  ;;  %v1414_v7 = vpop.permute.xlu1 %1413  ;;  %v1202_v11 = vpop.permute.xlu0 %1201 }
  0xd5   :  { %v1209_v47 = vsel %vm1203_vm5, %v1200_v4, %v1202_v11  ;;  %1333 = vmatprep.mubr.bf16.mxu1 %v3065_v1 }
  0xd6   :  { %1301 = vmatprep.subr.bf16.mxu1 %v1209_v47 }
  0xd7   :  { %1302 = vmatpush1.bf16.msra.mxu1 %v1208_v48 }
  0xd8   :  { %v2103_v49 = vpop.permute.xlu1 %2102  ;;  %v1416_v50 = vpop.permute.xlu0 %1415 }
  0xd9   :  { %2772 = vmatmul.mubr.msk.bf16.vlgmr.msra.gmra.mrb[8].mxu0 %vm79_vm2, %v2769_v36  ;;  %v1426_v51 = vsel %vm515_vm4, %v1414_v7, %v1416_v50 }
  0xda   :  { %1440 = vmatprep.subr.bf16.mxu0 %v1426_v51  ;;  %1472 = vmatprep.mubr.bf16.mxu0 %v3065_v1 }
  0xdc   :  { %2795 = vmatmul.mubr.msk.bf16.vlgmr.msra.gmra.mrb[8].mxu1 %vm79_vm2, %v2792_v39  ;;  %v1412_v16 = vpop.permute.xlu1 %1411  ;;  %v2105_v52 = vpop.permute.xlu0 %2104 }
  0xdd   :  { %v1425_v53 = vsel %vm515_vm4, %v1412_v16, %v1414_v7  ;;  %v2115_v54 = vsel %vm1203_vm5, %v2103_v49, %v2105_v52  ;;  %2161 = vmatprep.mubr.bf16.mxu1 %v3065_v1 }
  0xde   :  { %1441 = vmatpush1.bf16.msra.mxu0 %v1425_v53  ;;  %2129 = vmatprep.subr.bf16.mxu1 %v2115_v54 }
  0xe0   :  { %v1418_v56 = vpop.permute.xlu1 %1417  ;;  %v2101_v57 = vpop.permute.xlu0 %2100 }
  0xe1   :  { %v2114_v58 = vsel %vm1203_vm5, %v2101_v57, %v2103_v49  ;;  %2808 = vmatmul.mubr.msk.bf16.vlgmr.msra.gmra.mrb[12].mxu0 %vm79_vm2, %v2800_v55  ;;  %v1427_v63 = vsel %vm515_vm4, %v1416_v50, %v1418_v56  ;;  %v2814_v49 = vld [vmem:[%s3594_s1 + $0x14] sm:$0x3] }
  0xe2   :  { %2130 = vmatpush1.bf16.msra.mxu1 %v2114_v58  ;;  %1513 = vmatprep.mubr.bf16.mxu0 %v3065_v1 }
  0xe4   :  { %v2107_v60 = vpop.permute.xlu1 %2106  ;;  %v1420_v61 = vpop.permute.xlu0 %1419 }
  0xe5   :  { %v1428_v62 = vsel %vm515_vm4, %v1418_v56, %v1420_v61  ;;  %2834 = vmatmul.mubr.msk.bf16.vlgmr.msra.gmra.mrb[12].mxu1 %vm79_vm2, %v2826_v59  ;;  %v2116_v10 = vsel %vm1203_vm5, %v2105_v52, %v2107_v60  ;;  %v2840_v52 = vld [vmem:[%s3594_s1 + $0x1c] sm:$0x3] }
  0xe6   :  { %1481 = vmatprep.subr.bf16.mxu0 %v1428_v62  ;;  %2202 = vmatprep.mubr.bf16.mxu1 %v3065_v1 }
  0xe7   :  { %1482 = vmatpush1.bf16.msra.mxu0 %v1427_v63 }
  0xe8   :  { %v1422_v6 = vpop.permute.xlu1 %1421  ;;  %v2109_v8 = vpop.permute.xlu0 %2108 }
  0xe9   :  { %v2117_v9 = vsel %vm1203_vm5, %v2107_v60, %v2109_v8  ;;  %v1429_v15 = vsel %vm515_vm4, %v1420_v61, %v1422_v6 }
  0xea   :  { %2170 = vmatprep.subr.bf16.mxu1 %v2117_v9  ;;  %2809 = vmatmul.mubr.msk.bf16.vlgmr.msra.gmra.mrb[16].mxu0 %vm79_vm2, %v2800_v55 }
  0xeb   :  { %2171 = vmatpush1.bf16.msra.mxu1 %v2116_v10  ;;  %1554 = vmatprep.mubr.bf16.mxu0 %v3065_v1 }
  0xed   :  { %v2111_v12 = vpop.permute.xlu1 %2110  ;;  %v1424_v13 = vpop.permute.xlu0 %1423 }
  0xee   :  { %v1430_v14 = vsel %vm515_vm4, %v1422_v6, %v1424_v13  ;;  %2835 = vmatmul.mubr.msk.bf16.vlgmr.msra.gmra.mrb[16].mxu1 %vm79_vm2, %v2826_v59  ;;  %v2118_v20 = vsel %vm1203_vm5, %v2109_v8, %v2111_v12 }
  0xef   :  { %1522 = vmatprep.subr.bf16.mxu0 %v1430_v14  ;;  %2243 = vmatprep.mubr.bf16.mxu1 %v3065_v1 }
  0xf0   :  { %1523 = vmatpush1.bf16.msra.mxu0 %v1429_v15 }
  0xf1   :  { %v1566_v17 = vpop.permute.xlu1 %1565  ;;  %v2113_v18 = vpop.permute.xlu0 %2112 }
  0xf2   :  { %v2119_v19 = vsel %vm1203_vm5, %v2111_v12, %v2113_v18 }
  0xf3   :  { %2211 = vmatprep.subr.bf16.mxu1 %v2119_v19  ;;  %2810 = vmatmul.mubr.msk.bf16.vlgmr.msra.gmra.mrb[20].mxu0 %vm79_vm2, %v2800_v55 }
  0xf4   :  { %2212 = vmatpush1.bf16.msra.mxu1 %v2118_v20  ;;  %1624 = vmatprep.mubr.bf16.mxu0 %v3065_v1 }
  0xf5   :  { %v2255_v21 = vpop.permute.xlu1 %2254  ;;  %v1568_v22 = vpop.permute.xlu0 %1567 }
  0xf6   :  { %v1578_v23 = vsel %vm354_vm3, %v1566_v17, %v1568_v22 }
  0xf7   :  { %1592 = vmatprep.subr.bf16.mxu0 %v1578_v23  ;;  %2836 = vmatmul.mubr.msk.bf16.vlgmr.msra.gmra.mrb[20].mxu1 %vm79_vm2, %v2826_v59 }
  0xf8   :  { %2313 = vmatprep.mubr.bf16.mxu1 %v3065_v1 }
  0xf9   :  { %v1564_v24 = vpop.permute.xlu1 %1563  ;;  %v2257_v25 = vpop.permute.xlu0 %2256 }
  0xfa   :  { %v1577_v26 = vsel %vm354_vm3, %v1564_v24, %v1566_v17  ;;  %v2267_v27 = vsel %vm515_vm4, %v2255_v21, %v2257_v25 }
  0xfb   :  { %1593 = vmatpush1.bf16.msra.mxu0 %v1577_v26  ;;  %2281 = vmatprep.subr.bf16.mxu1 %v2267_v27 }
  0xfd   :  { %v1570_v29 = vpop.permute.xlu1 %1569  ;;  %v2253_v30 = vpop.permute.xlu0 %2252 }
  0xfe   :  { %v2266_v0 = vsel %vm515_vm4, %v2253_v30, %v2255_v21  ;;  %2811 = vmatmul.mubr.msk.bf16.vlgmr.msra.gmra.mrb[12].mxu0 %vm79_vm2, %v2799_v28  ;;  %v1579_v2 = vsel %vm354_vm3, %v1568_v22, %v1570_v29  ;;  %v2818_v21 = vld [vmem:[%s3594_s1 + $0x16] sm:$0x3] }
  0xff   :  { %2282 = vmatpush1.bf16.msra.mxu1 %v2266_v0  ;;  %1665 = vmatprep.mubr.bf16.mxu0 %v3065_v1 }
 0x101   :  { %v2259_v32 = vpop.permute.xlu1 %2258  ;;  %v1572_v33 = vpop.permute.xlu0 %1571 }
 0x102   :  { %v1580_v34 = vsel %vm354_vm3, %v1570_v29, %v1572_v33  ;;  %2837 = vmatmul.mubr.msk.bf16.vlgmr.msra.gmra.mrb[12].mxu1 %vm79_vm2, %v2825_v31  ;;  %v2268_v37 = vsel %vm515_vm4, %v2257_v25, %v2259_v32  ;;  %v2844_v25 = vld [vmem:[%s3594_s1 + $0x1e] sm:$0x3] }
 0x103   :  { %1633 = vmatprep.subr.bf16.mxu0 %v1580_v34  ;;  %2354 = vmatprep.mubr.bf16.mxu1 %v3065_v1 }
 0x104   :  { %1634 = vmatpush1.bf16.msra.mxu0 %v1579_v2 }
 0x105   :  { %v1574_v35 = vpop.permute.xlu1 %1573  ;;  %v2261_v36 = vpop.permute.xlu0 %2260 }
 0x106   :  { %v2269_v3 = vsel %vm515_vm4, %v2259_v32, %v2261_v36  ;;  %v1581_v5 = vsel %vm354_vm3, %v1572_v33, %v1574_v35 }
 0x107   :  { %2322 = vmatprep.subr.bf16.mxu1 %v2269_v3  ;;  %2812 = vmatmul.mubr.msk.bf16.vlgmr.msra.gmra.mrb[16].mxu0 %vm79_vm2, %v2799_v28 }
 0x108   :  { %2323 = vmatpush1.bf16.msra.mxu1 %v2268_v37  ;;  %1706 = vmatprep.mubr.bf16.mxu0 %v3065_v1 }
 0x109   :  { %v2263_v38 = vpop.permute.xlu1 %2262  ;;  %v1576_v39 = vpop.permute.xlu0 %1575 }
 0x10a   :  { %v1582_v40 = vsel %vm354_vm3, %v1574_v35, %v1576_v39  ;;  %v2270_v4 = vsel %vm515_vm4, %v2261_v36, %v2263_v38 }
 0x10b   :  { %1674 = vmatprep.subr.bf16.mxu0 %v1582_v40  ;;  %2838 = vmatmul.mubr.msk.bf16.vlgmr.msra.gmra.mrb[16].mxu1 %vm79_vm2, %v2825_v31 }
 0x10c   :  { %1675 = vmatpush1.bf16.msra.mxu0 %v1581_v5  ;;  %2395 = vmatprep.mubr.bf16.mxu1 %v3065_v1 }
 0x10d   :  { %v1720_v41 = vpop.permute.xlu1 %1719  ;;  %v2265_v42 = vpop.permute.xlu0 %2264 }
 0x10e   :  { %v2271_v43 = vsel %vm515_vm4, %v2263_v38, %v2265_v42 }
 0x10f   :  { %2363 = vmatprep.subr.bf16.mxu1 %v2271_v43  ;;  %2813 = vmatmul.mubr.msk.bf16.vlgmr.msra.gmra.mrb[20].mxu0 %vm79_vm2, %v2799_v28 }
 0x110   :  { %2364 = vmatpush1.bf16.msra.mxu1 %v2270_v4  ;;  %1779 = vmatprep.mubr.bf16.mxu0 %v3065_v1 }
 0x111   :  { %v2409_v44 = vpop.permute.xlu1 %2408  ;;  %v1722_v45 = vpop.permute.xlu0 %1721 }
 0x112   :  { %v1733_v46 = vsel %vm1731_vm6, %v1720_v41, %v1722_v45 }
 0x113   :  { %1747 = vmatprep.subr.bf16.mxu0 %v1733_v46  ;;  %2839 = vmatmul.mubr.msk.bf16.vlgmr.msra.gmra.mrb[20].mxu1 %vm79_vm2, %v2825_v31 }
 0x114   :  { %2467 = vmatprep.mubr.bf16.mxu1 %v3065_v1 }
 0x115   :  { %v1718_v7 = vpop.permute.xlu1 %1717  ;;  %v2411_v11 = vpop.permute.xlu0 %2410 }
 0x116   :  { %v1732_v47 = vsel %vm1731_vm6, %v1718_v7, %v1720_v41  ;;  %v2421_v48 = vsel %vm1892_vm7, %v2409_v44, %v2411_v11 }
 0x117   :  { %1748 = vmatpush1.bf16.msra.mxu0 %v1732_v47  ;;  %2435 = vmatprep.subr.bf16.mxu1 %v2421_v48 }
 0x119   :  { %v1724_v50 = vpop.permute.xlu1 %1723  ;;  %v2407_v51 = vpop.permute.xlu0 %2406 }
 0x11a   :  { %v2420_v16 = vsel %vm1892_vm7, %v2407_v51, %v2409_v44  ;;  %2815 = vmatmul.mubr.msk.bf16.vlgmr.msra.gmra.mrb[12].mxu0 %vm79_vm2, %v2814_v49  ;;  %v1734_v56 = vsel %vm1731_vm6, %v1722_v45, %v1724_v50 }
 0x11b   :  { %2436 = vmatpush1.bf16.msra.mxu1 %v2420_v16  ;;  %1820 = vmatprep.mubr.bf16.mxu0 %v3065_v1 }
 0x11d   :  { %v2413_v53 = vpop.permute.xlu1 %2412  ;;  %v1726_v54 = vpop.permute.xlu0 %1725 }
 0x11e   :  { %v1735_v55 = vsel %vm1731_vm6, %v1724_v50, %v1726_v54  ;;  %2841 = vmatmul.mubr.msk.bf16.vlgmr.msra.gmra.mrb[12].mxu1 %vm79_vm2, %v2840_v52  ;;  %v2422_v60 = vsel %vm1892_vm7, %v2411_v11, %v2413_v53 }
 0x11f   :  { %1788 = vmatprep.subr.bf16.mxu0 %v1735_v55  ;;  %2508 = vmatprep.mubr.bf16.mxu1 %v3065_v1 }
 0x120   :  { %1789 = vmatpush1.bf16.msra.mxu0 %v1734_v56 }
 0x121   :  { %v1728_v57 = vpop.permute.xlu1 %1727  ;;  %v2415_v58 = vpop.permute.xlu0 %2414 }
 0x122   :  { %v2423_v59 = vsel %vm1892_vm7, %v2413_v53, %v2415_v58  ;;  %v1736_v6 = vsel %vm1731_vm6, %v1726_v54, %v1728_v57 }
 0x123   :  { %2476 = vmatprep.subr.bf16.mxu1 %v2423_v59  ;;  %2816 = vmatmul.mubr.msk.bf16.vlgmr.msra.gmra.mrb[16].mxu0 %vm79_vm2, %v2814_v49 }
 0x124   :  { %2477 = vmatpush1.bf16.msra.mxu1 %v2422_v60  ;;  %1861 = vmatprep.mubr.bf16.mxu0 %v3065_v1 }
 0x125   :  { %v2417_v61 = vpop.permute.xlu1 %2416  ;;  %v1730_v62 = vpop.permute.xlu0 %1729 }
 0x126   :  { %v1737_v63 = vsel %vm1731_vm6, %v1728_v57, %v1730_v62  ;;  %v2424_v12 = vsel %vm1892_vm7, %v2415_v58, %v2417_v61 }
 0x127   :  { %1829 = vmatprep.subr.bf16.mxu0 %v1737_v63  ;;  %2842 = vmatmul.mubr.msk.bf16.vlgmr.msra.gmra.mrb[16].mxu1 %vm79_vm2, %v2840_v52 }
 0x128   :  { %1830 = vmatpush1.bf16.msra.mxu0 %v1736_v6  ;;  %2549 = vmatprep.mubr.bf16.mxu1 %v3065_v1 }
 0x129   :  { %v1881_v8 = vpop.permute.xlu1 %1880  ;;  %v2419_v9 = vpop.permute.xlu0 %2418 }
 0x12a   :  { %v2425_v10 = vsel %vm1892_vm7, %v2417_v61, %v2419_v9 }
 0x12b   :  { %2517 = vmatprep.subr.bf16.mxu1 %v2425_v10  ;;  %2817 = vmatmul.mubr.msk.bf16.vlgmr.msra.gmra.mrb[20].mxu0 %vm79_vm2, %v2814_v49 }
 0x12c   :  { %2518 = vmatpush1.bf16.msra.mxu1 %v2424_v12  ;;  %1940 = vmatprep.mubr.bf16.mxu0 %v3065_v1 }
 0x12d   :  { %v2569_v13 = vpop.permute.xlu1 %2568  ;;  %v1883_v14 = vpop.permute.xlu0 %1882 }
 0x12e   :  { %v1894_v15 = vsel %vm1892_vm7, %v1881_v8, %v1883_v14 }
 0x12f   :  { %1908 = vmatprep.subr.bf16.mxu0 %v1894_v15  ;;  %2843 = vmatmul.mubr.msk.bf16.vlgmr.msra.gmra.mrb[20].mxu1 %vm79_vm2, %v2840_v52 }
 0x130   :  { %2628 = vmatprep.mubr.bf16.mxu1 %v3065_v1 }
 0x131   :  { %v1879_v17 = vpop.permute.xlu1 %1878  ;;  %v2571_v18 = vpop.permute.xlu0 %2570 }
 0x132   :  { %v1893_v19 = vsel %vm1892_vm7, %v1879_v17, %v1881_v8  ;;  %v2582_v20 = vsel %vm2580_vm8, %v2569_v13, %v2571_v18 }
 0x133   :  { %1909 = vmatpush1.bf16.msra.mxu0 %v1893_v19  ;;  %2596 = vmatprep.subr.bf16.mxu1 %v2582_v20 }
 0x135   :  { %v1885_v22 = vpop.permute.xlu1 %1884  ;;  %v2567_v23 = vpop.permute.xlu0 %2566 }
 0x136   :  { %v2581_v24 = vsel %vm2580_vm8, %v2567_v23, %v2569_v13  ;;  %2819 = vmatmul.mubr.msk.bf16.vlgmr.msra.gmra.mrb[12].mxu0 %vm79_vm2, %v2818_v21  ;;  %v1895_v29 = vsel %vm1892_vm7, %v1883_v14, %v1885_v22 }
 0x137   :  { %2597 = vmatpush1.bf16.msra.mxu1 %v2581_v24  ;;  %1981 = vmatprep.mubr.bf16.mxu0 %v3065_v1 }
 0x139   :  { %v2573_v26 = vpop.permute.xlu1 %2572  ;;  %v1887_v27 = vpop.permute.xlu0 %1886 }
 0x13a   :  { %2845 = vmatmul.mubr.msk.bf16.vlgmr.msra.gmra.mrb[12].mxu1 %vm79_vm2, %v2844_v25  ;;  %v1896_v28 = vsel %vm1892_vm7, %v1885_v22, %v1887_v27  ;;  %v2583_v32 = vsel %vm2580_vm8, %v2571_v18, %v2573_v26 }
 0x13b   :  { %1949 = vmatprep.subr.bf16.mxu0 %v1896_v28  ;;  %2669 = vmatprep.mubr.bf16.mxu1 %v3065_v1 }
 0x13c   :  { %1950 = vmatpush1.bf16.msra.mxu0 %v1895_v29 }
 0x13d   :  { %v2575_v30 = vpop.permute.xlu0 %2574  ;;  %v1889_v0 = vpop.permute.xlu1 %1888 }
 0x13e   :  { %v2584_v31 = vsel %vm2580_vm8, %v2573_v26, %v2575_v30  ;;  %v1897_v2 = vsel %vm1892_vm7, %v1887_v27, %v1889_v0 }
 0x13f   :  { %2820 = vmatmul.mubr.msk.bf16.vlgmr.msra.gmra.mrb[16].mxu0 %vm79_vm2, %v2818_v21  ;;  %2637 = vmatprep.subr.bf16.mxu1 %v2584_v31 }
 0x140   :  { %2638 = vmatpush1.bf16.msra.mxu1 %v2583_v32  ;;  %2022 = vmatprep.mubr.bf16.mxu0 %v3065_v1 }
 0x141   :  { %v1891_v33 = vpop.permute.xlu0 %1890  ;;  %v2577_v35 = vpop.permute.xlu1 %2576 }
 0x142   :  { %v1898_v34 = vsel %vm1892_vm7, %v1889_v0, %v1891_v33  ;;  %v2585_v37 = vsel %vm2580_vm8, %v2575_v30, %v2577_v35 }
 0x143   :  { %1990 = vmatprep.subr.bf16.mxu0 %v1898_v34  ;;  %2846 = vmatmul.mubr.msk.bf16.vlgmr.msra.gmra.mrb[16].mxu1 %vm79_vm2, %v2844_v25 }
 0x144   :  { %1991 = vmatpush1.bf16.msra.mxu0 %v1897_v2  ;;  %2710 = vmatprep.mubr.bf16.mxu1 %v3065_v1 }
 0x145   :  { %v2579_v36 = vpop.permute.xlu0 %2578 }
 0x146   :  { %v2586_v3 = vsel %vm2580_vm8, %v2577_v35, %v2579_v36 }
 0x147   :  { %2821 = vmatmul.mubr.msk.bf16.vlgmr.msra.gmra.mrb[20].mxu0 %vm79_vm2, %v2818_v21  ;;  %2678 = vmatprep.subr.bf16.mxu1 %v2586_v3 }
 0x148   :  { %2679 = vmatpush1.bf16.msra.mxu1 %v2585_v37 }
 0x14b   :  { %2847 = vmatmul.mubr.msk.bf16.vlgmr.msra.gmra.mrb[20].mxu1 %vm79_vm2, %v2844_v25 }
 0x19c   :  { %v565_v38 = vpop.f32.mrb[0].mxu0 }
 0x19d   :  { %3017 = vtanh.f32 %v565_v38  ;;  %v567_v39 = vpop.f32.mrb[1].mxu0 }
 0x19e   :  { %3019 = vtanh.f32 %v567_v39  ;;  %v569_v40 = vpop.f32.mrb[2].mxu0 }
 0x19f   :  { %v1253_v5 = vpop.f32.mrb[0].mxu1  ;;  %v570_v41 = vpop.f32.mrb[3].mxu0 }
 0x1a0   :  { %3021 = vtanh.f32 %v1253_v5  ;;  %v1255_v1 = vpop.f32.mrb[1].mxu1 }
 0x1a1   :  { %3023 = vtanh.f32 %v1255_v1  ;;  %v1257_v42 = vpop.f32.mrb[2].mxu1 }
 0x1a2   :  { %v1258_v43 = vpop.f32.mrb[3].mxu1 }
 0x1a4   :  { %v606_v4 = vpop.f32.mrb[4].mxu0 }
 0x1a5   :  { %3025 = vtanh.f32 %v606_v4  ;;  %v608_v44 = vpop.f32.mrb[5].mxu0 }
 0x1a6   :  { %3027 = vtanh.f32 %v608_v44  ;;  %v610_v45 = vpop.f32.mrb[6].mxu0 }
 0x1a7   :  { %v3018_v46 = vpop.eup %3017  ;;  %v1294_v7 = vpop.f32.mrb[4].mxu1 }
 0x1a8   :  { %v611_v11 = vpop.f32.mrb[7].mxu0  ;;  %v3020_v47 = vpop.eup %3019  ;;  %3029 = vtanh.f32 %v1294_v7 }
 0x1a9   :  { %v1296_v48 = vpop.f32.mrb[5].mxu1  ;;  %v672_v49 = vcombine.low %v3018_v46, %v3020_v47 }
 0x1aa   :  { %3031 = vtanh.f32 %v1296_v48  ;;  %v1298_v50 = vpop.f32.mrb[6].mxu1  ;;  %v3022_v51 = vpop.eup %3021 }
 0x1ab   :  { %v1299_v16 = vpop.f32.mrb[7].mxu1  ;;  %v3024_v52 = vpop.eup %3023  ;;  %678 = vst [vmem:[%s3595_s2] sm:$0x77] %v672_v49 }
 0x1ac   :  { %v1360_v53 = vcombine.low %v3022_v51, %v3024_v52  ;;  %v647_v54 = vpop.f32.mrb[8].mxu0 }
 0x1ad   :  { %3033 = vtanh.f32 %v647_v54  ;;  %v649_v55 = vpop.f32.mrb[9].mxu0 }
 0x1ae   :  { %2796 = vst [vmem:[%s3595_s2 + $0x18] sm:$0x77] %v1360_v53  ;;  %3035 = vtanh.f32 %v649_v55  ;;  %v651_v56 = vpop.f32.mrb[10].mxu0 }
 0x1af   :  { %v3026_v57 = vpop.eup %3025  ;;  %v1335_v58 = vpop.f32.mrb[8].mxu1 }
 0x1b0   :  { %v652_v59 = vpop.f32.mrb[11].mxu0  ;;  %v3028_v60 = vpop.eup %3027  ;;  %3037 = vtanh.f32 %v1335_v58 }
 0x1b1   :  { %v1337_v61 = vpop.f32.mrb[9].mxu1  ;;  %v673_v62 = vcombine.low %v3026_v57, %v3028_v60 }
 0x1b2   :  { %3039 = vtanh.f32 %v1337_v61  ;;  %v1339_v63 = vpop.f32.mrb[10].mxu1  ;;  %v3030_v6 = vpop.eup %3029 }
 0x1b3   :  { %v1340_v8 = vpop.f32.mrb[11].mxu1  ;;  %679 = vst [vmem:[%s3595_s2 + $0x8] sm:$0x77] %v673_v62 }
 0x1b4   :  { %v3032_v9 = vpop.eup %3031 }
 0x1b5   :  { %v1361_v10 = vcombine.low %v3030_v6, %v3032_v9 }
 0x1b7   :  { %2797 = vst [vmem:[%s3595_s2 + $0x20] sm:$0x77] %v1361_v10  ;;  %v3034_v12 = vpop.eup %3033 }
 0x1b8   :  { %v3036_v13 = vpop.eup %3035 }
 0x1b9   :  { %v674_v14 = vcombine.low %v3034_v12, %v3036_v13 }
 0x1ba   :  { %v3038_v15 = vpop.eup %3037 }
 0x1bb   :  { %680 = vst [vmem:[%s3595_s2 + $0x10] sm:$0x77] %v674_v14 }
 0x1bc   :  { %v3040_v17 = vpop.eup %3039 }
 0x1bd   :  { %v1362_v18 = vcombine.low %v3038_v15, %v3040_v17 }
 0x1bf   :  { %2798 = vst [vmem:[%s3595_s2 + $0x28] sm:$0x77] %v1362_v18 }
 0x209   :  { %v1942_v19 = vpop.f32.mrb[12].mxu0 }
 0x20a   :  { %3041 = vtanh.f32 %v1942_v19  ;;  %v1944_v20 = vpop.f32.mrb[13].mxu0 }
 0x20b   :  { %3043 = vtanh.f32 %v1944_v20  ;;  %v1946_v21 = vpop.f32.mrb[14].mxu0 }
 0x20c   :  { %v1947_v22 = vpop.f32.mrb[15].mxu0 }
 0x20d   :  { %v2630_v23 = vpop.f32.mrb[12].mxu1 }
 0x20e   :  { %3045 = vtanh.f32 %v2630_v23  ;;  %v2632_v24 = vpop.f32.mrb[13].mxu1 }
 0x20f   :  { %3047 = vtanh.f32 %v2632_v24  ;;  %v2634_v25 = vpop.f32.mrb[14].mxu1 }
 0x210   :  { %v2635_v26 = vpop.f32.mrb[15].mxu1 }
 0x212   :  { %v1983_v27 = vpop.f32.mrb[16].mxu0 }
 0x213   :  { %3049 = vtanh.f32 %v1983_v27  ;;  %v1985_v28 = vpop.f32.mrb[17].mxu0 }
 0x214   :  { %v3042_v29 = vpop.eup %3041  ;;  %3051 = vtanh.f32 %v1985_v28  ;;  %v1987_v30 = vpop.f32.mrb[18].mxu0 }
 0x215   :  { %v3044_v0 = vpop.eup %3043  ;;  %v1988_v31 = vpop.f32.mrb[19].mxu0 }
 0x216   :  { %v2049_v32 = vcombine.low %v3042_v29, %v3044_v0  ;;  %v2671_v33 = vpop.f32.mrb[16].mxu1 }
 0x217   :  { %3053 = vtanh.f32 %v2671_v33  ;;  %v2673_v34 = vpop.f32.mrb[17].mxu1 }
 0x218   :  { %v3046_v2 = vpop.eup %3045  ;;  %2822 = vst [vmem:[%s3595_s2 + $0x30] sm:$0x77] %v2049_v32  ;;  %3055 = vtanh.f32 %v2673_v34  ;;  %v2675_v35 = vpop.f32.mrb[18].mxu1 }
 0x219   :  { %v3048_v36 = vpop.eup %3047  ;;  %v2676_v3 = vpop.f32.mrb[19].mxu1 }
 0x21a   :  { %v2737_v37 = vcombine.low %v3046_v2, %v3048_v36  ;;  %v2024_v38 = vpop.f32.mrb[20].mxu0 }
 0x21b   :  { %3057 = vtanh.f32 %v2024_v38  ;;  %v2026_v39 = vpop.f32.mrb[21].mxu0 }
 0x21c   :  { %2848 = vst [vmem:[%s3595_s2 + $0x48] sm:$0x77] %v2737_v37  ;;  %3059 = vtanh.f32 %v2026_v39  ;;  %v2028_v40 = vpop.f32.mrb[22].mxu0 }
 0x21d   :  { %v3050_v5 = vpop.eup %3049  ;;  %v2029_v41 = vpop.f32.mrb[23].mxu0 }
 0x21e   :  { %v3052_v1 = vpop.eup %3051  ;;  %v2712_v42 = vpop.f32.mrb[20].mxu1 }
 0x21f   :  { %v2050_v43 = vcombine.low %v3050_v5, %v3052_v1  ;;  %3061 = vtanh.f32 %v2712_v42  ;;  %v2714_v4 = vpop.f32.mrb[21].mxu1 }
 0x220   :  { %3063 = vtanh.f32 %v2714_v4  ;;  %v2716_v44 = vpop.f32.mrb[22].mxu1 }
 0x221   :  { %v3054_v45 = vpop.eup %3053  ;;  %2823 = vst [vmem:[%s3595_s2 + $0x38] sm:$0x77] %v2050_v43  ;;  %v2717_v46 = vpop.f32.mrb[23].mxu1 }
 0x222   :  { %v3056_v7 = vpop.eup %3055 }
 0x223   :  { %v2738_v11 = vcombine.low %v3054_v45, %v3056_v7 }
 0x225   :  { %v3058_v47 = vpop.eup %3057  ;;  %2849 = vst [vmem:[%s3595_s2 + $0x50] sm:$0x77] %v2738_v11 }
 0x226   :  { %v3060_v48 = vpop.eup %3059 }
 0x227   :  { %v2051_v49 = vcombine.low %v3058_v47, %v3060_v48 }
 0x229   :  { %v3062_v50 = vpop.eup %3061  ;;  %2824 = vst [vmem:[%s3595_s2 + $0x40] sm:$0x77] %v2051_v49 }
 0x22a   :  { %v3064_v51 = vpop.eup %3063 }
 0x22b   :  { %v2739_v16 = vcombine.low %v3062_v50, %v3064_v51 }
 0x22d   :  { %2850 = vst [vmem:[%s3595_s2 + $0x58] sm:$0x77] %v2739_v16 }

</bundles_post_ra>
